<compile_context>
chip_gen: v5e
topology: v5e:2x2
jax: 0.10.0
libtpu: 0.0.40
codegen_flags: <defaults>
</compile_context>

<pallas_src>
import functools
import math

import jax
import jax.numpy as jnp
from jax.experimental import pallas as pl
from jax.experimental.pallas import tpu as pltpu

LN_EPS = 1e-5                      # PyTorch nn.LayerNorm default
L2_EPS = 1e-12                     # guards x / ||x|| against all-zero rows
DTYPE = jnp.bfloat16               # storage dtype for weights / activations


def _vmem_limit_bytes(default=48 * 1024 * 1024):
    """Per-chip VMEM budget: ~100 MiB on 128-MiB chips (v5e/v6e), 48 MiB on v7x."""
    try:
        cap = int(pltpu.get_tpu_info().vmem_capacity_bytes)
    except Exception:
        return default
    return max(default, min(cap - 16 * 1024 * 1024, 100 * 1024 * 1024))


VMEM_LIMIT = _vmem_limit_bytes()

_MM_PARAMS = pltpu.CompilerParams(
    dimension_semantics=("parallel", "parallel"),
    vmem_limit_bytes=VMEM_LIMIT)


def _pick_tn(n, cap=1024, align=128):
    """Largest `align`-multiple divisor of n that is <= cap (full dim if small)."""
    if n <= cap:
        return n
    t = (cap // align) * align
    while t >= align:
        if n % t == 0:
            return t
        t -= align
    return cap  # no friendly divisor; remainder blocks are masked by Pallas.


# ------------------------- fused linear Pallas kernel -------------------------

def _fused_linear_kernel(*refs, has_bias, has_ln, has_res, activation):
    it = iter(refs)
    x_ref = next(it)
    w_ref = next(it)
    b_ref = next(it) if has_bias else None
    g_ref = next(it) if has_ln else None
    beta_ref = next(it) if has_ln else None
    r_ref = next(it) if has_res else None
    o_ref = next(it)

    x = x_ref[...]
    if has_ln:                                    # fused pre-LayerNorm (f32 math)
        # Re-runs once per N-tile of the same rows: ~1/tn of the matmul cost,
        # negligible at tn >= 768.  Remainder-M rows are garbage but are never
        # written back (Pallas masks the store).
        xf = x.astype(jnp.float32)
        mu = jnp.mean(xf, axis=-1, keepdims=True)
        xc = xf - mu
        var = jnp.mean(xc * xc, axis=-1, keepdims=True)
        x = xc * jax.lax.rsqrt(var + LN_EPS)
        x = x * g_ref[...].astype(jnp.float32) + beta_ref[...].astype(jnp.float32)
    # bf16 operands into the MXU, f32 accumulation.
    acc = jnp.dot(x.astype(w_ref.dtype), w_ref[...],
                  preferred_element_type=jnp.float32)
    if has_bias:
        acc = acc + b_ref[...].astype(jnp.float32)
    if activation == "quick_gelu":                # fused QuickGELU epilogue
        acc = acc * jax.nn.sigmoid(1.702 * acc)
    if has_res:                                   # fused residual add epilogue
        acc = acc + r_ref[...].astype(jnp.float32)
    o_ref[...] = acc.astype(o_ref.dtype)


def fused_linear(x, w, b=None, *, ln_gamma=None, ln_beta=None, residual=None,
                 activation=None, out_dtype=None, tm_cap=512, tn_cap=1024):
    """y = [residual +] [quick_gelu]( [LN](x) @ w [+ b] )   (x: (M,K), w: (K,N)).

    Grid is (N-tiles, M-tiles) with M innermost so the weight tile stays
    resident across the inner loop: W is streamed from HBM exactly once, x is
    re-read only N/tn times (arithmetic intensity per x byte = tn FLOP/B).
    K is not tiled: the full-K x row is what makes the LayerNorm prologue
    fusable, and at CLIP sizes (K <= 4096 bf16) the double-buffered working set
    is ~28 MiB at tm=512/tn=1024 -- inside the per-chip VMEM budget.
    """
    M, K = x.shape
    Kw, N = w.shape
    assert K == Kw
    out_dtype = out_dtype if out_dtype is not None else x.dtype

    tm = M if M <= tm_cap else tm_cap            # remainder M blocks are masked
    tn = _pick_tn(N, tn_cap)
    grid = (pl.cdiv(N, tn), pl.cdiv(M, tm))      # M innermost -> W resident

    has_bias = b is not None
    has_ln = ln_gamma is not None
    has_res = residual is not None

    inputs = [x, w]
    in_specs = [pl.BlockSpec((tm, K), lambda j, i: (i, 0)),
                pl.BlockSpec((K, tn), lambda j, i: (0, j))]
    if has_bias:
        inputs.append(b.reshape(1, N))
        in_specs.append(pl.BlockSpec((1, tn), lambda j, i: (0, j)))
    if has_ln:
        inputs += [ln_gamma.reshape(1, K), ln_beta.reshape(1, K)]
        in_specs += [pl.BlockSpec((1, K), lambda j, i: (0, 0)),
                     pl.BlockSpec((1, K), lambda j, i: (0, 0))]
    if has_res:
        inputs.append(residual)
        in_specs.append(pl.BlockSpec((tm, tn), lambda j, i: (i, j)))

    kernel = functools.partial(_fused_linear_kernel, has_bias=has_bias,
                               has_ln=has_ln, has_res=has_res,
                               activation=activation)
    return pl.pallas_call(
        kernel,
        out_shape=jax.ShapeDtypeStruct((M, N), out_dtype),
        grid=grid,
        in_specs=in_specs,
        out_specs=pl.BlockSpec((tm, tn), lambda j, i: (i, j)),
        compiler_params=_MM_PARAMS,
    )(*inputs)


# --------------------------- standalone LayerNorm ----------------------------
# Only used for ln_pre (its output is the residual stream, so it cannot be
# folded into a following matmul).

def _layernorm_kernel(x_ref, g_ref, b_ref, o_ref):
    x = x_ref[...].astype(jnp.float32)
    mu = jnp.mean(x, axis=-1, keepdims=True)
    xc = x - mu
    var = jnp.mean(xc * xc, axis=-1, keepdims=True)
    y = xc * jax.lax.rsqrt(var + LN_EPS)
    o_ref[...] = (y * g_ref[...].astype(jnp.float32)
                  + b_ref[...].astype(jnp.float32)).astype(o_ref.dtype)


def pallas_layernorm(x, gamma, beta, *, tm_cap=1024):
    M, D = x.shape
    tm = M if M <= tm_cap else tm_cap
    return pl.pallas_call(
        _layernorm_kernel,
        out_shape=jax.ShapeDtypeStruct((M, D), x.dtype),
        grid=(pl.cdiv(M, tm),),
        in_specs=[pl.BlockSpec((tm, D), lambda i: (i, 0)),
                  pl.BlockSpec((1, D), lambda i: (0, 0)),
                  pl.BlockSpec((1, D), lambda i: (0, 0))],
        out_specs=pl.BlockSpec((tm, D), lambda i: (i, 0)),
        compiler_params=pltpu.CompilerParams(
            dimension_semantics=("parallel",), vmem_limit_bytes=VMEM_LIMIT),
    )(x, gamma.reshape(1, D), beta.reshape(1, D))


# ------------------------------ attention kernel ------------------------------
# grid = (B, q-tiles): K/V (the full (1, S, 3D) qkv slab) stays resident across
# the q-tile axis, the q rows (only the first D columns) stream per tile, and
# every head's output is stored straight into its lane slice of o_ref as soon
# as it is computed -- no concat epilogue, live state bounded to one head's
# (tq, S) score matrix.  No JAX-side split_heads transposes anywhere.

def _attention_kernel(q_ref, kv_ref, o_ref, *, heads, scale):
    # q_ref: (1, tq, D), kv_ref: (1, S, 3D), o_ref: (1, tq, D)
    D = q_ref.shape[2]
    Dh = D // heads
    for h in range(heads):                        # static offsets, one head live
        q = q_ref[0, :, h * Dh:(h + 1) * Dh]
        k = kv_ref[0, :, D + h * Dh:D + (h + 1) * Dh]
        v = kv_ref[0, :, 2 * D + h * Dh:2 * D + (h + 1) * Dh]
        # q @ k^T contracting head_dim, bf16 operands -> f32 accumulator.
        s = jax.lax.dot_general(q, k, (((1,), (1,)), ((), ())),
                                preferred_element_type=jnp.float32) * scale
        s = s - jnp.max(s, axis=-1, keepdims=True)
        p = jnp.exp(s)
        p = p * pl.reciprocal(jnp.sum(p, axis=-1, keepdims=True), approx=True)
        out_h = jnp.dot(p.astype(v.dtype), v, preferred_element_type=jnp.float32)
        o_ref[0, :, h * Dh:(h + 1) * Dh] = out_h.astype(o_ref.dtype)
    # TODO(synk): batching the per-head (Dh=64-deep) q@k^T dots into a single
    # leading-batch einsum needs a head-major qkv layout (an extra HBM
    # transpose of qkv); kept per-head to bound live state and avoid it.


def pallas_attention(qkv, heads, scale, *, tq_cap=256):
    """qkv: (B, S, 3D) -> (B, S, D) multi-head self-attention output."""
    B, S, D3 = qkv.shape
    D = D3 // 3
    tq = S if S <= tq_cap else tq_cap
    kern = functools.partial(_attention_kernel, heads=heads, scale=scale)
    return pl.pallas_call(
        kern,
        out_shape=jax.ShapeDtypeStruct((B, S, D), qkv.dtype),
        grid=(B, pl.cdiv(S, tq)),
        in_specs=[pl.BlockSpec((1, tq, D), lambda b, qi: (b, qi, 0)),   # q rows
                  pl.BlockSpec((1, S, D3), lambda b, qi: (b, 0, 0))],   # resident K/V
        out_specs=pl.BlockSpec((1, tq, D), lambda b, qi: (b, qi, 0)),
        compiler_params=pltpu.CompilerParams(
            dimension_semantics=("parallel", "parallel"),
            vmem_limit_bytes=VMEM_LIMIT),
    )(qkv, qkv)


# ------------------------- fused score-combining head -------------------------

def _score_combine_kernel(s1_ref, s2_ref, o_ref, *, norm_pred):
    s1 = s1_ref[...].astype(jnp.float32)
    s2 = s2_ref[...].astype(jnp.float32)
    if norm_pred:
        s1 = s1 * jax.lax.rsqrt(jnp.sum(s1 * s1, axis=-1, keepdims=True) + L2_EPS)
        s2 = s2 * jax.lax.rsqrt(jnp.sum(s2 * s2, axis=-1, keepdims=True) + L2_EPS)
    o_ref[...] = (0.5 * (s1 + s2)).astype(o_ref.dtype)


def pallas_score_combine(score1, score2, norm_pred):
    kern = functools.partial(_score_combine_kernel, norm_pred=norm_pred)
    return pl.pallas_call(
        kern, out_shape=jax.ShapeDtypeStruct(score1.shape, jnp.float32),
    )(score1, score2)


# -------------------------------- model (glue) --------------------------------

def init_params(key, *, img=32, patch=16, in_ch=3, width=128, heads=4,
                layers=2, out_dim=64, topk=3, dtype=DTYPE):
    n_patches = (img // patch) ** 2
    seq = n_patches + 1
    ks = jax.random.split(key, 4)

    def nrm(k, shape, scale=0.02):
        return (scale * jax.random.normal(k, shape)).astype(dtype)

    params = dict(
        # conv1 (kernel==stride==patch, bias=False) lowered to a matmul; to load
        # real CLIP weights use conv1.weight.reshape(width, C*P*P).T so column
        # order matches the (C, P, P) patch flattening used below.
        conv_w=nrm(ks[0], (in_ch * patch * patch, width)),
        class_embedding=nrm(ks[1], (width,)),
        positional_embedding=nrm(ks[2], (seq, width)),
        ln_pre_g=jnp.ones((width,), jnp.float32),
        ln_pre_b=jnp.zeros((width,), jnp.float32),
        ln_post_g=jnp.ones((width,), jnp.float32),
        ln_post_b=jnp.zeros((width,), jnp.float32),
        proj_dist=nrm(ks[3], (width, out_dim)),       # clip_model.visual.proj
    )
    blocks = []
    for li in range(layers):
        bk = jax.random.split(jax.random.fold_in(key, 100 + li), 4)
        blocks.append(dict(
            ln1_g=jnp.ones((width,), jnp.float32),
            ln1_b=jnp.zeros((width,), jnp.float32),
            in_w=nrm(bk[0], (width, 3 * width)),      # MHA in_proj_weight.T
            in_b=jnp.zeros((3 * width,), jnp.float32),
            out_w=nrm(bk[1], (width, width)),         # MHA out_proj.weight.T
            out_b=jnp.zeros((width,), jnp.float32),
            ln2_g=jnp.ones((width,), jnp.float32),
            ln2_b=jnp.zeros((width,), jnp.float32),
            fc_w=nrm(bk[2], (width, 4 * width)),      # mlp.c_fc
            fc_b=jnp.zeros((4 * width,), jnp.float32),
            cproj_w=nrm(bk[3], (4 * width, width)),   # mlp.c_proj
            cproj_b=jnp.zeros((width,), jnp.float32),
        ))
    params['blocks'] = blocks
    # NOTE: the torch module also defines self.projection (fc1/tanh/fc2) but it
    # is never used in forward(); we mirror that by not materializing it.
    cfg = dict(img=img, patch=patch, width=width, heads=heads,
               out_dim=out_dim, topk=topk)
    return cfg, params


def residual_attention_block(p, x2, B, S, heads):
    """Operates on the flat (B*S, D) residual stream (bf16)."""
    D = x2.shape[-1]
    Dh = D // heads
    # qkv = ln_1(x) @ in_w + in_b              (LN fused as matmul prologue)
    qkv = fused_linear(x2, p['in_w'], p['in_b'],
                       ln_gamma=p['ln1_g'], ln_beta=p['ln1_b'])
    attn = pallas_attention(qkv.reshape(B, S, 3 * D), heads,
                            1.0 / math.sqrt(Dh)).reshape(B * S, D)
    # x = x + attn @ out_w + out_b             (residual fused in epilogue)
    x2 = fused_linear(attn, p['out_w'], p['out_b'], residual=x2)
    # h = quick_gelu(ln_2(x) @ fc_w + fc_b)    (LN prologue + GeLU epilogue fused)
    h = fused_linear(x2, p['fc_w'], p['fc_b'],
                     ln_gamma=p['ln2_g'], ln_beta=p['ln2_b'],
                     activation="quick_gelu")
    # x = x + h @ cproj_w + cproj_b            (residual fused in epilogue)
    x2 = fused_linear(h, p['cproj_w'], p['cproj_b'], residual=x2)
    return x2


def forward_features(cfg, params, x):
    """Patch embed + transformer.  Returns the hidden states BEFORE ln_post as a
    flat (B*S, D) bf16 tensor; ln_post is fused into the projection matmul."""
    B, C, H, W = x.shape
    P = cfg['patch']
    D = cfg['width']
    Gy, Gx = H // P, W // P
    # conv1 (kernel==stride==P, bias=False) == patchify + matmul (no bias path).
    patches = (x.reshape(B, C, Gy, P, Gx, P)
                .transpose(0, 2, 4, 1, 3, 5)
                .reshape(B * Gy * Gx, C * P * P)).astype(DTYPE)
    tok = fused_linear(patches, params['conv_w']).reshape(B, Gy * Gx, D)
    cls = jnp.broadcast_to(params['class_embedding'].reshape(1, 1, D), (B, 1, D))
    h = jnp.concatenate([cls, tok], axis=1)               # (B, S, D) bf16
    h = h + params['positional_embedding'][None]
    S = h.shape[1]
    h2 = pallas_layernorm(h.reshape(B * S, D),
                          params['ln_pre_g'], params['ln_pre_b'])
    for blk in params['blocks']:
        h2 = residual_attention_block(blk, h2, B, S, cfg['heads'])
    return h2, S


def clip_vit_forward(cfg, params, x, label_embed, norm_pred=True):
    B = x.shape[0]
    out_dim = cfg['out_dim']
    h2, S = forward_features(cfg, params, x)               # (B*S, D) pre-ln_post
    Np = S - 1

    # ln_post fused into the shared projection_dist matmul; kept in bf16 so the
    # CLS / patch splits below move half the bytes.  Token 0 -> dist_feat,
    # tokens 1: -> pred_feat (identical math to the torch code).
    proj = fused_linear(h2, params['proj_dist'],
                        ln_gamma=params['ln_post_g'], ln_beta=params['ln_post_b'],
                        out_dtype=DTYPE).reshape(B, S, out_dim)
    dist_feat = proj[:, 0]                                  # (B, out_dim) bf16
    pred_feat = proj[:, 1:]                                 # (B, Np, out_dim) bf16

    # bf16 operands into the MXU for the score head, f32 accumulation.
    label_w = jnp.transpose(label_embed).astype(DTYPE)              # (out_dim, L)
    logits = fused_linear(pred_feat.reshape(B * Np, out_dim), label_w,
                          out_dtype=jnp.float32).reshape(B, Np, -1)
    # TODO(synk): torch.topk has no clean Pallas lowering; computed with
    # jax.lax.top_k glue on the tiny (B, L, Np) logits tensor.
    topv = jax.lax.top_k(jnp.transpose(logits, (0, 2, 1)), cfg['topk'])[0]
    score1 = jnp.mean(topv, axis=-1)                         # (B, L) f32
    score2 = fused_linear(dist_feat, label_w, out_dtype=jnp.float32)  # (B, L)
    # fused l2-normalize (rsqrt + eps) and averaging in one tiny kernel.
    score = pallas_score_combine(score1, score2, norm_pred)
    return score, pred_feat, dist_feat


if __name__ == "__main__":
    key = jax.random.PRNGKey(0)
    kp, kx, kl = jax.random.split(key, 3)

    B, C, IMG, PATCH = 2, 3, 32, 16            # -> 2x2 = 4 patches, seq = 5
    WIDTH, HEADS, LAYERS, OUT_DIM = 128, 4, 2, 64
    N_LABELS, TOPK = 16, 3

    cfg, params = init_params(kp, img=IMG, patch=PATCH, in_ch=C, width=WIDTH,
                              heads=HEADS, layers=LAYERS, out_dim=OUT_DIM,
                              topk=TOPK)
    x = jax.random.normal(kx, (B, C, IMG, IMG), jnp.float32)
    label_embed = 0.1 * jax.random.normal(kl, (N_LABELS, OUT_DIM), jnp.float32)

    fwd = jax.jit(functools.partial(clip_vit_forward, cfg))
    score, pred_feat, dist_feat = fwd(params, x, label_embed)
    jax.block_until_ready((score, pred_feat, dist_feat))

    assert score.shape == (B, N_LABELS)
    assert pred_feat.shape == (B, (IMG // PATCH) ** 2, OUT_DIM)
    assert dist_feat.shape == (B, OUT_DIM)
    assert bool(jnp.all(jnp.isfinite(score)))
    assert bool(jnp.all(jnp.isfinite(pred_feat.astype(jnp.float32))))
    print("KERNEL_OK")
</pallas_src>

<mosaic_0001>
module attributes {stable_mosaic.version = 11 : i64} {
  func.func @_fused_linear_kernel(%arg0: i32, %arg1: i32, %arg2: memref<8x768xbf16, #tpu.memory_space<vmem>>, %arg3: memref<768x128xbf16, #tpu.memory_space<vmem>>, %arg4: memref<8x128xbf16, #tpu.memory_space<vmem>>) attributes {dimension_semantics = [#tpu.dimension_semantics<parallel>, #tpu.dimension_semantics<parallel>], iteration_bounds = array<i64: 1, 1>, scalar_prefetch = 0 : i64, scratch_operands = 0 : i64, tpu.core_type = #tpu.core_type<tc>, window_params = [{transform_indices = @transform_0, window_bounds = array<i64: 8, 768>}, {transform_indices = @transform_1, window_bounds = array<i64: 768, 128>}, {transform_indices = @transform_2, window_bounds = array<i64: 8, 128>}]} {
    %c0 = arith.constant 0 : index
    %c0_0 = arith.constant 0 : index
    %0 = vector.load %arg2[%c0, %c0_0] : memref<8x768xbf16, #tpu.memory_space<vmem>>, vector<8x768xbf16>
    %c0_1 = arith.constant 0 : index
    %c0_2 = arith.constant 0 : index
    %1 = vector.load %arg3[%c0_1, %c0_2] : memref<768x128xbf16, #tpu.memory_space<vmem>>, vector<768x128xbf16>
    %cst = arith.constant dense<0.000000e+00> : vector<8x128xf32>
    %2 = tpu.matmul %0, %1, %cst {dimension_numbers = #tpu.dot_dimension_numbers<[1], [0], [0], [1], [0, 0, 1, 1], [], []>} : vector<8x768xbf16>, vector<768x128xbf16>, vector<8x128xf32> -> vector<8x128xf32>
    %3 = arith.truncf %2 : vector<8x128xf32> to vector<8x128xbf16>
    %c0_3 = arith.constant 0 : index
    %c0_4 = arith.constant 0 : index
    %4 = vector.load %arg4[%c0_3, %c0_4] : memref<8x128xbf16, #tpu.memory_space<vmem>>, vector<8x128xbf16>
    tpu.vector_store %arg4[%c0_3, %c0_4], %3 {strides = array<i32>} : memref<8x128xbf16, #tpu.memory_space<vmem>>, vector<8x128xbf16>,
    return
  }
  func.func @transform_0(%arg0: i32, %arg1: i32) -> (i32, i32) {
    %c0_i32 = arith.constant 0 : i32
    %c0_i32_0 = arith.constant 0 : i32
    return %arg1, %c0_i32 : i32, i32
  }
  func.func @transform_1(%arg0: i32, %arg1: i32) -> (i32, i32) {
    %c0_i32 = arith.constant 0 : i32
    %c0_i32_0 = arith.constant 0 : i32
    return %c0_i32, %arg0 : i32, i32
  }
  func.func @transform_2(%arg0: i32, %arg1: i32) -> (i32, i32) {
    %c0_i32 = arith.constant 0 : i32
    return %arg1, %arg0 : i32, i32
  }
}

module attributes {stable_mosaic.version = 11 : i64} {
  func.func @_layernorm_kernel(%arg0: i32, %arg1: memref<10x128xbf16, #tpu.memory_space<vmem>>, %arg2: memref<1x128xf32, #tpu.memory_space<vmem>>, %arg3: memref<1x128xf32, #tpu.memory_space<vmem>>, %arg4: memref<10x128xbf16, #tpu.memory_space<vmem>>) attributes {dimension_semantics = [#tpu.dimension_semantics<parallel>], iteration_bounds = array<i64: 1>, scalar_prefetch = 0 : i64, scratch_operands = 0 : i64, tpu.core_type = #tpu.core_type<tc>, window_params = [{transform_indices = @transform_0, window_bounds = array<i64: 10, 128>}, {pipeline_mode = #tpu.pipeline_mode<synchronous>, transform_indices = @transform_1, window_bounds = array<i64: 1, 128>}, {pipeline_mode = #tpu.pipeline_mode<synchronous>, transform_indices = @transform_2, window_bounds = array<i64: 1, 128>}, {transform_indices = @transform_3, window_bounds = array<i64: 10, 128>}]} {
    %c0 = arith.constant 0 : index
    %c0_0 = arith.constant 0 : index
    %0 = vector.load %arg1[%c0, %c0_0] : memref<10x128xbf16, #tpu.memory_space<vmem>>, vector<10x128xbf16>
    %1 = arith.extf %0 : vector<10x128xbf16> to vector<10x128xf32>
    %cst = arith.constant dense<0.000000e+00> : vector<10xf32>
    %2 = vector.multi_reduction <add>, %1, %cst [1] : vector<10x128xf32> to vector<10xf32>
    %3 = vector.shape_cast %2 : vector<10xf32> to vector<10x1xf32>
    %cst_1 = arith.constant 1.280000e+02 : f32
    %4 = vector.broadcast %cst_1 : f32 to vector<10x1xf32>
    %5 = arith.divf %3, %4 : vector<10x1xf32>
    %6 = vector.broadcast %5 : vector<10x1xf32> to vector<10x128xf32>
    %7 = arith.subf %1, %6 : vector<10x128xf32>
    %8 = arith.mulf %7, %7 : vector<10x128xf32>
    %cst_2 = arith.constant dense<0.000000e+00> : vector<10xf32>
    %9 = vector.multi_reduction <add>, %8, %cst_2 [1] : vector<10x128xf32> to vector<10xf32>
    %10 = vector.shape_cast %9 : vector<10xf32> to vector<10x1xf32>
    %cst_3 = arith.constant 1.280000e+02 : f32
    %11 = vector.broadcast %cst_3 : f32 to vector<10x1xf32>
    %12 = arith.divf %10, %11 : vector<10x1xf32>
    %cst_4 = arith.constant 9.99999974E-6 : f32
    %13 = vector.broadcast %cst_4 : f32 to vector<10x1xf32>
    %14 = arith.addf %12, %13 : vector<10x1xf32>
    %15 = math.rsqrt %14 : vector<10x1xf32>
    %16 = vector.broadcast %15 : vector<10x1xf32> to vector<10x128xf32>
    %17 = arith.mulf %7, %16 : vector<10x128xf32>
    %c0_5 = arith.constant 0 : index
    %c0_6 = arith.constant 0 : index
    %18 = vector.load %arg2[%c0_5, %c0_6] : memref<1x128xf32, #tpu.memory_space<vmem>>, vector<1x128xf32>
    %19 = vector.broadcast %18 : vector<1x128xf32> to vector<10x128xf32>
    %20 = arith.mulf %17, %19 : vector<10x128xf32>
    %c0_7 = arith.constant 0 : index
    %c0_8 = arith.constant 0 : index
    %21 = vector.load %arg3[%c0_7, %c0_8] : memref<1x128xf32, #tpu.memory_space<vmem>>, vector<1x128xf32>
    %22 = vector.broadcast %21 : vector<1x128xf32> to vector<10x128xf32>
    %23 = arith.addf %20, %22 : vector<10x128xf32>
    %24 = arith.truncf %23 : vector<10x128xf32> to vector<10x128xbf16>
    %c0_9 = arith.constant 0 : index
    %c0_10 = arith.constant 0 : index
    %25 = vector.load %arg4[%c0_9, %c0_10] : memref<10x128xbf16, #tpu.memory_space<vmem>>, vector<10x128xbf16>
    tpu.vector_store %arg4[%c0_9, %c0_10], %24 {strides = array<i32>} : memref<10x128xbf16, #tpu.memory_space<vmem>>, vector<10x128xbf16>,
    return
  }
  func.func @transform_0(%arg0: i32) -> (i32, i32) {
    %c0_i32 = arith.constant 0 : i32
    %c0_i32_0 = arith.constant 0 : i32
    return %arg0, %c0_i32 : i32, i32
  }
  func.func @transform_1(%arg0: i32) -> (i32, i32) {
    %c0_i32 = arith.constant 0 : i32
    %c0_i32_0 = arith.constant 0 : i32
    %c0_i32_1 = arith.constant 0 : i32
    return %c0_i32, %c0_i32_0 : i32, i32
  }
  func.func @transform_2(%arg0: i32) -> (i32, i32) {
    %c0_i32 = arith.constant 0 : i32
    %c0_i32_0 = arith.constant 0 : i32
    %c0_i32_1 = arith.constant 0 : i32
    return %c0_i32, %c0_i32_0 : i32, i32
  }
  func.func @transform_3(%arg0: i32) -> (i32, i32) {
    %c0_i32 = arith.constant 0 : i32
    %c0_i32_0 = arith.constant 0 : i32
    return %arg0, %c0_i32 : i32, i32
  }
}

module attributes {stable_mosaic.version = 11 : i64} {
  func.func @_fused_linear_kernel(%arg0: i32, %arg1: i32, %arg2: memref<10x128xbf16, #tpu.memory_space<vmem>>, %arg3: memref<128x384xbf16, #tpu.memory_space<vmem>>, %arg4: memref<1x384xf32, #tpu.memory_space<vmem>>, %arg5: memref<1x128xf32, #tpu.memory_space<vmem>>, %arg6: memref<1x128xf32, #tpu.memory_space<vmem>>, %arg7: memref<10x384xbf16, #tpu.memory_space<vmem>>) attributes {dimension_semantics = [#tpu.dimension_semantics<parallel>, #tpu.dimension_semantics<parallel>], iteration_bounds = array<i64: 1, 1>, scalar_prefetch = 0 : i64, scratch_operands = 0 : i64, tpu.core_type = #tpu.core_type<tc>, window_params = [{transform_indices = @transform_0, window_bounds = array<i64: 10, 128>}, {transform_indices = @transform_1, window_bounds = array<i64: 128, 384>}, {transform_indices = @transform_2, window_bounds = array<i64: 1, 384>}, {pipeline_mode = #tpu.pipeline_mode<synchronous>, transform_indices = @transform_3, window_bounds = array<i64: 1, 128>}, {pipeline_mode = #tpu.pipeline_mode<synchronous>, transform_indices = @transform_4, window_bounds = array<i64: 1, 128>}, {transform_indices = @transform_5, window_bounds = array<i64: 10, 384>}]} {
    %c0 = arith.constant 0 : index
    %c0_0 = arith.constant 0 : index
    %0 = vector.load %arg2[%c0, %c0_0] : memref<10x128xbf16, #tpu.memory_space<vmem>>, vector<10x128xbf16>
    %1 = arith.extf %0 : vector<10x128xbf16> to vector<10x128xf32>
    %cst = arith.constant dense<0.000000e+00> : vector<10xf32>
    %2 = vector.multi_reduction <add>, %1, %cst [1] : vector<10x128xf32> to vector<10xf32>
    %3 = vector.shape_cast %2 : vector<10xf32> to vector<10x1xf32>
    %cst_1 = arith.constant 1.280000e+02 : f32
    %4 = vector.broadcast %cst_1 : f32 to vector<10x1xf32>
    %5 = arith.divf %3, %4 : vector<10x1xf32>
    %6 = vector.broadcast %5 : vector<10x1xf32> to vector<10x128xf32>
    %7 = arith.subf %1, %6 : vector<10x128xf32>
    %8 = arith.mulf %7, %7 : vector<10x128xf32>
    %cst_2 = arith.constant dense<0.000000e+00> : vector<10xf32>
    %9 = vector.multi_reduction <add>, %8, %cst_2 [1] : vector<10x128xf32> to vector<10xf32>
    %10 = vector.shape_cast %9 : vector<10xf32> to vector<10x1xf32>
    %cst_3 = arith.constant 1.280000e+02 : f32
    %11 = vector.broadcast %cst_3 : f32 to vector<10x1xf32>
    %12 = arith.divf %10, %11 : vector<10x1xf32>
    %cst_4 = arith.constant 9.99999974E-6 : f32
    %13 = vector.broadcast %cst_4 : f32 to vector<10x1xf32>
    %14 = arith.addf %12, %13 : vector<10x1xf32>
    %15 = math.rsqrt %14 : vector<10x1xf32>
    %16 = vector.broadcast %15 : vector<10x1xf32> to vector<10x128xf32>
    %17 = arith.mulf %7, %16 : vector<10x128xf32>
    %c0_5 = arith.constant 0 : index
    %c0_6 = arith.constant 0 : index
    %18 = vector.load %arg5[%c0_5, %c0_6] : memref<1x128xf32, #tpu.memory_space<vmem>>, vector<1x128xf32>
    %19 = vector.broadcast %18 : vector<1x128xf32> to vector<10x128xf32>
    %20 = arith.mulf %17, %19 : vector<10x128xf32>
    %c0_7 = arith.constant 0 : index
    %c0_8 = arith.constant 0 : index
    %21 = vector.load %arg6[%c0_7, %c0_8] : memref<1x128xf32, #tpu.memory_space<vmem>>, vector<1x128xf32>
    %22 = vector.broadcast %21 : vector<1x128xf32> to vector<10x128xf32>
    %23 = arith.addf %20, %22 : vector<10x128xf32>
    %24 = arith.truncf %23 : vector<10x128xf32> to vector<10x128xbf16>
    %c0_9 = arith.constant 0 : index
    %c0_10 = arith.constant 0 : index
    %25 = vector.load %arg3[%c0_9, %c0_10] : memref<128x384xbf16, #tpu.memory_space<vmem>>, vector<128x384xbf16>
    %cst_11 = arith.constant dense<0.000000e+00> : vector<10x384xf32>
    %26 = tpu.matmul %24, %25, %cst_11 {dimension_numbers = #tpu.dot_dimension_numbers<[1], [0], [0], [1], [0, 0, 1, 1], [], []>} : vector<10x128xbf16>, vector<128x384xbf16>, vector<10x384xf32> -> vector<10x384xf32>
    %c0_12 = arith.constant 0 : index
    %c0_13 = arith.constant 0 : index
    %27 = vector.load %arg4[%c0_12, %c0_13] : memref<1x384xf32, #tpu.memory_space<vmem>>, vector<1x384xf32>
    %28 = vector.broadcast %27 : vector<1x384xf32> to vector<10x384xf32>
    %29 = arith.addf %26, %28 : vector<10x384xf32>
    %30 = arith.truncf %29 : vector<10x384xf32> to vector<10x384xbf16>
    %c0_14 = arith.constant 0 : index
    %c0_15 = arith.constant 0 : index
    %31 = vector.load %arg7[%c0_14, %c0_15] : memref<10x384xbf16, #tpu.memory_space<vmem>>, vector<10x384xbf16>
    tpu.vector_store %arg7[%c0_14, %c0_15], %30 {strides = array<i32>} : memref<10x384xbf16, #tpu.memory_space<vmem>>, vector<10x384xbf16>,
    return
  }
  func.func @transform_0(%arg0: i32, %arg1: i32) -> (i32, i32) {
    %c0_i32 = arith.constant 0 : i32
    %c0_i32_0 = arith.constant 0 : i32
    return %arg1, %c0_i32 : i32, i32
  }
  func.func @transform_1(%arg0: i32, %arg1: i32) -> (i32, i32) {
    %c0_i32 = arith.constant 0 : i32
    %c0_i32_0 = arith.constant 0 : i32
    return %c0_i32, %arg0 : i32, i32
  }
  func.func @transform_2(%arg0: i32, %arg1: i32) -> (i32, i32) {
    %c0_i32 = arith.constant 0 : i32
    %c0_i32_0 = arith.constant 0 : i32
    return %c0_i32, %arg0 : i32, i32
  }
  func.func @transform_3(%arg0: i32, %arg1: i32) -> (i32, i32) {
    %c0_i32 = arith.constant 0 : i32
    %c0_i32_0 = arith.constant 0 : i32
    %c0_i32_1 = arith.constant 0 : i32
    return %c0_i32, %c0_i32_0 : i32, i32
  }
  func.func @transform_4(%arg0: i32, %arg1: i32) -> (i32, i32) {
    %c0_i32 = arith.constant 0 : i32
    %c0_i32_0 = arith.constant 0 : i32
    %c0_i32_1 = arith.constant 0 : i32
    return %c0_i32, %c0_i32_0 : i32, i32
  }
  func.func @transform_5(%arg0: i32, %arg1: i32) -> (i32, i32) {
    %c0_i32 = arith.constant 0 : i32
    return %arg1, %arg0 : i32, i32
  }
}

module attributes {stable_mosaic.version = 11 : i64} {
  func.func @_attention_kernel(%arg0: i32, %arg1: i32, %arg2: memref<1x5x128xbf16, #tpu.memory_space<vmem>>, %arg3: memref<1x5x384xbf16, #tpu.memory_space<vmem>>, %arg4: memref<1x5x128xbf16, #tpu.memory_space<vmem>>) attributes {dimension_semantics = [#tpu.dimension_semantics<parallel>, #tpu.dimension_semantics<parallel>], iteration_bounds = array<i64: 2, 1>, scalar_prefetch = 0 : i64, scratch_operands = 0 : i64, tpu.core_type = #tpu.core_type<tc>, window_params = [{transform_indices = @transform_0, window_bounds = array<i64: 1, 5, 128>}, {transform_indices = @transform_1, window_bounds = array<i64: 1, 5, 384>}, {transform_indices = @transform_2, window_bounds = array<i64: 1, 5, 128>}]} {
    %c0 = arith.constant 0 : index
    %c0_0 = arith.constant 0 : index
    %c0_1 = arith.constant 0 : index
    %0 = vector.load %arg2[%c0, %c0_0, %c0_1] : memref<1x5x128xbf16, #tpu.memory_space<vmem>>, vector<1x5x32xbf16>
    %1 = vector.shape_cast %0 : vector<1x5x32xbf16> to vector<5x32xbf16>
    %c0_2 = arith.constant 0 : index
    %c0_3 = arith.constant 0 : index
    %c128 = arith.constant 128 : index
    %2 = vector.load %arg3[%c0_2, %c0_3, %c128] : memref<1x5x384xbf16, #tpu.memory_space<vmem>>, vector<1x5x32xbf16>
    %3 = vector.shape_cast %2 : vector<1x5x32xbf16> to vector<5x32xbf16>
    %c0_4 = arith.constant 0 : index
    %c0_5 = arith.constant 0 : index
    %c256 = arith.constant 256 : index
    %4 = vector.load %arg3[%c0_4, %c0_5, %c256] : memref<1x5x384xbf16, #tpu.memory_space<vmem>>, vector<1x5x32xbf16>
    %5 = vector.shape_cast %4 : vector<1x5x32xbf16> to vector<5x32xbf16>
    %cst = arith.constant dense<0.000000e+00> : vector<5x5xf32>
    %6 = tpu.matmul %1, %3, %cst {dimension_numbers = #tpu.dot_dimension_numbers<[1], [1], [0], [0], [0, 0, 1, 0], [], []>} : vector<5x32xbf16>, vector<5x32xbf16>, vector<5x5xf32> -> vector<5x5xf32>
    %cst_6 = arith.constant 0.176776692 : f32
    %7 = vector.broadcast %cst_6 : f32 to vector<5x5xf32>
    %8 = arith.mulf %6, %7 : vector<5x5xf32>
    %cst_7 = arith.constant dense<0xFF800000> : vector<5xf32>
    %9 = vector.multi_reduction <maximumf>, %8, %cst_7 [1] : vector<5x5xf32> to vector<5xf32>
    %10 = vector.shape_cast %9 : vector<5xf32> to vector<5x1xf32>
    %11 = vector.broadcast %10 : vector<5x1xf32> to vector<5x5xf32>
    %12 = arith.subf %8, %11 : vector<5x5xf32>
    %13 = math.exp %12 : vector<5x5xf32>
    %cst_8 = arith.constant dense<0.000000e+00> : vector<5xf32>
    %14 = vector.multi_reduction <add>, %13, %cst_8 [1] : vector<5x5xf32> to vector<5xf32>
    %15 = vector.shape_cast %14 : vector<5xf32> to vector<5x1xf32>
    %16 = tpu.reciprocal %15 {approx = true} : vector<5x1xf32> -> vector<5x1xf32>
    %17 = vector.broadcast %16 : vector<5x1xf32> to vector<5x5xf32>
    %18 = arith.mulf %13, %17 : vector<5x5xf32>
    %19 = arith.truncf %18 : vector<5x5xf32> to vector<5x5xbf16>
    %cst_9 = arith.constant dense<0.000000e+00> : vector<5x32xf32>
    %20 = tpu.matmul %19, %5, %cst_9 {dimension_numbers = #tpu.dot_dimension_numbers<[1], [0], [0], [1], [0, 0, 1, 1], [], []>} : vector<5x5xbf16>, vector<5x32xbf16>, vector<5x32xf32> -> vector<5x32xf32>
    %21 = arith.truncf %20 : vector<5x32xf32> to vector<5x32xbf16>
    %c0_10 = arith.constant 0 : index
    %c0_11 = arith.constant 0 : index
    %c0_12 = arith.constant 0 : index
    %22 = vector.load %arg4[%c0_10, %c0_11, %c0_12] : memref<1x5x128xbf16, #tpu.memory_space<vmem>>, vector<1x5x32xbf16>
    %23 = vector.shape_cast %22 : vector<1x5x32xbf16> to vector<5x32xbf16>
    %24 = vector.shape_cast %21 : vector<5x32xbf16> to vector<1x5x32xbf16>
    tpu.vector_store %arg4[%c0_10, %c0_11, %c0_12], %24 {strides = array<i32>} : memref<1x5x128xbf16, #tpu.memory_space<vmem>>, vector<1x5x32xbf16>,
    %c0_13 = arith.constant 0 : index
    %c0_14 = arith.constant 0 : index
    %c32 = arith.constant 32 : index
    %25 = vector.load %arg2[%c0_13, %c0_14, %c32] : memref<1x5x128xbf16, #tpu.memory_space<vmem>>, vector<1x5x32xbf16>
    %26 = vector.shape_cast %25 : vector<1x5x32xbf16> to vector<5x32xbf16>
    %c0_15 = arith.constant 0 : index
    %c0_16 = arith.constant 0 : index
    %c160 = arith.constant 160 : index
    %27 = vector.load %arg3[%c0_15, %c0_16, %c160] : memref<1x5x384xbf16, #tpu.memory_space<vmem>>, vector<1x5x32xbf16>
    %28 = vector.shape_cast %27 : vector<1x5x32xbf16> to vector<5x32xbf16>
    %c0_17 = arith.constant 0 : index
    %c0_18 = arith.constant 0 : index
    %c288 = arith.constant 288 : index
    %29 = vector.load %arg3[%c0_17, %c0_18, %c288] : memref<1x5x384xbf16, #tpu.memory_space<vmem>>, vector<1x5x32xbf16>
    %30 = vector.shape_cast %29 : vector<1x5x32xbf16> to vector<5x32xbf16>
    %cst_19 = arith.constant dense<0.000000e+00> : vector<5x5xf32>
    %31 = tpu.matmul %26, %28, %cst_19 {dimension_numbers = #tpu.dot_dimension_numbers<[1], [1], [0], [0], [0, 0, 1, 0], [], []>} : vector<5x32xbf16>, vector<5x32xbf16>, vector<5x5xf32> -> vector<5x5xf32>
    %cst_20 = arith.constant 0.176776692 : f32
    %32 = vector.broadcast %cst_20 : f32 to vector<5x5xf32>
    %33 = arith.mulf %31, %32 : vector<5x5xf32>
    %cst_21 = arith.constant dense<0xFF800000> : vector<5xf32>
    %34 = vector.multi_reduction <maximumf>, %33, %cst_21 [1] : vector<5x5xf32> to vector<5xf32>
    %35 = vector.shape_cast %34 : vector<5xf32> to vector<5x1xf32>
    %36 = vector.broadcast %35 : vector<5x1xf32> to vector<5x5xf32>
    %37 = arith.subf %33, %36 : vector<5x5xf32>
    %38 = math.exp %37 : vector<5x5xf32>
    %cst_22 = arith.constant dense<0.000000e+00> : vector<5xf32>
    %39 = vector.multi_reduction <add>, %38, %cst_22 [1] : vector<5x5xf32> to vector<5xf32>
    %40 = vector.shape_cast %39 : vector<5xf32> to vector<5x1xf32>
    %41 = tpu.reciprocal %40 {approx = true} : vector<5x1xf32> -> vector<5x1xf32>
    %42 = vector.broadcast %41 : vector<5x1xf32> to vector<5x5xf32>
    %43 = arith.mulf %38, %42 : vector<5x5xf32>
    %44 = arith.truncf %43 : vector<5x5xf32> to vector<5x5xbf16>
    %cst_23 = arith.constant dense<0.000000e+00> : vector<5x32xf32>
    %45 = tpu.matmul %44, %30, %cst_23 {dimension_numbers = #tpu.dot_dimension_numbers<[1], [0], [0], [1], [0, 0, 1, 1], [], []>} : vector<5x5xbf16>, vector<5x32xbf16>, vector<5x32xf32> -> vector<5x32xf32>
    %46 = arith.truncf %45 : vector<5x32xf32> to vector<5x32xbf16>
    %c0_24 = arith.constant 0 : index
    %c0_25 = arith.constant 0 : index
    %c32_26 = arith.constant 32 : index
    %47 = vector.load %arg4[%c0_24, %c0_25, %c32_26] : memref<1x5x128xbf16, #tpu.memory_space<vmem>>, vector<1x5x32xbf16>
    %48 = vector.shape_cast %47 : vector<1x5x32xbf16> to vector<5x32xbf16>
    %49 = vector.shape_cast %46 : vector<5x32xbf16> to vector<1x5x32xbf16>
    tpu.vector_store %arg4[%c0_24, %c0_25, %c32_26], %49 {strides = array<i32>} : memref<1x5x128xbf16, #tpu.memory_space<vmem>>, vector<1x5x32xbf16>,
    %c0_27 = arith.constant 0 : index
    %c0_28 = arith.constant 0 : index
    %c64 = arith.constant 64 : index
    %50 = vector.load %arg2[%c0_27, %c0_28, %c64] : memref<1x5x128xbf16, #tpu.memory_space<vmem>>, vector<1x5x32xbf16>
    %51 = vector.shape_cast %50 : vector<1x5x32xbf16> to vector<5x32xbf16>
    %c0_29 = arith.constant 0 : index
    %c0_30 = arith.constant 0 : index
    %c192 = arith.constant 192 : index
    %52 = vector.load %arg3[%c0_29, %c0_30, %c192] : memref<1x5x384xbf16, #tpu.memory_space<vmem>>, vector<1x5x32xbf16>
    %53 = vector.shape_cast %52 : vector<1x5x32xbf16> to vector<5x32xbf16>
    %c0_31 = arith.constant 0 : index
    %c0_32 = arith.constant 0 : index
    %c320 = arith.constant 320 : index
    %54 = vector.load %arg3[%c0_31, %c0_32, %c320] : memref<1x5x384xbf16, #tpu.memory_space<vmem>>, vector<1x5x32xbf16>
    %55 = vector.shape_cast %54 : vector<1x5x32xbf16> to vector<5x32xbf16>
    %cst_33 = arith.constant dense<0.000000e+00> : vector<5x5xf32>
    %56 = tpu.matmul %51, %53, %cst_33 {dimension_numbers = #tpu.dot_dimension_numbers<[1], [1], [0], [0], [0, 0, 1, 0], [], []>} : vector<5x32xbf16>, vector<5x32xbf16>, vector<5x5xf32> -> vector<5x5xf32>
    %cst_34 = arith.constant 0.176776692 : f32
    %57 = vector.broadcast %cst_34 : f32 to vector<5x5xf32>
    %58 = arith.mulf %56, %57 : vector<5x5xf32>
    %cst_35 = arith.constant dense<0xFF800000> : vector<5xf32>
    %59 = vector.multi_reduction <maximumf>, %58, %cst_35 [1] : vector<5x5xf32> to vector<5xf32>
    %60 = vector.shape_cast %59 : vector<5xf32> to vector<5x1xf32>
    %61 = vector.broadcast %60 : vector<5x1xf32> to vector<5x5xf32>
    %62 = arith.subf %58, %61 : vector<5x5xf32>
    %63 = math.exp %62 : vector<5x5xf32>
    %cst_36 = arith.constant dense<0.000000e+00> : vector<5xf32>
    %64 = vector.multi_reduction <add>, %63, %cst_36 [1] : vector<5x5xf32> to vector<5xf32>
    %65 = vector.shape_cast %64 : vector<5xf32> to vector<5x1xf32>
    %66 = tpu.reciprocal %65 {approx = true} : vector<5x1xf32> -> vector<5x1xf32>
    %67 = vector.broadcast %66 : vector<5x1xf32> to vector<5x5xf32>
    %68 = arith.mulf %63, %67 : vector<5x5xf32>
    %69 = arith.truncf %68 : vector<5x5xf32> to vector<5x5xbf16>
    %cst_37 = arith.constant dense<0.000000e+00> : vector<5x32xf32>
    %70 = tpu.matmul %69, %55, %cst_37 {dimension_numbers = #tpu.dot_dimension_numbers<[1], [0], [0], [1], [0, 0, 1, 1], [], []>} : vector<5x5xbf16>, vector<5x32xbf16>, vector<5x32xf32> -> vector<5x32xf32>
    %71 = arith.truncf %70 : vector<5x32xf32> to vector<5x32xbf16>
    %c0_38 = arith.constant 0 : index
    %c0_39 = arith.constant 0 : index
    %c64_40 = arith.constant 64 : index
    %72 = vector.load %arg4[%c0_38, %c0_39, %c64_40] : memref<1x5x128xbf16, #tpu.memory_space<vmem>>, vector<1x5x32xbf16>
    %73 = vector.shape_cast %72 : vector<1x5x32xbf16> to vector<5x32xbf16>
    %74 = vector.shape_cast %71 : vector<5x32xbf16> to vector<1x5x32xbf16>
    tpu.vector_store %arg4[%c0_38, %c0_39, %c64_40], %74 {strides = array<i32>} : memref<1x5x128xbf16, #tpu.memory_space<vmem>>, vector<1x5x32xbf16>,
    %c0_41 = arith.constant 0 : index
    %c0_42 = arith.constant 0 : index
    %c96 = arith.constant 96 : index
    %75 = vector.load %arg2[%c0_41, %c0_42, %c96] : memref<1x5x128xbf16, #tpu.memory_space<vmem>>, vector<1x5x32xbf16>
    %76 = vector.shape_cast %75 : vector<1x5x32xbf16> to vector<5x32xbf16>
    %c0_43 = arith.constant 0 : index
    %c0_44 = arith.constant 0 : index
    %c224 = arith.constant 224 : index
    %77 = vector.load %arg3[%c0_43, %c0_44, %c224] : memref<1x5x384xbf16, #tpu.memory_space<vmem>>, vector<1x5x32xbf16>
    %78 = vector.shape_cast %77 : vector<1x5x32xbf16> to vector<5x32xbf16>
    %c0_45 = arith.constant 0 : index
    %c0_46 = arith.constant 0 : index
    %c352 = arith.constant 352 : index
    %79 = vector.load %arg3[%c0_45, %c0_46, %c352] : memref<1x5x384xbf16, #tpu.memory_space<vmem>>, vector<1x5x32xbf16>
    %80 = vector.shape_cast %79 : vector<1x5x32xbf16> to vector<5x32xbf16>
    %cst_47 = arith.constant dense<0.000000e+00> : vector<5x5xf32>
    %81 = tpu.matmul %76, %78, %cst_47 {dimension_numbers = #tpu.dot_dimension_numbers<[1], [1], [0], [0], [0, 0, 1, 0], [], []>} : vector<5x32xbf16>, vector<5x32xbf16>, vector<5x5xf32> -> vector<5x5xf32>
    %cst_48 = arith.constant 0.176776692 : f32
    %82 = vector.broadcast %cst_48 : f32 to vector<5x5xf32>
    %83 = arith.mulf %81, %82 : vector<5x5xf32>
    %cst_49 = arith.constant dense<0xFF800000> : vector<5xf32>
    %84 = vector.multi_reduction <maximumf>, %83, %cst_49 [1] : vector<5x5xf32> to vector<5xf32>
    %85 = vector.shape_cast %84 : vector<5xf32> to vector<5x1xf32>
    %86 = vector.broadcast %85 : vector<5x1xf32> to vector<5x5xf32>
    %87 = arith.subf %83, %86 : vector<5x5xf32>
    %88 = math.exp %87 : vector<5x5xf32>
    %cst_50 = arith.constant dense<0.000000e+00> : vector<5xf32>
    %89 = vector.multi_reduction <add>, %88, %cst_50 [1] : vector<5x5xf32> to vector<5xf32>
    %90 = vector.shape_cast %89 : vector<5xf32> to vector<5x1xf32>
    %91 = tpu.reciprocal %90 {approx = true} : vector<5x1xf32> -> vector<5x1xf32>
    %92 = vector.broadcast %91 : vector<5x1xf32> to vector<5x5xf32>
    %93 = arith.mulf %88, %92 : vector<5x5xf32>
    %94 = arith.truncf %93 : vector<5x5xf32> to vector<5x5xbf16>
    %cst_51 = arith.constant dense<0.000000e+00> : vector<5x32xf32>
    %95 = tpu.matmul %94, %80, %cst_51 {dimension_numbers = #tpu.dot_dimension_numbers<[1], [0], [0], [1], [0, 0, 1, 1], [], []>} : vector<5x5xbf16>, vector<5x32xbf16>, vector<5x32xf32> -> vector<5x32xf32>
    %96 = arith.truncf %95 : vector<5x32xf32> to vector<5x32xbf16>
    %c0_52 = arith.constant 0 : index
    %c0_53 = arith.constant 0 : index
    %c96_54 = arith.constant 96 : index
    %97 = vector.load %arg4[%c0_52, %c0_53, %c96_54] : memref<1x5x128xbf16, #tpu.memory_space<vmem>>, vector<1x5x32xbf16>
    %98 = vector.shape_cast %97 : vector<1x5x32xbf16> to vector<5x32xbf16>
    %99 = vector.shape_cast %96 : vector<5x32xbf16> to vector<1x5x32xbf16>
    tpu.vector_store %arg4[%c0_52, %c0_53, %c96_54], %99 {strides = array<i32>} : memref<1x5x128xbf16, #tpu.memory_space<vmem>>, vector<1x5x32xbf16>,
    return
  }
  func.func @transform_0(%arg0: i32, %arg1: i32) -> (i32, i32, i32) {
    %c0_i32 = arith.constant 0 : i32
    %c0_i32_0 = arith.constant 0 : i32
    return %arg0, %arg1, %c0_i32 : i32, i32, i32
  }
  func.func @transform_1(%arg0: i32, %arg1: i32) -> (i32, i32, i32) {
    %c0_i32 = arith.constant 0 : i32
    %c0_i32_0 = arith.constant 0 : i32
    %c0_i32_1 = arith.constant 0 : i32
    return %arg0, %c0_i32, %c0_i32_0 : i32, i32, i32
  }
  func.func @transform_2(%arg0: i32, %arg1: i32) -> (i32, i32, i32) {
    %c0_i32 = arith.constant 0 : i32
    %c0_i32_0 = arith.constant 0 : i32
    return %arg0, %arg1, %c0_i32 : i32, i32, i32
  }
}

module attributes {stable_mosaic.version = 11 : i64} {
  func.func @_fused_linear_kernel(%arg0: i32, %arg1: i32, %arg2: memref<10x128xbf16, #tpu.memory_space<vmem>>, %arg3: memref<128x128xbf16, #tpu.memory_space<vmem>>, %arg4: memref<1x128xf32, #tpu.memory_space<vmem>>, %arg5: memref<10x128xbf16, #tpu.memory_space<vmem>>, %arg6: memref<10x128xbf16, #tpu.memory_space<vmem>>) attributes {dimension_semantics = [#tpu.dimension_semantics<parallel>, #tpu.dimension_semantics<parallel>], iteration_bounds = array<i64: 1, 1>, scalar_prefetch = 0 : i64, scratch_operands = 0 : i64, tpu.core_type = #tpu.core_type<tc>, window_params = [{transform_indices = @transform_0, window_bounds = array<i64: 10, 128>}, {transform_indices = @transform_1, window_bounds = array<i64: 128, 128>}, {transform_indices = @transform_2, window_bounds = array<i64: 1, 128>}, {transform_indices = @transform_3, window_bounds = array<i64: 10, 128>}, {transform_indices = @transform_4, window_bounds = array<i64: 10, 128>}]} {
    %c0 = arith.constant 0 : index
    %c0_0 = arith.constant 0 : index
    %0 = vector.load %arg2[%c0, %c0_0] : memref<10x128xbf16, #tpu.memory_space<vmem>>, vector<10x128xbf16>
    %c0_1 = arith.constant 0 : index
    %c0_2 = arith.constant 0 : index
    %1 = vector.load %arg3[%c0_1, %c0_2] : memref<128x128xbf16, #tpu.memory_space<vmem>>, vector<128x128xbf16>
    %cst = arith.constant dense<0.000000e+00> : vector<10x128xf32>
    %2 = tpu.matmul %0, %1, %cst {dimension_numbers = #tpu.dot_dimension_numbers<[1], [0], [0], [1], [0, 0, 1, 1], [], []>} : vector<10x128xbf16>, vector<128x128xbf16>, vector<10x128xf32> -> vector<10x128xf32>
    %c0_3 = arith.constant 0 : index
    %c0_4 = arith.constant 0 : index
    %3 = vector.load %arg4[%c0_3, %c0_4] : memref<1x128xf32, #tpu.memory_space<vmem>>, vector<1x128xf32>
    %4 = vector.broadcast %3 : vector<1x128xf32> to vector<10x128xf32>
    %5 = arith.addf %2, %4 : vector<10x128xf32>
    %c0_5 = arith.constant 0 : index
    %c0_6 = arith.constant 0 : index
    %6 = vector.load %arg5[%c0_5, %c0_6] : memref<10x128xbf16, #tpu.memory_space<vmem>>, vector<10x128xbf16>
    %7 = arith.extf %6 : vector<10x128xbf16> to vector<10x128xf32>
    %8 = arith.addf %5, %7 : vector<10x128xf32>
    %9 = arith.truncf %8 : vector<10x128xf32> to vector<10x128xbf16>
    %c0_7 = arith.constant 0 : index
    %c0_8 = arith.constant 0 : index
    %10 = vector.load %arg6[%c0_7, %c0_8] : memref<10x128xbf16, #tpu.memory_space<vmem>>, vector<10x128xbf16>
    tpu.vector_store %arg6[%c0_7, %c0_8], %9 {strides = array<i32>} : memref<10x128xbf16, #tpu.memory_space<vmem>>, vector<10x128xbf16>,
    return
  }
  func.func @transform_0(%arg0: i32, %arg1: i32) -> (i32, i32) {
    %c0_i32 = arith.constant 0 : i32
    %c0_i32_0 = arith.constant 0 : i32
    return %arg1, %c0_i32 : i32, i32
  }
  func.func @transform_1(%arg0: i32, %arg1: i32) -> (i32, i32) {
    %c0_i32 = arith.constant 0 : i32
    %c0_i32_0 = arith.constant 0 : i32
    return %c0_i32, %arg0 : i32, i32
  }
  func.func @transform_2(%arg0: i32, %arg1: i32) -> (i32, i32) {
    %c0_i32 = arith.constant 0 : i32
    %c0_i32_0 = arith.constant 0 : i32
    return %c0_i32, %arg0 : i32, i32
  }
  func.func @transform_3(%arg0: i32, %arg1: i32) -> (i32, i32) {
    %c0_i32 = arith.constant 0 : i32
    return %arg1, %arg0 : i32, i32
  }
  func.func @transform_4(%arg0: i32, %arg1: i32) -> (i32, i32) {
    %c0_i32 = arith.constant 0 : i32
    return %arg1, %arg0 : i32, i32
  }
}

module attributes {stable_mosaic.version = 11 : i64} {
  func.func @_fused_linear_kernel(%arg0: i32, %arg1: i32, %arg2: memref<10x128xbf16, #tpu.memory_space<vmem>>, %arg3: memref<128x512xbf16, #tpu.memory_space<vmem>>, %arg4: memref<1x512xf32, #tpu.memory_space<vmem>>, %arg5: memref<1x128xf32, #tpu.memory_space<vmem>>, %arg6: memref<1x128xf32, #tpu.memory_space<vmem>>, %arg7: memref<10x512xbf16, #tpu.memory_space<vmem>>) attributes {dimension_semantics = [#tpu.dimension_semantics<parallel>, #tpu.dimension_semantics<parallel>], iteration_bounds = array<i64: 1, 1>, scalar_prefetch = 0 : i64, scratch_operands = 0 : i64, tpu.core_type = #tpu.core_type<tc>, window_params = [{transform_indices = @transform_0, window_bounds = array<i64: 10, 128>}, {transform_indices = @transform_1, window_bounds = array<i64: 128, 512>}, {transform_indices = @transform_2, window_bounds = array<i64: 1, 512>}, {pipeline_mode = #tpu.pipeline_mode<synchronous>, transform_indices = @transform_3, window_bounds = array<i64: 1, 128>}, {pipeline_mode = #tpu.pipeline_mode<synchronous>, transform_indices = @transform_4, window_bounds = array<i64: 1, 128>}, {transform_indices = @transform_5, window_bounds = array<i64: 10, 512>}]} {
    %c0 = arith.constant 0 : index
    %c0_0 = arith.constant 0 : index
    %0 = vector.load %arg2[%c0, %c0_0] : memref<10x128xbf16, #tpu.memory_space<vmem>>, vector<10x128xbf16>
    %1 = arith.extf %0 : vector<10x128xbf16> to vector<10x128xf32>
    %cst = arith.constant dense<0.000000e+00> : vector<10xf32>
    %2 = vector.multi_reduction <add>, %1, %cst [1] : vector<10x128xf32> to vector<10xf32>
    %3 = vector.shape_cast %2 : vector<10xf32> to vector<10x1xf32>
    %cst_1 = arith.constant 1.280000e+02 : f32
    %4 = vector.broadcast %cst_1 : f32 to vector<10x1xf32>
    %5 = arith.divf %3, %4 : vector<10x1xf32>
    %6 = vector.broadcast %5 : vector<10x1xf32> to vector<10x128xf32>
    %7 = arith.subf %1, %6 : vector<10x128xf32>
    %8 = arith.mulf %7, %7 : vector<10x128xf32>
    %cst_2 = arith.constant dense<0.000000e+00> : vector<10xf32>
    %9 = vector.multi_reduction <add>, %8, %cst_2 [1] : vector<10x128xf32> to vector<10xf32>
    %10 = vector.shape_cast %9 : vector<10xf32> to vector<10x1xf32>
    %cst_3 = arith.constant 1.280000e+02 : f32
    %11 = vector.broadcast %cst_3 : f32 to vector<10x1xf32>
    %12 = arith.divf %10, %11 : vector<10x1xf32>
    %cst_4 = arith.constant 9.99999974E-6 : f32
    %13 = vector.broadcast %cst_4 : f32 to vector<10x1xf32>
    %14 = arith.addf %12, %13 : vector<10x1xf32>
    %15 = math.rsqrt %14 : vector<10x1xf32>
    %16 = vector.broadcast %15 : vector<10x1xf32> to vector<10x128xf32>
    %17 = arith.mulf %7, %16 : vector<10x128xf32>
    %c0_5 = arith.constant 0 : index
    %c0_6 = arith.constant 0 : index
    %18 = vector.load %arg5[%c0_5, %c0_6] : memref<1x128xf32, #tpu.memory_space<vmem>>, vector<1x128xf32>
    %19 = vector.broadcast %18 : vector<1x128xf32> to vector<10x128xf32>
    %20 = arith.mulf %17, %19 : vector<10x128xf32>
    %c0_7 = arith.constant 0 : index
    %c0_8 = arith.constant 0 : index
    %21 = vector.load %arg6[%c0_7, %c0_8] : memref<1x128xf32, #tpu.memory_space<vmem>>, vector<1x128xf32>
    %22 = vector.broadcast %21 : vector<1x128xf32> to vector<10x128xf32>
    %23 = arith.addf %20, %22 : vector<10x128xf32>
    %24 = arith.truncf %23 : vector<10x128xf32> to vector<10x128xbf16>
    %c0_9 = arith.constant 0 : index
    %c0_10 = arith.constant 0 : index
    %25 = vector.load %arg3[%c0_9, %c0_10] : memref<128x512xbf16, #tpu.memory_space<vmem>>, vector<128x512xbf16>
    %cst_11 = arith.constant dense<0.000000e+00> : vector<10x512xf32>
    %26 = tpu.matmul %24, %25, %cst_11 {dimension_numbers = #tpu.dot_dimension_numbers<[1], [0], [0], [1], [0, 0, 1, 1], [], []>} : vector<10x128xbf16>, vector<128x512xbf16>, vector<10x512xf32> -> vector<10x512xf32>
    %c0_12 = arith.constant 0 : index
    %c0_13 = arith.constant 0 : index
    %27 = vector.load %arg4[%c0_12, %c0_13] : memref<1x512xf32, #tpu.memory_space<vmem>>, vector<1x512xf32>
    %28 = vector.broadcast %27 : vector<1x512xf32> to vector<10x512xf32>
    %29 = arith.addf %26, %28 : vector<10x512xf32>
    %cst_14 = arith.constant 1.702000e+00 : f32
    %30 = vector.broadcast %cst_14 : f32 to vector<10x512xf32>
    %31 = arith.mulf %30, %29 : vector<10x512xf32>
    %32 = arith.negf %31 : vector<10x512xf32>
    %33 = math.exp %32 : vector<10x512xf32>
    %cst_15 = arith.constant 1.000000e+00 : f32
    %34 = vector.broadcast %cst_15 : f32 to vector<10x512xf32>
    %35 = arith.addf %34, %33 : vector<10x512xf32>
    %36 = arith.divf %34, %35 : vector<10x512xf32>
    %37 = arith.mulf %29, %36 : vector<10x512xf32>
    %38 = arith.truncf %37 : vector<10x512xf32> to vector<10x512xbf16>
    %c0_16 = arith.constant 0 : index
    %c0_17 = arith.constant 0 : index
    %39 = vector.load %arg7[%c0_16, %c0_17] : memref<10x512xbf16, #tpu.memory_space<vmem>>, vector<10x512xbf16>
    tpu.vector_store %arg7[%c0_16, %c0_17], %38 {strides = array<i32>} : memref<10x512xbf16, #tpu.memory_space<vmem>>, vector<10x512xbf16>,
    return
  }
  func.func @transform_0(%arg0: i32, %arg1: i32) -> (i32, i32) {
    %c0_i32 = arith.constant 0 : i32
    %c0_i32_0 = arith.constant 0 : i32
    return %arg1, %c0_i32 : i32, i32
  }
  func.func @transform_1(%arg0: i32, %arg1: i32) -> (i32, i32) {
    %c0_i32 = arith.constant 0 : i32
    %c0_i32_0 = arith.constant 0 : i32
    return %c0_i32, %arg0 : i32, i32
  }
  func.func @transform_2(%arg0: i32, %arg1: i32) -> (i32, i32) {
    %c0_i32 = arith.constant 0 : i32
    %c0_i32_0 = arith.constant 0 : i32
    return %c0_i32, %arg0 : i32, i32
  }
  func.func @transform_3(%arg0: i32, %arg1: i32) -> (i32, i32) {
    %c0_i32 = arith.constant 0 : i32
    %c0_i32_0 = arith.constant 0 : i32
    %c0_i32_1 = arith.constant 0 : i32
    return %c0_i32, %c0_i32_0 : i32, i32
  }
  func.func @transform_4(%arg0: i32, %arg1: i32) -> (i32, i32) {
    %c0_i32 = arith.constant 0 : i32
    %c0_i32_0 = arith.constant 0 : i32
    %c0_i32_1 = arith.constant 0 : i32
    return %c0_i32, %c0_i32_0 : i32, i32
  }
  func.func @transform_5(%arg0: i32, %arg1: i32) -> (i32, i32) {
    %c0_i32 = arith.constant 0 : i32
    return %arg1, %arg0 : i32, i32
  }
}

module attributes {stable_mosaic.version = 11 : i64} {
  func.func @_fused_linear_kernel(%arg0: i32, %arg1: i32, %arg2: memref<10x512xbf16, #tpu.memory_space<vmem>>, %arg3: memref<512x128xbf16, #tpu.memory_space<vmem>>, %arg4: memref<1x128xf32, #tpu.memory_space<vmem>>, %arg5: memref<10x128xbf16, #tpu.memory_space<vmem>>, %arg6: memref<10x128xbf16, #tpu.memory_space<vmem>>) attributes {dimension_semantics = [#tpu.dimension_semantics<parallel>, #tpu.dimension_semantics<parallel>], iteration_bounds = array<i64: 1, 1>, scalar_prefetch = 0 : i64, scratch_operands = 0 : i64, tpu.core_type = #tpu.core_type<tc>, window_params = [{transform_indices = @transform_0, window_bounds = array<i64: 10, 512>}, {transform_indices = @transform_1, window_bounds = array<i64: 512, 128>}, {transform_indices = @transform_2, window_bounds = array<i64: 1, 128>}, {transform_indices = @transform_3, window_bounds = array<i64: 10, 128>}, {transform_indices = @transform_4, window_bounds = array<i64: 10, 128>}]} {
    %c0 = arith.constant 0 : index
    %c0_0 = arith.constant 0 : index
    %0 = vector.load %arg2[%c0, %c0_0] : memref<10x512xbf16, #tpu.memory_space<vmem>>, vector<10x512xbf16>
    %c0_1 = arith.constant 0 : index
    %c0_2 = arith.constant 0 : index
    %1 = vector.load %arg3[%c0_1, %c0_2] : memref<512x128xbf16, #tpu.memory_space<vmem>>, vector<512x128xbf16>
    %cst = arith.constant dense<0.000000e+00> : vector<10x128xf32>
    %2 = tpu.matmul %0, %1, %cst {dimension_numbers = #tpu.dot_dimension_numbers<[1], [0], [0], [1], [0, 0, 1, 1], [], []>} : vector<10x512xbf16>, vector<512x128xbf16>, vector<10x128xf32> -> vector<10x128xf32>
    %c0_3 = arith.constant 0 : index
    %c0_4 = arith.constant 0 : index
    %3 = vector.load %arg4[%c0_3, %c0_4] : memref<1x128xf32, #tpu.memory_space<vmem>>, vector<1x128xf32>
    %4 = vector.broadcast %3 : vector<1x128xf32> to vector<10x128xf32>
    %5 = arith.addf %2, %4 : vector<10x128xf32>
    %c0_5 = arith.constant 0 : index
    %c0_6 = arith.constant 0 : index
    %6 = vector.load %arg5[%c0_5, %c0_6] : memref<10x128xbf16, #tpu.memory_space<vmem>>, vector<10x128xbf16>
    %7 = arith.extf %6 : vector<10x128xbf16> to vector<10x128xf32>
    %8 = arith.addf %5, %7 : vector<10x128xf32>
    %9 = arith.truncf %8 : vector<10x128xf32> to vector<10x128xbf16>
    %c0_7 = arith.constant 0 : index
    %c0_8 = arith.constant 0 : index
    %10 = vector.load %arg6[%c0_7, %c0_8] : memref<10x128xbf16, #tpu.memory_space<vmem>>, vector<10x128xbf16>
    tpu.vector_store %arg6[%c0_7, %c0_8], %9 {strides = array<i32>} : memref<10x128xbf16, #tpu.memory_space<vmem>>, vector<10x128xbf16>,
    return
  }
  func.func @transform_0(%arg0: i32, %arg1: i32) -> (i32, i32) {
    %c0_i32 = arith.constant 0 : i32
    %c0_i32_0 = arith.constant 0 : i32
    return %arg1, %c0_i32 : i32, i32
  }
  func.func @transform_1(%arg0: i32, %arg1: i32) -> (i32, i32) {
    %c0_i32 = arith.constant 0 : i32
    %c0_i32_0 = arith.constant 0 : i32
    return %c0_i32, %arg0 : i32, i32
  }
  func.func @transform_2(%arg0: i32, %arg1: i32) -> (i32, i32) {
    %c0_i32 = arith.constant 0 : i32
    %c0_i32_0 = arith.constant 0 : i32
    return %c0_i32, %arg0 : i32, i32
  }
  func.func @transform_3(%arg0: i32, %arg1: i32) -> (i32, i32) {
    %c0_i32 = arith.constant 0 : i32
    return %arg1, %arg0 : i32, i32
  }
  func.func @transform_4(%arg0: i32, %arg1: i32) -> (i32, i32) {
    %c0_i32 = arith.constant 0 : i32
    return %arg1, %arg0 : i32, i32
  }
}

module attributes {stable_mosaic.version = 11 : i64} {
  func.func @_fused_linear_kernel(%arg0: i32, %arg1: i32, %arg2: memref<10x128xbf16, #tpu.memory_space<vmem>>, %arg3: memref<128x128xbf16, #tpu.memory_space<vmem>>, %arg4: memref<1x128xf32, #tpu.memory_space<vmem>>, %arg5: memref<10x128xbf16, #tpu.memory_space<vmem>>, %arg6: memref<10x128xbf16, #tpu.memory_space<vmem>>) attributes {dimension_semantics = [#tpu.dimension_semantics<parallel>, #tpu.dimension_semantics<parallel>], iteration_bounds = array<i64: 1, 1>, scalar_prefetch = 0 : i64, scratch_operands = 0 : i64, tpu.core_type = #tpu.core_type<tc>, window_params = [{transform_indices = @transform_0, window_bounds = array<i64: 10, 128>}, {transform_indices = @transform_1, window_bounds = array<i64: 128, 128>}, {transform_indices = @transform_2, window_bounds = array<i64: 1, 128>}, {transform_indices = @transform_3, window_bounds = array<i64: 10, 128>}, {transform_indices = @transform_4, window_bounds = array<i64: 10, 128>}]} {
    %c0 = arith.constant 0 : index
    %c0_0 = arith.constant 0 : index
    %0 = vector.load %arg2[%c0, %c0_0] : memref<10x128xbf16, #tpu.memory_space<vmem>>, vector<10x128xbf16>
    %c0_1 = arith.constant 0 : index
    %c0_2 = arith.constant 0 : index
    %1 = vector.load %arg3[%c0_1, %c0_2] : memref<128x128xbf16, #tpu.memory_space<vmem>>, vector<128x128xbf16>
    %cst = arith.constant dense<0.000000e+00> : vector<10x128xf32>
    %2 = tpu.matmul %0, %1, %cst {dimension_numbers = #tpu.dot_dimension_numbers<[1], [0], [0], [1], [0, 0, 1, 1], [], []>} : vector<10x128xbf16>, vector<128x128xbf16>, vector<10x128xf32> -> vector<10x128xf32>
    %c0_3 = arith.constant 0 : index
    %c0_4 = arith.constant 0 : index
    %3 = vector.load %arg4[%c0_3, %c0_4] : memref<1x128xf32, #tpu.memory_space<vmem>>, vector<1x128xf32>
    %4 = vector.broadcast %3 : vector<1x128xf32> to vector<10x128xf32>
    %5 = arith.addf %2, %4 : vector<10x128xf32>
    %c0_5 = arith.constant 0 : index
    %c0_6 = arith.constant 0 : index
    %6 = vector.load %arg5[%c0_5, %c0_6] : memref<10x128xbf16, #tpu.memory_space<vmem>>, vector<10x128xbf16>
    %7 = arith.extf %6 : vector<10x128xbf16> to vector<10x128xf32>
    %8 = arith.addf %5, %7 : vector<10x128xf32>
    %9 = arith.truncf %8 : vector<10x128xf32> to vector<10x128xbf16>
    %c0_7 = arith.constant 0 : index
    %c0_8 = arith.constant 0 : index
    %10 = vector.load %arg6[%c0_7, %c0_8] : memref<10x128xbf16, #tpu.memory_space<vmem>>, vector<10x128xbf16>
    tpu.vector_store %arg6[%c0_7, %c0_8], %9 {strides = array<i32>} : memref<10x128xbf16, #tpu.memory_space<vmem>>, vector<10x128xbf16>,
    return
  }
  func.func @transform_0(%arg0: i32, %arg1: i32) -> (i32, i32) {
    %c0_i32 = arith.constant 0 : i32
    %c0_i32_0 = arith.constant 0 : i32
    return %arg1, %c0_i32 : i32, i32
  }
  func.func @transform_1(%arg0: i32, %arg1: i32) -> (i32, i32) {
    %c0_i32 = arith.constant 0 : i32
    %c0_i32_0 = arith.constant 0 : i32
    return %c0_i32, %arg0 : i32, i32
  }
  func.func @transform_2(%arg0: i32, %arg1: i32) -> (i32, i32) {
    %c0_i32 = arith.constant 0 : i32
    %c0_i32_0 = arith.constant 0 : i32
    return %c0_i32, %arg0 : i32, i32
  }
  func.func @transform_3(%arg0: i32, %arg1: i32) -> (i32, i32) {
    %c0_i32 = arith.constant 0 : i32
    return %arg1, %arg0 : i32, i32
  }
  func.func @transform_4(%arg0: i32, %arg1: i32) -> (i32, i32) {
    %c0_i32 = arith.constant 0 : i32
    return %arg1, %arg0 : i32, i32
  }
}

module attributes {stable_mosaic.version = 11 : i64} {
  func.func @_fused_linear_kernel(%arg0: i32, %arg1: i32, %arg2: memref<10x512xbf16, #tpu.memory_space<vmem>>, %arg3: memref<512x128xbf16, #tpu.memory_space<vmem>>, %arg4: memref<1x128xf32, #tpu.memory_space<vmem>>, %arg5: memref<10x128xbf16, #tpu.memory_space<vmem>>, %arg6: memref<10x128xbf16, #tpu.memory_space<vmem>>) attributes {dimension_semantics = [#tpu.dimension_semantics<parallel>, #tpu.dimension_semantics<parallel>], iteration_bounds = array<i64: 1, 1>, scalar_prefetch = 0 : i64, scratch_operands = 0 : i64, tpu.core_type = #tpu.core_type<tc>, window_params = [{transform_indices = @transform_0, window_bounds = array<i64: 10, 512>}, {transform_indices = @transform_1, window_bounds = array<i64: 512, 128>}, {transform_indices = @transform_2, window_bounds = array<i64: 1, 128>}, {transform_indices = @transform_3, window_bounds = array<i64: 10, 128>}, {transform_indices = @transform_4, window_bounds = array<i64: 10, 128>}]} {
    %c0 = arith.constant 0 : index
    %c0_0 = arith.constant 0 : index
    %0 = vector.load %arg2[%c0, %c0_0] : memref<10x512xbf16, #tpu.memory_space<vmem>>, vector<10x512xbf16>
    %c0_1 = arith.constant 0 : index
    %c0_2 = arith.constant 0 : index
    %1 = vector.load %arg3[%c0_1, %c0_2] : memref<512x128xbf16, #tpu.memory_space<vmem>>, vector<512x128xbf16>
    %cst = arith.constant dense<0.000000e+00> : vector<10x128xf32>
    %2 = tpu.matmul %0, %1, %cst {dimension_numbers = #tpu.dot_dimension_numbers<[1], [0], [0], [1], [0, 0, 1, 1], [], []>} : vector<10x512xbf16>, vector<512x128xbf16>, vector<10x128xf32> -> vector<10x128xf32>
    %c0_3 = arith.constant 0 : index
    %c0_4 = arith.constant 0 : index
    %3 = vector.load %arg4[%c0_3, %c0_4] : memref<1x128xf32, #tpu.memory_space<vmem>>, vector<1x128xf32>
    %4 = vector.broadcast %3 : vector<1x128xf32> to vector<10x128xf32>
    %5 = arith.addf %2, %4 : vector<10x128xf32>
    %c0_5 = arith.constant 0 : index
    %c0_6 = arith.constant 0 : index
    %6 = vector.load %arg5[%c0_5, %c0_6] : memref<10x128xbf16, #tpu.memory_space<vmem>>, vector<10x128xbf16>
    %7 = arith.extf %6 : vector<10x128xbf16> to vector<10x128xf32>
    %8 = arith.addf %5, %7 : vector<10x128xf32>
    %9 = arith.truncf %8 : vector<10x128xf32> to vector<10x128xbf16>
    %c0_7 = arith.constant 0 : index
    %c0_8 = arith.constant 0 : index
    %10 = vector.load %arg6[%c0_7, %c0_8] : memref<10x128xbf16, #tpu.memory_space<vmem>>, vector<10x128xbf16>
    tpu.vector_store %arg6[%c0_7, %c0_8], %9 {strides = array<i32>} : memref<10x128xbf16, #tpu.memory_space<vmem>>, vector<10x128xbf16>,
    return
  }
  func.func @transform_0(%arg0: i32, %arg1: i32) -> (i32, i32) {
    %c0_i32 = arith.constant 0 : i32
    %c0_i32_0 = arith.constant 0 : i32
    return %arg1, %c0_i32 : i32, i32
  }
  func.func @transform_1(%arg0: i32, %arg1: i32) -> (i32, i32) {
    %c0_i32 = arith.constant 0 : i32
    %c0_i32_0 = arith.constant 0 : i32
    return %c0_i32, %arg0 : i32, i32
  }
  func.func @transform_2(%arg0: i32, %arg1: i32) -> (i32, i32) {
    %c0_i32 = arith.constant 0 : i32
    %c0_i32_0 = arith.constant 0 : i32
    return %c0_i32, %arg0 : i32, i32
  }
  func.func @transform_3(%arg0: i32, %arg1: i32) -> (i32, i32) {
    %c0_i32 = arith.constant 0 : i32
    return %arg1, %arg0 : i32, i32
  }
  func.func @transform_4(%arg0: i32, %arg1: i32) -> (i32, i32) {
    %c0_i32 = arith.constant 0 : i32
    return %arg1, %arg0 : i32, i32
  }
}

module attributes {stable_mosaic.version = 11 : i64} {
  func.func @_fused_linear_kernel(%arg0: i32, %arg1: i32, %arg2: memref<10x128xbf16, #tpu.memory_space<vmem>>, %arg3: memref<128x64xbf16, #tpu.memory_space<vmem>>, %arg4: memref<1x128xf32, #tpu.memory_space<vmem>>, %arg5: memref<1x128xf32, #tpu.memory_space<vmem>>, %arg6: memref<10x64xbf16, #tpu.memory_space<vmem>>) attributes {dimension_semantics = [#tpu.dimension_semantics<parallel>, #tpu.dimension_semantics<parallel>], iteration_bounds = array<i64: 1, 1>, scalar_prefetch = 0 : i64, scratch_operands = 0 : i64, tpu.core_type = #tpu.core_type<tc>, window_params = [{transform_indices = @transform_0, window_bounds = array<i64: 10, 128>}, {transform_indices = @transform_1, window_bounds = array<i64: 128, 64>}, {pipeline_mode = #tpu.pipeline_mode<synchronous>, transform_indices = @transform_2, window_bounds = array<i64: 1, 128>}, {pipeline_mode = #tpu.pipeline_mode<synchronous>, transform_indices = @transform_3, window_bounds = array<i64: 1, 128>}, {transform_indices = @transform_4, window_bounds = array<i64: 10, 64>}]} {
    %c0 = arith.constant 0 : index
    %c0_0 = arith.constant 0 : index
    %0 = vector.load %arg2[%c0, %c0_0] : memref<10x128xbf16, #tpu.memory_space<vmem>>, vector<10x128xbf16>
    %1 = arith.extf %0 : vector<10x128xbf16> to vector<10x128xf32>
    %cst = arith.constant dense<0.000000e+00> : vector<10xf32>
    %2 = vector.multi_reduction <add>, %1, %cst [1] : vector<10x128xf32> to vector<10xf32>
    %3 = vector.shape_cast %2 : vector<10xf32> to vector<10x1xf32>
    %cst_1 = arith.constant 1.280000e+02 : f32
    %4 = vector.broadcast %cst_1 : f32 to vector<10x1xf32>
    %5 = arith.divf %3, %4 : vector<10x1xf32>
    %6 = vector.broadcast %5 : vector<10x1xf32> to vector<10x128xf32>
    %7 = arith.subf %1, %6 : vector<10x128xf32>
    %8 = arith.mulf %7, %7 : vector<10x128xf32>
    %cst_2 = arith.constant dense<0.000000e+00> : vector<10xf32>
    %9 = vector.multi_reduction <add>, %8, %cst_2 [1] : vector<10x128xf32> to vector<10xf32>
    %10 = vector.shape_cast %9 : vector<10xf32> to vector<10x1xf32>
    %cst_3 = arith.constant 1.280000e+02 : f32
    %11 = vector.broadcast %cst_3 : f32 to vector<10x1xf32>
    %12 = arith.divf %10, %11 : vector<10x1xf32>
    %cst_4 = arith.constant 9.99999974E-6 : f32
    %13 = vector.broadcast %cst_4 : f32 to vector<10x1xf32>
    %14 = arith.addf %12, %13 : vector<10x1xf32>
    %15 = math.rsqrt %14 : vector<10x1xf32>
    %16 = vector.broadcast %15 : vector<10x1xf32> to vector<10x128xf32>
    %17 = arith.mulf %7, %16 : vector<10x128xf32>
    %c0_5 = arith.constant 0 : index
    %c0_6 = arith.constant 0 : index
    %18 = vector.load %arg4[%c0_5, %c0_6] : memref<1x128xf32, #tpu.memory_space<vmem>>, vector<1x128xf32>
    %19 = vector.broadcast %18 : vector<1x128xf32> to vector<10x128xf32>
    %20 = arith.mulf %17, %19 : vector<10x128xf32>
    %c0_7 = arith.constant 0 : index
    %c0_8 = arith.constant 0 : index
    %21 = vector.load %arg5[%c0_7, %c0_8] : memref<1x128xf32, #tpu.memory_space<vmem>>, vector<1x128xf32>
    %22 = vector.broadcast %21 : vector<1x128xf32> to vector<10x128xf32>
    %23 = arith.addf %20, %22 : vector<10x128xf32>
    %24 = arith.truncf %23 : vector<10x128xf32> to vector<10x128xbf16>
    %c0_9 = arith.constant 0 : index
    %c0_10 = arith.constant 0 : index
    %25 = vector.load %arg3[%c0_9, %c0_10] : memref<128x64xbf16, #tpu.memory_space<vmem>>, vector<128x64xbf16>
    %cst_11 = arith.constant dense<0.000000e+00> : vector<10x64xf32>
    %26 = tpu.matmul %24, %25, %cst_11 {dimension_numbers = #tpu.dot_dimension_numbers<[1], [0], [0], [1], [0, 0, 1, 1], [], []>} : vector<10x128xbf16>, vector<128x64xbf16>, vector<10x64xf32> -> vector<10x64xf32>
    %27 = arith.truncf %26 : vector<10x64xf32> to vector<10x64xbf16>
    %c0_12 = arith.constant 0 : index
    %c0_13 = arith.constant 0 : index
    %28 = vector.load %arg6[%c0_12, %c0_13] : memref<10x64xbf16, #tpu.memory_space<vmem>>, vector<10x64xbf16>
    tpu.vector_store %arg6[%c0_12, %c0_13], %27 {strides = array<i32>} : memref<10x64xbf16, #tpu.memory_space<vmem>>, vector<10x64xbf16>,
    return
  }
  func.func @transform_0(%arg0: i32, %arg1: i32) -> (i32, i32) {
    %c0_i32 = arith.constant 0 : i32
    %c0_i32_0 = arith.constant 0 : i32
    return %arg1, %c0_i32 : i32, i32
  }
  func.func @transform_1(%arg0: i32, %arg1: i32) -> (i32, i32) {
    %c0_i32 = arith.constant 0 : i32
    %c0_i32_0 = arith.constant 0 : i32
    return %c0_i32, %arg0 : i32, i32
  }
  func.func @transform_2(%arg0: i32, %arg1: i32) -> (i32, i32) {
    %c0_i32 = arith.constant 0 : i32
    %c0_i32_0 = arith.constant 0 : i32
    %c0_i32_1 = arith.constant 0 : i32
    return %c0_i32, %c0_i32_0 : i32, i32
  }
  func.func @transform_3(%arg0: i32, %arg1: i32) -> (i32, i32) {
    %c0_i32 = arith.constant 0 : i32
    %c0_i32_0 = arith.constant 0 : i32
    %c0_i32_1 = arith.constant 0 : i32
    return %c0_i32, %c0_i32_0 : i32, i32
  }
  func.func @transform_4(%arg0: i32, %arg1: i32) -> (i32, i32) {
    %c0_i32 = arith.constant 0 : i32
    return %arg1, %arg0 : i32, i32
  }
}

module attributes {stable_mosaic.version = 11 : i64} {
  func.func @_fused_linear_kernel(%arg0: i32, %arg1: i32, %arg2: memref<8x64xbf16, #tpu.memory_space<vmem>>, %arg3: memref<64x16xbf16, #tpu.memory_space<vmem>>, %arg4: memref<8x16xf32, #tpu.memory_space<vmem>>) attributes {dimension_semantics = [#tpu.dimension_semantics<parallel>, #tpu.dimension_semantics<parallel>], iteration_bounds = array<i64: 1, 1>, scalar_prefetch = 0 : i64, scratch_operands = 0 : i64, tpu.core_type = #tpu.core_type<tc>, window_params = [{transform_indices = @transform_0, window_bounds = array<i64: 8, 64>}, {transform_indices = @transform_1, window_bounds = array<i64: 64, 16>}, {transform_indices = @transform_2, window_bounds = array<i64: 8, 16>}]} {
    %c0 = arith.constant 0 : index
    %c0_0 = arith.constant 0 : index
    %0 = vector.load %arg2[%c0, %c0_0] : memref<8x64xbf16, #tpu.memory_space<vmem>>, vector<8x64xbf16>
    %c0_1 = arith.constant 0 : index
    %c0_2 = arith.constant 0 : index
    %1 = vector.load %arg3[%c0_1, %c0_2] : memref<64x16xbf16, #tpu.memory_space<vmem>>, vector<64x16xbf16>
    %cst = arith.constant dense<0.000000e+00> : vector<8x16xf32>
    %2 = tpu.matmul %0, %1, %cst {dimension_numbers = #tpu.dot_dimension_numbers<[1], [0], [0], [1], [0, 0, 1, 1], [], []>} : vector<8x64xbf16>, vector<64x16xbf16>, vector<8x16xf32> -> vector<8x16xf32>
    %c0_3 = arith.constant 0 : index
    %c0_4 = arith.constant 0 : index
    %3 = vector.load %arg4[%c0_3, %c0_4] : memref<8x16xf32, #tpu.memory_space<vmem>>, vector<8x16xf32>
    tpu.vector_store %arg4[%c0_3, %c0_4], %2 {strides = array<i32>} : memref<8x16xf32, #tpu.memory_space<vmem>>, vector<8x16xf32>,
    return
  }
  func.func @transform_0(%arg0: i32, %arg1: i32) -> (i32, i32) {
    %c0_i32 = arith.constant 0 : i32
    %c0_i32_0 = arith.constant 0 : i32
    return %arg1, %c0_i32 : i32, i32
  }
  func.func @transform_1(%arg0: i32, %arg1: i32) -> (i32, i32) {
    %c0_i32 = arith.constant 0 : i32
    %c0_i32_0 = arith.constant 0 : i32
    return %c0_i32, %arg0 : i32, i32
  }
  func.func @transform_2(%arg0: i32, %arg1: i32) -> (i32, i32) {
    %c0_i32 = arith.constant 0 : i32
    return %arg1, %arg0 : i32, i32
  }
}

module attributes {stable_mosaic.version = 11 : i64} {
  func.func @_score_combine_kernel(%arg0: memref<2x16xf32, #tpu.memory_space<vmem>>, %arg1: memref<2x16xf32, #tpu.memory_space<vmem>>, %arg2: memref<2x16xf32, #tpu.memory_space<vmem>>) attributes {dimension_semantics = [], scalar_prefetch = 0 : i64, scratch_operands = 0 : i64, tpu.core_type = #tpu.core_type<tc>} {
    %c0 = arith.constant 0 : index
    %c0_0 = arith.constant 0 : index
    %0 = vector.load %arg0[%c0, %c0_0] : memref<2x16xf32, #tpu.memory_space<vmem>>, vector<2x16xf32>
    %c0_1 = arith.constant 0 : index
    %c0_2 = arith.constant 0 : index
    %1 = vector.load %arg1[%c0_1, %c0_2] : memref<2x16xf32, #tpu.memory_space<vmem>>, vector<2x16xf32>
    %2 = arith.mulf %0, %0 : vector<2x16xf32>
    %cst = arith.constant dense<0.000000e+00> : vector<2xf32>
    %3 = vector.multi_reduction <add>, %2, %cst [1] : vector<2x16xf32> to vector<2xf32>
    %4 = vector.shape_cast %3 : vector<2xf32> to vector<2x1xf32>
    %cst_3 = arith.constant 9.99999996E-13 : f32
    %5 = vector.broadcast %cst_3 : f32 to vector<2x1xf32>
    %6 = arith.addf %4, %5 : vector<2x1xf32>
    %7 = math.rsqrt %6 : vector<2x1xf32>
    %8 = vector.broadcast %7 : vector<2x1xf32> to vector<2x16xf32>
    %9 = arith.mulf %0, %8 : vector<2x16xf32>
    %10 = arith.mulf %1, %1 : vector<2x16xf32>
    %cst_4 = arith.constant dense<0.000000e+00> : vector<2xf32>
    %11 = vector.multi_reduction <add>, %10, %cst_4 [1] : vector<2x16xf32> to vector<2xf32>
    %12 = vector.shape_cast %11 : vector<2xf32> to vector<2x1xf32>
    %cst_5 = arith.constant 9.99999996E-13 : f32
    %13 = vector.broadcast %cst_5 : f32 to vector<2x1xf32>
    %14 = arith.addf %12, %13 : vector<2x1xf32>
    %15 = math.rsqrt %14 : vector<2x1xf32>
    %16 = vector.broadcast %15 : vector<2x1xf32> to vector<2x16xf32>
    %17 = arith.mulf %1, %16 : vector<2x16xf32>
    %18 = arith.addf %9, %17 : vector<2x16xf32>
    %cst_6 = arith.constant 5.000000e-01 : f32
    %19 = vector.broadcast %cst_6 : f32 to vector<2x16xf32>
    %20 = arith.mulf %19, %18 : vector<2x16xf32>
    %c0_7 = arith.constant 0 : index
    %c0_8 = arith.constant 0 : index
    %21 = vector.load %arg2[%c0_7, %c0_8] : memref<2x16xf32, #tpu.memory_space<vmem>>, vector<2x16xf32>
    tpu.vector_store %arg2[%c0_7, %c0_8], %20 {strides = array<i32>} : memref<2x16xf32, #tpu.memory_space<vmem>>, vector<2x16xf32>,
    return
  }
}

module attributes {stable_mosaic.version = 11 : i64} {
  func.func @_fused_linear_kernel(%arg0: i32, %arg1: i32, %arg2: memref<2x64xbf16, #tpu.memory_space<vmem>>, %arg3: memref<64x16xbf16, #tpu.memory_space<vmem>>, %arg4: memref<2x16xf32, #tpu.memory_space<vmem>>) attributes {dimension_semantics = [#tpu.dimension_semantics<parallel>, #tpu.dimension_semantics<parallel>], iteration_bounds = array<i64: 1, 1>, scalar_prefetch = 0 : i64, scratch_operands = 0 : i64, tpu.core_type = #tpu.core_type<tc>, window_params = [{transform_indices = @transform_0, window_bounds = array<i64: 2, 64>}, {transform_indices = @transform_1, window_bounds = array<i64: 64, 16>}, {transform_indices = @transform_2, window_bounds = array<i64: 2, 16>}]} {
    %c0 = arith.constant 0 : index
    %c0_0 = arith.constant 0 : index
    %0 = vector.load %arg2[%c0, %c0_0] : memref<2x64xbf16, #tpu.memory_space<vmem>>, vector<2x64xbf16>
    %c0_1 = arith.constant 0 : index
    %c0_2 = arith.constant 0 : index
    %1 = vector.load %arg3[%c0_1, %c0_2] : memref<64x16xbf16, #tpu.memory_space<vmem>>, vector<64x16xbf16>
    %cst = arith.constant dense<0.000000e+00> : vector<2x16xf32>
    %2 = tpu.matmul %0, %1, %cst {dimension_numbers = #tpu.dot_dimension_numbers<[1], [0], [0], [1], [0, 0, 1, 1], [], []>} : vector<2x64xbf16>, vector<64x16xbf16>, vector<2x16xf32> -> vector<2x16xf32>
    %c0_3 = arith.constant 0 : index
    %c0_4 = arith.constant 0 : index
    %3 = vector.load %arg4[%c0_3, %c0_4] : memref<2x16xf32, #tpu.memory_space<vmem>>, vector<2x16xf32>
    tpu.vector_store %arg4[%c0_3, %c0_4], %2 {strides = array<i32>} : memref<2x16xf32, #tpu.memory_space<vmem>>, vector<2x16xf32>,
    return
  }
  func.func @transform_0(%arg0: i32, %arg1: i32) -> (i32, i32) {
    %c0_i32 = arith.constant 0 : i32
    %c0_i32_0 = arith.constant 0 : i32
    return %arg1, %c0_i32 : i32, i32
  }
  func.func @transform_1(%arg0: i32, %arg1: i32) -> (i32, i32) {
    %c0_i32 = arith.constant 0 : i32
    %c0_i32_0 = arith.constant 0 : i32
    return %c0_i32, %arg0 : i32, i32
  }
  func.func @transform_2(%arg0: i32, %arg1: i32) -> (i32, i32) {
    %c0_i32 = arith.constant 0 : i32
    return %arg1, %arg0 : i32, i32
  }
}

</mosaic_0001>

<bundles_post_ra>
// kernel: clip_vit_forward.17
= control target key start
LH: loop header
LB: loop body
LE: loop exit
PB: predicated region body
PF: predicated region fallthrough
CT: control target
= control target key end

     0   :  { %vm20_vm0 = vcmask 1041408   ;;  %v97_v5 = vmov 128.0   ;;  %s138_s0 = inlined_call_operand.vmem [shape: bf16[10,128], index: 0, kind: input, shape index: {}]   ;;  %s139_s1 = inlined_call_operand.vmem [shape: f32[1,128], index: 1, kind: input, shape index: {}]   ;;  %s140_s2 = inlined_call_operand.vmem [shape: f32[1,128], index: 2, kind: input, shape index: {}]   ;;  %s141_s3 = inlined_call_operand.vmem [shape: bf16[10,128], index: 3, kind: output, shape index: {}]  }
   0x1   :  { %v15_v0 = vld [vmem:[%s138_s0 + $0x4] sm:$0x1]  ;;  %v14_v3 = vld [vmem:[%s138_s0] sm:$0xf]  ;;  %91 = vrcp.f32 %v97_v5 }
   0x2   :  { %v17_v1 = vunpack.c.l.bf16 %v15_v0  ;;  %v16_v4 = vunpack.c.l.bf16 %v14_v3  ;;  %v89_v35 = vld [vmem:[%s139_s1] ss:$0 sm:$0xff] }
   0x3   :  { %v90_v38 = vld [vmem:[%s140_s2] ss:$0 sm:$0xff] }
   0x4   :  { %v21_v2 = vsel %vm20_vm0, %v17_v1, 0.0 }
   0x5   :  { %22 = vadd.xlane.f32.xlu0 %v21_v2 }
   0x7   :  { %v92_v6 = vpop.eup %91 }
   0x8   :  { %v25_v7 = vmul.f32 128.0, %v92_v6  ;;  %vm29_vm1 = vweird.f32 %v92_v6 }
   0xa   :  { %v26_v8 = vsub.f32 1.0, %v25_v7 }
   0xc   :  { %v27_v9 = vmul.f32 %v92_v6, %v26_v8 }
   0xd   :  { %18 = vadd.xlane.f32.xlu0 %v16_v4 }
   0xe   :  { %v28_v11 = vadd.f32 %v92_v6, %v27_v9 }
  0x10   :  { %v30_v12 = vsel %vm29_vm1, %v92_v6, %v28_v11 }
  0x78   :  { %v23_v10 = vpop.xlane.xlu0 %22 }
  0x79   :  { %v32_v15 = vmul.f32 %v30_v12, %v23_v10 }
  0x7b   :  { %v34_v18 = vsub.f32 %v17_v1, %v32_v15 }
  0x7d   :  { %v36_v19 = vmul.f32 %v34_v18, %v34_v18 }
  0x7f   :  { %v39_v20 = vsel %vm20_vm0, %v36_v19, 0.0 }
  0x80   :  { %v19_v13 = vpop.xlane.xlu0 %18 }
  0x81   :  { %v31_v14 = vmul.f32 %v30_v12, %v19_v13 }
  0x83   :  { %v33_v16 = vsub.f32 %v16_v4, %v31_v14 }
  0x85   :  { %v35_v17 = vmul.f32 %v33_v16, %v33_v16 }
  0x87   :  { %37 = vadd.xlane.f32.xlu1 %v35_v17 }
  0x8f   :  { %40 = vadd.xlane.f32.xlu1 %v39_v20 }
  0xfa   :  { %v38_v21 = vpop.xlane.xlu1 %37 }
  0xfb   :  { %v42_v22 = vmul.f32 %v38_v21, %v30_v12 }
  0xfd   :  { %v44_v23 = vadd.f32 1e-05, %v42_v22 }
  0xff   :  { %93 = vrsqrt.f32 %v44_v23  ;;  %vm52_vm3 = vweird.f32 %v44_v23 }
 0x102   :  { %v41_v24 = vpop.xlane.xlu1 %40 }
 0x103   :  { %v43_v25 = vmul.f32 %v41_v24, %v30_v12 }
 0x105   :  { %v94_v26 = vpop.eup %93  ;;  %v45_v27 = vadd.f32 1e-05, %v43_v25 }
 0x106   :  { %v47_v28 = vmul.f32 %v94_v26, %v44_v23  ;;  %vm53_vm2 = vweird.f32 %v94_v26 }
 0x107   :  { %95 = vrsqrt.f32 %v45_v27  ;;  %vm54_vm4 = vmor %vm52_vm3, %vm53_vm2  ;;  %vm62_vm6 = vweird.f32 %v45_v27 }
 0x108   :  { %v48_v29 = vmul.f32 %v94_v26, %v47_v28 }
 0x10a   :  { %v49_v30 = vmul.f32 0.5, %v48_v29 }
 0x10c   :  { %v50_v31 = vsub.f32 1.5, %v49_v30 }
 0x10d   :  { %v96_v32 = vpop.eup %95 }
 0x10e   :  { %v51_v33 = vmul.f32 %v94_v26, %v50_v31  ;;  %v57_v34 = vmul.f32 %v96_v32, %v45_v27  ;;  %vm63_vm5 = vweird.f32 %v96_v32 }
 0x10f   :  { %vm64_vm7 = vmor %vm62_vm6, %vm63_vm5 }
 0x110   :  { %v55_v36 = vsel %vm54_vm4, %v94_v26, %v51_v33  ;;  %v58_v37 = vmul.f32 %v96_v32, %v57_v34 }
 0x111   :  { %v66_v39 = vmul.f32 %v55_v36, %v33_v16 }
 0x112   :  { %v59_v40 = vmul.f32 0.5, %v58_v37 }
 0x113   :  { %v72_v41 = vmul.f32 %v89_v35, %v66_v39 }
 0x114   :  { %v60_v42 = vsub.f32 1.5, %v59_v40 }
 0x115   :  { %v78_v43 = vadd.f32 %v90_v38, %v72_v41 }
 0x116   :  { %v61_v44 = vmul.f32 %v96_v32, %v60_v42 }
 0x117   :  { %v80_v45 = vpack.c.bf16 %v78_v43, %v78_v43 }
 0x118   :  { %v65_v46 = vsel %vm64_vm7, %v96_v32, %v61_v44 }
 0x119   :  { %82 = vst [vmem:[%s141_s3] sm:$0xf] %v80_v45  ;;  %v67_v47 = vmul.f32 %v65_v46, %v34_v18 }
 0x11b   :  { %v73_v48 = vmul.f32 %v89_v35, %v67_v47 }
 0x11d   :  { %v79_v49 = vadd.f32 %v90_v38, %v73_v48 }
 0x11f   :  { %v81_v50 = vpack.c.bf16 %v79_v49, %v79_v49 }
 0x121   :  { %83 = vst [vmem:[%s141_s3 + $0x4] sm:$0x1] %v81_v50 }

// kernel: clip_vit_forward.16
= control target key start
LH: loop header
LB: loop body
LE: loop exit
PB: predicated region body
PF: predicated region fallthrough
CT: control target
= control target key end

     0   :  { %s914_s1 = inlined_call_operand.vmem [shape: bf16[768,128], index: 1, kind: input, shape index: {}]   ;;  %s915_s0 = inlined_call_operand.vmem [shape: bf16[8,768], index: 0, kind: input, shape index: {}]   ;;  %s916_s2 = inlined_call_operand.vmem [shape: bf16[8,128], index: 2, kind: output, shape index: {}]  }
   0x1   :  { %v702_v0 = vld [vmem:[%s914_s1 + $0x38] sm:$0xff]  ;;  %v701_v2 = vld [vmem:[%s914_s1 + $0x30] sm:$0xff]  ;;  %v700_v8 = vld [vmem:[%s914_s1 + $0x28] sm:$0xff] }
   0x2   :  { %v710_v1 = vld [vmem:[%s914_s1 + $0x78] sm:$0xff]  ;;  %419 = vmatpush.bf16.msra.mxu0 %v702_v0  ;;  %v709_v3 = vld [vmem:[%s914_s1 + $0x70] sm:$0xff]  ;;  %v708_v9 = vld [vmem:[%s914_s1 + $0x68] sm:$0xff] }
   0x3   :  { %432 = vmatpush.bf16.msra.mxu1 %v710_v1  ;;  %v718_v4 = vld [vmem:[%s914_s1 + $0xb8] sm:$0xff]  ;;  %v717_v6 = vld [vmem:[%s914_s1 + $0xb0] sm:$0xff]  ;;  %v716_v10 = vld [vmem:[%s914_s1 + $0xa8] sm:$0xff] }
   0x4   :  { %v726_v5 = vld [vmem:[%s914_s1 + $0xf8] sm:$0xff]  ;;  %445 = vmatpush.bf16.msra.mxu2 %v718_v4  ;;  %v725_v7 = vld [vmem:[%s914_s1 + $0xf0] sm:$0xff]  ;;  %v724_v11 = vld [vmem:[%s914_s1 + $0xe8] sm:$0xff] }
   0x5   :  { %458 = vmatpush.bf16.msra.mxu3 %v726_v5  ;;  %v699_v12 = vld [vmem:[%s914_s1 + $0x20] sm:$0xff]  ;;  %v698_v16 = vld [vmem:[%s914_s1 + $0x18] sm:$0xff]  ;;  %v697_v20 = vld [vmem:[%s914_s1 + $0x10] sm:$0xff] }
   0x6   :  { %420 = vmatpush.bf16.msra.mxu0 %v701_v2  ;;  %v707_v13 = vld [vmem:[%s914_s1 + $0x60] sm:$0xff]  ;;  %v706_v17 = vld [vmem:[%s914_s1 + $0x58] sm:$0xff]  ;;  %v705_v21 = vld [vmem:[%s914_s1 + $0x50] sm:$0xff] }
   0x7   :  { %433 = vmatpush.bf16.msra.mxu1 %v709_v3  ;;  %v715_v14 = vld [vmem:[%s914_s1 + $0xa0] sm:$0xff]  ;;  %v714_v18 = vld [vmem:[%s914_s1 + $0x98] sm:$0xff]  ;;  %v713_v22 = vld [vmem:[%s914_s1 + $0x90] sm:$0xff] }
   0x8   :  { %446 = vmatpush.bf16.msra.mxu2 %v717_v6  ;;  %v723_v15 = vld [vmem:[%s914_s1 + $0xe0] sm:$0xff]  ;;  %v722_v19 = vld [vmem:[%s914_s1 + $0xd8] sm:$0xff]  ;;  %v721_v23 = vld [vmem:[%s914_s1 + $0xd0] sm:$0xff] }
   0x9   :  { %459 = vmatpush.bf16.msra.mxu3 %v725_v7  ;;  %v696_v24 = vld [vmem:[%s914_s1 + $0x8] sm:$0xff]  ;;  %v11_v26 = vld [vmem:[%s915_s0] sm:$0xff]  ;;  %v734_v34 = vld [vmem:[%s914_s1 + $0x138] sm:$0xff] }
   0xa   :  { %421 = vmatpush.bf16.msra.mxu0 %v700_v8  ;;  %v704_v25 = vld [vmem:[%s914_s1 + $0x48] sm:$0xff]  ;;  %v113_v29 = vunpack.c.l.b16 %v11_v26  ;;  %v114_v30 = vunpack.c.h.b16 %v11_v26  ;;  %v695_v32 = vld [vmem:[%s914_s1] sm:$0xff]  ;;  %v742_v35 = vld [vmem:[%s914_s1 + $0x178] sm:$0xff] }
   0xb   :  { %434 = vmatpush.bf16.msra.mxu1 %v708_v9  ;;  %v712_v27 = vld [vmem:[%s914_s1 + $0x88] sm:$0xff]  ;;  %v703_v33 = vld [vmem:[%s914_s1 + $0x40] sm:$0xff]  ;;  %v733_v42 = vld [vmem:[%s914_s1 + $0x130] sm:$0xff] }
   0xc   :  { %447 = vmatpush.bf16.msra.mxu2 %v716_v10  ;;  %v720_v28 = vld [vmem:[%s914_s1 + $0xc8] sm:$0xff]  ;;  %v711_v36 = vld [vmem:[%s914_s1 + $0x80] sm:$0xff]  ;;  %v119_v40 = vpack.c.b16 %v113_v29, %v113_v29  ;;  %v120_v41 = vpack.c.b16 %v114_v30, %v114_v30  ;;  %v741_v43 = vld [vmem:[%s914_s1 + $0x170] sm:$0xff] }
   0xd   :  { %460 = vmatpush.bf16.msra.mxu3 %v724_v11  ;;  %v12_v31 = vld [vmem:[%s915_s0 + $0x8] sm:$0xff]  ;;  %v719_v37 = vld [vmem:[%s914_s1 + $0xc0] sm:$0xff]  ;;  %v730_v50 = vld [vmem:[%s914_s1 + $0x118] sm:$0xff] }
   0xe   :  { %422 = vmatpush.bf16.msra.mxu0 %v699_v12  ;;  %v115_v38 = vunpack.c.l.b16 %v12_v31  ;;  %v116_v39 = vunpack.c.h.b16 %v12_v31  ;;  %v732_v46 = vld [vmem:[%s914_s1 + $0x128] sm:$0xff]  ;;  %v731_v48 = vld [vmem:[%s914_s1 + $0x120] sm:$0xff]  ;;  %v738_v51 = vld [vmem:[%s914_s1 + $0x158] sm:$0xff] }
   0xf   :  { %435 = vmatpush.bf16.msra.mxu1 %v707_v13  ;;  %v740_v47 = vld [vmem:[%s914_s1 + $0x168] sm:$0xff]  ;;  %v739_v49 = vld [vmem:[%s914_s1 + $0x160] sm:$0xff]  ;;  %v729_v52 = vld [vmem:[%s914_s1 + $0x110] sm:$0xff] }
  0x10   :  { %448 = vmatpush.bf16.msra.mxu2 %v715_v14  ;;  %v121_v44 = vpack.c.b16 %v115_v38, %v115_v38  ;;  %v122_v45 = vpack.c.b16 %v116_v39, %v116_v39  ;;  %v737_v53 = vld [vmem:[%s914_s1 + $0x150] sm:$0xff]  ;;  %v728_v54 = vld [vmem:[%s914_s1 + $0x108] sm:$0xff]  ;;  %v727_v59 = vld [vmem:[%s914_s1 + $0x100] sm:$0xff] }
  0x11   :  { %461 = vmatpush.bf16.msra.mxu3 %v723_v15  ;;  %v736_v55 = vld [vmem:[%s914_s1 + $0x148] sm:$0xff]  ;;  %v13_v56 = vld [vmem:[%s915_s0 + $0x10] sm:$0xff]  ;;  %v735_v60 = vld [vmem:[%s914_s1 + $0x140] sm:$0xff] }
  0x12   :  { %423 = vmatpush.bf16.msra.mxu0 %v698_v16  ;;  %v117_v57 = vunpack.c.l.b16 %v13_v56  ;;  %v118_v58 = vunpack.c.h.b16 %v13_v56 }
  0x13   :  { %436 = vmatpush.bf16.msra.mxu1 %v706_v17 }
  0x14   :  { %449 = vmatpush.bf16.msra.mxu2 %v714_v18  ;;  %v123_v61 = vpack.c.b16 %v117_v57, %v117_v57  ;;  %v124_v62 = vpack.c.b16 %v118_v58, %v118_v58 }
  0x15   :  { %462 = vmatpush.bf16.msra.mxu3 %v722_v19 }
  0x16   :  { %424 = vmatpush.bf16.msra.mxu0 %v697_v20 }
  0x17   :  { %437 = vmatpush.bf16.msra.mxu1 %v705_v21 }
  0x18   :  { %450 = vmatpush.bf16.msra.mxu2 %v713_v22 }
  0x19   :  { %463 = vmatpush.bf16.msra.mxu3 %v721_v23 }
  0x1a   :  { %425 = vmatpush.bf16.msra.mxu0 %v696_v24 }
  0x1b   :  { %438 = vmatpush.bf16.msra.mxu1 %v704_v25 }
  0x1c   :  { %451 = vmatpush.bf16.msra.mxu2 %v712_v27 }
  0x1d   :  { %464 = vmatpush.bf16.msra.mxu3 %v720_v28 }
  0x1e   :  { %426 = vmatpush.bf16.msra.mxu0 %v695_v32 }
  0x1f   :  { %439 = vmatpush.bf16.msra.mxu1 %v703_v33 }
  0x20   :  { %452 = vmatpush.bf16.msra.mxu2 %v711_v36 }
  0x21   :  { %465 = vmatpush.bf16.msra.mxu3 %v719_v37  ;;  %427 = vmatmul.bf16.vlgmr.msra.gmra.mxu0 %v119_v40 }
  0x22   :  { %471 = vmatpush.bf16.msrb.mxu0 %v734_v34  ;;  %440 = vmatmul.bf16.vlgmr.msra.gmra.mxu1 %v120_v41 }
  0x23   :  { %484 = vmatpush.bf16.msrb.mxu1 %v742_v35  ;;  %453 = vmatmul.bf16.vlgmr.msra.gmra.mxu2 %v121_v44 }
  0x24   :  { %466 = vmatmul.bf16.vlgmr.msra.gmra.mxu3 %v122_v45 }
  0x26   :  { %472 = vmatpush.bf16.msrb.mxu0 %v733_v42 }
  0x27   :  { %485 = vmatpush.bf16.msrb.mxu1 %v741_v43 }
  0x2a   :  { %473 = vmatpush.bf16.msrb.mxu0 %v732_v46 }
  0x2b   :  { %486 = vmatpush.bf16.msrb.mxu1 %v740_v47 }
  0x2e   :  { %474 = vmatpush.bf16.msrb.mxu0 %v731_v48 }
  0x2f   :  { %487 = vmatpush.bf16.msrb.mxu1 %v739_v49 }
  0x32   :  { %475 = vmatpush.bf16.msrb.mxu0 %v730_v50 }
  0x33   :  { %488 = vmatpush.bf16.msrb.mxu1 %v738_v51 }
  0x36   :  { %476 = vmatpush.bf16.msrb.mxu0 %v729_v52 }
  0x37   :  { %489 = vmatpush.bf16.msrb.mxu1 %v737_v53 }
  0x3a   :  { %477 = vmatpush.bf16.msrb.mxu0 %v728_v54 }
  0x3b   :  { %490 = vmatpush.bf16.msrb.mxu1 %v736_v55 }
  0x3e   :  { %478 = vmatpush.bf16.msrb.mxu0 %v727_v59 }
  0x3f   :  { %491 = vmatpush.bf16.msrb.mxu1 %v735_v60 }
  0x41   :  { %479 = vmatmul.bf16.vlgmr.msrb.gmra.mxu0 %v123_v61 }
  0x42   :  { %492 = vmatmul.bf16.vlgmr.msrb.gmra.mxu1 %v124_v62 }
  0x9e   :  { %v428_v63 = vpop.f32.mrf.mxu0 }
  0x9f   :  { %v441_v0 = vpop.f32.mrf.mxu1 }
  0xa0   :  { %v442_v7 = vadd.f32 %v441_v0, %v428_v63 }
  0xa6   :  { %v430_v1 = vpop.f32.mrf.mxu0  ;;  %v454_v3 = vpop.f32.mrf.mxu2 }
  0xa7   :  { %v443_v2 = vpop.f32.mrf.mxu1  ;;  %v467_v4 = vpop.f32.mrf.mxu3  ;;  %v455_v8 = vadd.f32 %v454_v3, %v442_v7 }
  0xa9   :  { %v468_v9 = vadd.f32 %v467_v4, %v455_v8 }
  0xae   :  { %v456_v5 = vpop.f32.mrf.mxu2 }
  0xaf   :  { %v469_v6 = vpop.f32.mrf.mxu3 }
  0xbe   :  { %v480_v10 = vpop.f32.mrf.mxu0 }
  0xbf   :  { %v493_v11 = vpop.f32.mrf.mxu1  ;;  %v481_v12 = vadd.f32 %v480_v10, %v468_v9 }
  0xc1   :  { %v494_v13 = vadd.f32 %v493_v11, %v481_v12 }
  0xc3   :  { %v497_v14 = vpack.c.bf16 %v494_v13, %v494_v13 }
  0xc5   :  { %498 = vst [vmem:[%s916_s2] sm:$0xf] %v497_v14 }
  0xc6   :  { %v482_v15 = vpop.f32.mrf.mxu0 }
  0xc7   :  { %v495_v16 = vpop.f32.mrf.mxu1 }

// kernel: clip_vit_forward.18
= control target key start
LH: loop header
LB: loop body
LE: loop exit
PB: predicated region body
PF: predicated region fallthrough
CT: control target
= control target key end

     0   :  { %10 = vsyncpa [#allocation3], 0  ;;  %s484_s21 = smov [#allocation2]   ;;  %s485_s23 = smov 192   ;;  %s566_s0 = inlined_call_operand.vmem [shape: bf16[10,128], index: 0, kind: input, shape index: {}]   ;;  %s567_s1 = inlined_call_operand.hbm [shape: bf16[128,384], index: 1, kind: input, shape index: {}]   ;;  %s568_s2 = inlined_call_operand.vmem [shape: f32[1,384], index: 2, kind: input, shape index: {}]   ;;  %s569_s3 = inlined_call_operand.vmem [shape: f32[1,128], index: 3, kind: input, shape index: {}]   ;;  %s570_s4 = inlined_call_operand.vmem [shape: f32[1,128], index: 4, kind: input, shape index: {}]   ;;  %s571_s5 = inlined_call_operand.vmem [shape: bf16[10,384], index: 5, kind: output, shape index: {}]  }
   0x1   :  { %s17_s20 = sshll.u32 %s567_s1, 4  ;;  %s19_s22 = sshll.u32 %s484_s21, 4  ;;  %s18_s20 = int_to_ptr.hbm [resolvable:$true] %s17_s20  ;;  %s20_s22 = int_to_ptr.vmem [resolvable:$true] %s19_s22 }
   0x2   :  { %s486_s24 = smov 12  }
   0x3   :  { %25 = dma.hbm_to_vmem [thread:$0]  %s18_s20, 3072, %s20_s22, [#allocation3], %s485_s23, %s485_s23, %s486_s24  }
   0x4   :  { %482 = dma.done.wait [#allocation3], 3072  }
   0x5   :  { %483 = vsyncadd [#allocation3], 4294964224  ;;  %v37_v0 = vld [vmem:[%s566_s0 + $0x4] sm:$0x1]  ;;  %vm42_vm0 = vcmask 1041408   ;;  %v487_v5 = vmov 128.0  }
   0x6   :  { %v39_v1 = vunpack.c.l.bf16 %v37_v0  ;;  %v36_v3 = vld [vmem:[%s566_s0] sm:$0xf]  ;;  %452 = vrcp.f32 %v487_v5  ;;  %v412_v21 = vld [vmem:[#allocation2 + $0xa8] sm:$0xf]  ;;  %v444_v22 = vld [vmem:[#allocation2 + $0xb0] sm:$0xf0] }
   0x7   :  { %v38_v4 = vunpack.c.l.bf16 %v36_v3  ;;  %v443_v23 = vld [vmem:[#allocation2 + $0xac] sm:$0xf]  ;;  %v413_v24 = vor.u32 %v444_v22, %v412_v21  ;;  %v414_v25 = vld [vmem:[#allocation2 + $0xb4] sm:$0xf0]  ;;  %v420_v26 = vld [vmem:[#allocation2 + $0xb0] sm:$0xf] }
   0x8   :  { %v43_v2 = vsel %vm42_vm0, %v39_v1, 0.0  ;;  %v445_v27 = vld [vmem:[#allocation2 + $0xb8] sm:$0xf0]  ;;  %v417_v28 = vor.u32 %v443_v23, %v414_v25  ;;  %v400_v30 = vld [vmem:[#allocation2 + $0x90] sm:$0xf] }
   0x9   :  { %44 = vadd.xlane.f32.xlu0 %v43_v2  ;;  %v421_v29 = vor.u32 %v445_v27, %v420_v26  ;;  %271 = vmatpush.bf16.msra.mxu0 %v413_v24  ;;  %v441_v31 = vld [vmem:[#allocation2 + $0x98] sm:$0xf0]  ;;  %v440_v32 = vld [vmem:[#allocation2 + $0x94] sm:$0xf]  ;;  %v402_v34 = vld [vmem:[#allocation2 + $0x9c] sm:$0xf0] }
   0xa   :  { %285 = vmatpush.bf16.msra.mxu1 %v417_v28  ;;  %v401_v33 = vor.u32 %v441_v31, %v400_v30  ;;  %v408_v35 = vld [vmem:[#allocation2 + $0x98] sm:$0xf]  ;;  %v442_v36 = vld [vmem:[#allocation2 + $0xa0] sm:$0xf0]  ;;  %v405_v37 = vor.u32 %v440_v32, %v402_v34  ;;  %v437_v41 = vld [vmem:[#allocation2 + $0x7c] sm:$0xf] }
   0xb   :  { %299 = vmatpush.bf16.msra.mxu2 %v421_v29  ;;  %v409_v38 = vor.u32 %v442_v36, %v408_v35  ;;  %v388_v39 = vld [vmem:[#allocation2 + $0x78] sm:$0xf]  ;;  %v438_v40 = vld [vmem:[#allocation2 + $0x80] sm:$0xf0]  ;;  %v390_v43 = vld [vmem:[#allocation2 + $0x84] sm:$0xf0] }
   0xc   :  { %v453_v6 = vpop.eup %452  ;;  %v389_v42 = vor.u32 %v438_v40, %v388_v39  ;;  %v396_v44 = vld [vmem:[#allocation2 + $0x80] sm:$0xf]  ;;  %v439_v45 = vld [vmem:[#allocation2 + $0x88] sm:$0xf0]  ;;  %v393_v46 = vor.u32 %v437_v41, %v390_v43  ;;  %v434_v50 = vld [vmem:[#allocation2 + $0x64] sm:$0xf] }
   0xd   :  { %v47_v7 = vmul.f32 128.0, %v453_v6  ;;  %vm51_vm1 = vweird.f32 %v453_v6  ;;  %272 = vmatpush.bf16.msra.mxu0 %v401_v33  ;;  %v397_v47 = vor.u32 %v439_v45, %v396_v44  ;;  %v376_v48 = vld [vmem:[#allocation2 + $0x60] sm:$0xf]  ;;  %v435_v49 = vld [vmem:[#allocation2 + $0x68] sm:$0xf0] }
   0xe   :  { %286 = vmatpush.bf16.msra.mxu1 %v405_v37  ;;  %v377_v51 = vor.u32 %v435_v49, %v376_v48  ;;  %v378_v52 = vld [vmem:[#allocation2 + $0x6c] sm:$0xf0]  ;;  %v384_v53 = vld [vmem:[#allocation2 + $0x68] sm:$0xf]  ;;  %v436_v54 = vld [vmem:[#allocation2 + $0x70] sm:$0xf0] }
   0xf   :  { %v48_v8 = vsub.f32 1.0, %v47_v7  ;;  %300 = vmatpush.bf16.msra.mxu2 %v409_v38  ;;  %v381_v55 = vor.u32 %v434_v50, %v378_v52  ;;  %v385_v56 = vor.u32 %v436_v54, %v384_v53  ;;  %v364_v57 = vld [vmem:[#allocation2 + $0x48] sm:$0xf]  ;;  %v432_v58 = vld [vmem:[#allocation2 + $0x50] sm:$0xf0] }
  0x10   :  { %v431_v59 = vld [vmem:[#allocation2 + $0x4c] sm:$0xf]  ;;  %v365_v60 = vor.u32 %v432_v58, %v364_v57  ;;  %v366_v61 = vld [vmem:[#allocation2 + $0x54] sm:$0xf0]  ;;  %v372_v62 = vld [vmem:[#allocation2 + $0x50] sm:$0xf] }
  0x11   :  { %40 = vadd.xlane.f32.xlu0 %v38_v4  ;;  %v49_v9 = vmul.f32 %v453_v6, %v48_v8  ;;  %273 = vmatpush.bf16.msra.mxu0 %v389_v42  ;;  %v433_v63 = vld [vmem:[#allocation2 + $0x58] sm:$0xf0]  ;;  %v369_v0 = vor.u32 %v431_v59, %v366_v61  ;;  %v352_v2 = vld [vmem:[#allocation2 + $0x30] sm:$0xf]  ;;  %v360_v7 = vld [vmem:[#allocation2 + $0x38] sm:$0xf] }
  0x12   :  { %287 = vmatpush.bf16.msra.mxu1 %v393_v46  ;;  %v429_v3 = vld [vmem:[#allocation2 + $0x38] sm:$0xf0]  ;;  %v430_v8 = vld [vmem:[#allocation2 + $0x40] sm:$0xf0]  ;;  %v328_v23 = vld [vmem:[#allocation2] sm:$0xf] }
  0x13   :  { %v50_v11 = vadd.f32 %v453_v6, %v49_v9  ;;  %301 = vmatpush.bf16.msra.mxu2 %v397_v47  ;;  %v353_v5 = vor.u32 %v429_v3, %v352_v2  ;;  %v423_v24 = vld [vmem:[#allocation2 + $0x8] sm:$0xf0]  ;;  %v422_v25 = vld [vmem:[#allocation2 + $0x4] sm:$0xf]  ;;  %v330_v28 = vld [vmem:[#allocation2 + $0xc] sm:$0xf0] }
  0x14   :  { %v329_v27 = vor.u32 %v423_v24, %v328_v23  ;;  %v336_v29 = vld [vmem:[#allocation2 + $0x8] sm:$0xf]  ;;  %v424_v30 = vld [vmem:[#allocation2 + $0x10] sm:$0xf0]  ;;  %v333_v32 = vor.u32 %v422_v25, %v330_v28  ;;  %v450_v50 = vld [vmem:[%s569_s3] ss:$0 sm:$0xff] }
  0x15   :  { %v528_v12 = vsel %vm51_vm1, %v453_v6, %v50_v11  ;;  %274 = vmatpush.bf16.msra.mxu0 %v377_v51  ;;  %v354_v6 = vld [vmem:[#allocation2 + $0x3c] sm:$0xf0]  ;;  %v340_v11 = vld [vmem:[#allocation2 + $0x18] sm:$0xf]  ;;  %v337_v33 = vor.u32 %v424_v30, %v336_v29 }
  0x16   :  { %288 = vmatpush.bf16.msra.mxu1 %v381_v55  ;;  %v451_v55 = vld [vmem:[%s570_s4] ss:$0 sm:$0xff] }
  0x17   :  { %302 = vmatpush.bf16.msra.mxu2 %v385_v56 }
  0x19   :  { %275 = vmatpush.bf16.msra.mxu0 %v365_v60 }
  0x1a   :  { %289 = vmatpush.bf16.msra.mxu1 %v369_v0 }
  0x1d   :  { %276 = vmatpush.bf16.msra.mxu0 %v353_v5 }
  0x7c   :  { %v45_v10 = vpop.xlane.xlu0 %44 }
  0x7d   :  { %v54_v15 = vmul.f32 %v528_v12, %v45_v10  ;;  %v361_v10 = vor.u32 %v430_v8, %v360_v7 }
  0x7f   :  { %v536_v18 = vsub.f32 %v39_v1, %v54_v15  ;;  %v373_v1 = vor.u32 %v433_v63, %v372_v62 }
  0x81   :  { %v58_v19 = vmul.f32 %v536_v18, %v536_v18  ;;  %303 = vmatpush.bf16.msra.mxu2 %v373_v1 }
  0x83   :  { %v61_v20 = vsel %vm42_vm0, %v58_v19, 0.0  ;;  %v348_v19 = vld [vmem:[#allocation2 + $0x20] sm:$0xf] }
  0x84   :  { %v41_v13 = vpop.xlane.xlu0 %40 }
  0x85   :  { %v53_v14 = vmul.f32 %v528_v12, %v41_v13  ;;  %304 = vmatpush.bf16.msra.mxu2 %v361_v10  ;;  %v426_v13 = vld [vmem:[#allocation2 + $0x20] sm:$0xf0] }
  0x86   :  { %v341_v15 = vor.u32 %v426_v13, %v340_v11 }
  0x87   :  { %v532_v16 = vsub.f32 %v38_v4, %v53_v14  ;;  %v428_v4 = vld [vmem:[#allocation2 + $0x34] sm:$0xf]  ;;  %v425_v14 = vld [vmem:[#allocation2 + $0x1c] sm:$0xf] }
  0x88   :  { %v357_v9 = vor.u32 %v428_v4, %v354_v6  ;;  %277 = vmatpush.bf16.msra.mxu0 %v341_v15 }
  0x89   :  { %v57_v17 = vmul.f32 %v532_v16, %v532_v16 }
  0x8a   :  { %290 = vmatpush.bf16.msra.mxu1 %v357_v9 }
  0x8b   :  { %59 = vadd.xlane.f32.xlu1 %v57_v17  ;;  %v342_v17 = vld [vmem:[#allocation2 + $0x24] sm:$0xf0] }
  0x8c   :  { %v345_v21 = vor.u32 %v425_v14, %v342_v17  ;;  %278 = vmatpush.bf16.msra.mxu0 %v329_v27 }
  0x8e   :  { %291 = vmatpush.bf16.msra.mxu1 %v345_v21 }
  0x92   :  { %292 = vmatpush.bf16.msra.mxu1 %v333_v32 }
  0x93   :  { %62 = vadd.xlane.f32.xlu1 %v61_v20  ;;  %v427_v20 = vld [vmem:[#allocation2 + $0x28] sm:$0xf0] }
  0x94   :  { %v349_v22 = vor.u32 %v427_v20, %v348_v19 }
  0x96   :  { %305 = vmatpush.bf16.msra.mxu2 %v349_v22 }
  0x9a   :  { %306 = vmatpush.bf16.msra.mxu2 %v337_v33 }
  0xfe   :  { %v60_v26 = vpop.xlane.xlu1 %59 }
  0xff   :  { %v64_v31 = vmul.f32 %v60_v26, %v528_v12 }
 0x101   :  { %v66_v34 = vadd.f32 1e-05, %v64_v31 }
 0x103   :  { %454 = vrsqrt.f32 %v66_v34  ;;  %vm74_vm3 = vweird.f32 %v66_v34 }
 0x106   :  { %v63_v35 = vpop.xlane.xlu1 %62 }
 0x107   :  { %v65_v36 = vmul.f32 %v63_v35, %v528_v12 }
 0x109   :  { %v455_v37 = vpop.eup %454  ;;  %v67_v38 = vadd.f32 1e-05, %v65_v36 }
 0x10a   :  { %v69_v39 = vmul.f32 %v455_v37, %v66_v34  ;;  %vm75_vm2 = vweird.f32 %v455_v37 }
 0x10b   :  { %456 = vrsqrt.f32 %v67_v38  ;;  %vm76_vm4 = vmor %vm74_vm3, %vm75_vm2  ;;  %vm84_vm6 = vweird.f32 %v67_v38 }
 0x10c   :  { %v70_v40 = vmul.f32 %v455_v37, %v69_v39 }
 0x10e   :  { %v71_v41 = vmul.f32 0.5, %v70_v40 }
 0x110   :  { %v72_v42 = vsub.f32 1.5, %v71_v41 }
 0x111   :  { %v457_v43 = vpop.eup %456 }
 0x112   :  { %v73_v44 = vmul.f32 %v455_v37, %v72_v42  ;;  %v79_v45 = vmul.f32 %v457_v43, %v67_v38  ;;  %vm85_vm5 = vweird.f32 %v457_v43 }
 0x113   :  { %vm86_vm7 = vmor %vm84_vm6, %vm85_vm5 }
 0x114   :  { %v80_v46 = vmul.f32 %v457_v43, %v79_v45  ;;  %v77_v47 = vsel %vm76_vm4, %v455_v37, %v73_v44 }
 0x115   :  { %v88_v12 = vmul.f32 %v77_v47, %v532_v16  ;;  %v135_v16 = vld [vmem:[%s568_s2] sm:$0x7] }
 0x116   :  { %v81_v48 = vmul.f32 0.5, %v80_v46  ;;  %v137_v60 = vperm.slane %v135_v16, 0  ;;  %v138_v61 = vperm.slane %v135_v16, 1  ;;  %v139_v2 = vperm.slane %v135_v16, 2 }
 0x117   :  { %v94_v54 = vmul.f32 %v450_v50, %v88_v12 }
 0x118   :  { %v82_v49 = vsub.f32 1.5, %v81_v48 }
 0x119   :  { %v100_v57 = vadd.f32 %v451_v55, %v94_v54 }
 0x11a   :  { %v83_v51 = vmul.f32 %v457_v43, %v82_v49 }
 0x11c   :  { %v87_v52 = vsel %vm86_vm7, %v457_v43, %v83_v51 }
 0x11d   :  { %v89_v53 = vmul.f32 %v87_v52, %v536_v18 }
 0x11f   :  { %v95_v56 = vmul.f32 %v450_v50, %v89_v53 }
 0x121   :  { %v101_v58 = vadd.f32 %v451_v55, %v95_v56 }
 0x123   :  { %v102_v59 = vpack.c.bf16 %v101_v58, %v100_v57 }
 0x125   :  { %279 = vmatmul.bf16.vlgmr.msra.gmra.mxu0 %v102_v59  ;;  %293 = vmatmul.bf16.vlgmr.msra.gmra.mxu1 %v102_v59 }
 0x126   :  { %307 = vmatmul.bf16.vlgmr.msra.gmra.mxu2 %v102_v59 }
 0x1a2   :  { %v280_v62 = vpop.f32.mrf.mxu0  ;;  %v294_v18 = vpop.f32.mrf.mxu1 }
 0x1a3   :  { %v281_v63 = vadd.f32 %v280_v62, %v137_v60  ;;  %v295_v0 = vadd.f32 %v294_v18, %v138_v61 }
 0x1a5   :  { %v313_v1 = vpack.c.bf16 %v295_v0, %v281_v63 }
 0x1a7   :  { %317 = vst [vmem:[%s571_s5] sm:$0xff] %v313_v1 }
 0x1a9   :  { %v308_v3 = vpop.f32.mrf.mxu2 }
 0x1aa   :  { %v309_v4 = vadd.f32 %v308_v3, %v139_v2  ;;  %v282_v5 = vpop.f32.mrf.mxu0  ;;  %v296_v6 = vpop.f32.mrf.mxu1 }
 0x1ab   :  { %v283_v7 = vadd.f32 %v282_v5, %v137_v60  ;;  %v297_v8 = vadd.f32 %v296_v6, %v138_v61 }
 0x1ac   :  { %v314_v9 = vpack.c.bf16 %v309_v4, %v309_v4 }
 0x1ad   :  { %v315_v10 = vpack.c.bf16 %v297_v8, %v283_v7 }
 0x1ae   :  { %318 = vst [vmem:[%s571_s5 + $0x8] sm:$0xf] %v314_v9 }
 0x1af   :  { %319 = vst [vmem:[%s571_s5 + $0xc] sm:$0x11] %v315_v10 }
 0x1b1   :  { %v310_v11 = vpop.f32.mrf.mxu2 }
 0x1b2   :  { %v311_v13 = vadd.f32 %v310_v11, %v139_v2 }
 0x1b4   :  { %v316_v14 = vpack.c.bf16 %v311_v13, %v311_v13 }
 0x1b6   :  { %320 = vst [vmem:[%s571_s5 + $0x14] sm:$0x1] %v316_v14 }
 0x1b7   :  { %325 = vsyncpa [#allocation3], 1 }

// kernel: clip_vit_forward.19
= control target key start
LH: loop header
LB: loop body
LE: loop exit
PB: predicated region body
PF: predicated region fallthrough
CT: control target
= control target key end

     0   :  { %s700_s9 = smov 0   ;;  %s702_s10 = smov 0   ;;  %s812_s0 = inlined_call_operand.vmem [shape: bf16[2,5,384], index: 0, kind: input, shape index: {}, may-alias: {0,1}]   ;;  %s813_s1 = inlined_call_operand.vmem [shape: bf16[2,5,384], index: 1, kind: input, shape index: {}, may-alias: {0,1}]   ;;  %s814_s2 = inlined_call_operand.vmem [shape: bf16[2,5,128], index: 2, kind: output, shape index: {}]  }
   0x1   :  { %s704_s11 = smov 0  }
   0x2 LB: > { %s24_s12 = sadd.s32 1, %s675_s10  ;;  %p598_p0 = scmp.ge.s32.totalorder %s679_s11, 1  ;;  %s679_s11 = sphi %s704_s11, %s12_s11   ;;  %s675_s10 = sphi %s702_s10, %s816_s10   ;;  %s671_s9 = sphi %s700_s9, %s815_s9  }
   0x3   : > { %p26_p1 = scmp.ge.s32.totalorder %s24_s12, 2  ;;  %p142_p2 = scmp.lt.s32.totalorder %s679_s11, 3 }
   0x5   : > { %s818_s12 = smov (%p26_p1, %s24_s12), 0  ;;  %p143_p3 = pnand %p598_p0, %p142_p2 }
   0x6   : > { %p175_p4 = scmp.lt.s32.totalorder (!%p143_p3), %s671_s9, 1  ;;  %s681_s20 = smov (!%p143_p3), 64  }
   0x7   : > { %146 = sbr.rel (%p143_p3) target bundleno = 1088 (0x440), region = 28  ;;  %s682_s21 = smov (!%p143_p3), 32  }
   0x8   : > { %s683_s22 = smov (!%p143_p3), 96  }
   0xc   : > { %s820_s9 = smov (!%p175_p4, %s671_s9), 1  ;;  %vm200_vm0 = vcmask 261120   ;;  %vm221_vm1 = vcmask 36864   ;;  %vm238_vm2 = vcmask 1041408   ;;  %vm239_vm3 = vcmask 1042432  }
   0xd   : > { %s612_s13 = smul.u32 12, %s820_s9  ;;  %v684_v40 = vmov 65535   ;;  %vm234_vm4 = vcmask 39936   ;;  %s601_s23 = sshll.u32 %s820_s9, 2  ;;  %vm259_vm5 = vcmask 256000   ;;  %vm339_vm8 = vcmask 518400  }
   0xe   : > { %v240_v41 = vsel %vm238_vm2, 4294967295, %v684_v40  ;;  %s769_s26 = scalar_lea.vmem %s814_s2, %s601_s23  ;;  %vm260_vm6 = vsmask.f32 2304  ;;  %vm418_vm10 = vcmask 780800   ;;  %vm497_vm12 = vcmask 1043200  }
   0xf   : > { %s724_s16 = scalar_lea.vmem %s813_s1, %s612_s13  ;;  %s732_s19 = scalar_lea.vmem %s812_s0, %s612_s13  ;;  %v753_v42 = vsel %vm239_vm3, %v240_v41, 0  ;;  %vm261_vm7 = vmand %vm259_vm5, %vm260_vm6  ;;  %v262_v58 = vld [vmem:[%s769_s26] sm:$0x7] }
  0x10   : > { %v198_v0 = vld [vmem:[%s724_s16 + $0x4] sm:$0x7]  ;;  %v344_v4 = vld [vmem:[%s732_s19] sm:$0x7]  ;;  %v199_v39 = vld [vmem:[%s724_s16 + $0x8] sm:$0x7] }
  0x11   : > { %v345_v1 = vld [vmem:[%s724_s16 + $0x4] sm:$0x7]  ;;  %v205_v2 = vsel %vm200_vm0, %v198_v0, 0  ;;  %v348_v6 = vunpack.c.l.b16 %v344_v4  ;;  %v197_v7 = vld [vmem:[%s732_s19] sm:$0x7]  ;;  %v243_v43 = vand.u32 %v753_v42, %v199_v39  ;;  %vm340_vm9 = vmand %vm339_vm8, %vm260_vm6 }
  0x12   : > { %v353_v3 = vunpack.c.l.b16 %v345_v1  ;;  %214 = vmatpush.bf16.xpose.msra.mxu0 %v205_v2  ;;  %v424_v9 = vld [vmem:[%s724_s16 + $0x4] sm:$0x7]  ;;  %v423_v12 = vld [vmem:[%s732_s19] sm:$0x7]  ;;  %vm419_vm11 = vmand %vm418_vm10, %vm260_vm6 }
  0x13   : > { %v349_v8 = vpack.c.b16 %v348_v6, %v348_v6  ;;  %v432_v10 = vunpack.c.l.b16 %v424_v9  ;;  %v427_v13 = vunpack.c.l.b16 %v423_v12  ;;  %v266_v24 = vld [vmem:[%s724_s16 + $0x4] sm:$0x7]  ;;  %v265_v34 = vld [vmem:[%s732_s19] sm:$0x7]  ;;  %252 = vmatpush.bf16.msra.mxu1 %v243_v43  ;;  %v267_v12 = vld [vmem:[%s724_s16 + $0x8] sm:$0x7] }
  0x14   : > { %v354_v5 = vpack.c.b16 %v353_v3, %v353_v3  ;;  %v274_v25 = vunpack.c.l.b16 %v266_v24  ;;  %v269_v35 = vunpack.c.l.b16 %v265_v34  ;;  %vm498_vm13 = vmand %vm497_vm12, %vm260_vm6 }
  0x15   : > { %v433_v11 = vpack.c.b16 %v432_v10, %v432_v10  ;;  %v428_v14 = vpack.c.b16 %v427_v13, %v427_v13  ;;  %v311_v13 = vunpack.c.l.b16 %v267_v12 }
  0x16   : > { %355 = vrot.lane.b32.xlu2 %v354_v5, %s681_s20  ;;  %v275_v26 = vpack.c.b16 %v274_v25, %v274_v25  ;;  %v270_v36 = vpack.c.b16 %v269_v35, %v269_v35 }
  0x19   : > { %602 = vmatmul.msk.bf16.vlgmr.msra.gmra.mxu0 %vm200_vm0, %v197_v7 }
  0x1e   : > { %350 = vrot.lane.b32.xlu2 %v349_v8, %s681_s20 }
  0x26   : > { %434 = vrot.lane.b32.xlu2 %v433_v11, %s682_s21 }
  0x2e   : > { %429 = vrot.lane.b32.xlu2 %v428_v14, %s682_s21  ;;  %v312_v14 = vpack.c.b16 %v311_v13, %v311_v13 }
  0x70   : > { %v356_v15 = vpop.permute.xlu2 %355 }
  0x71   : > { %v361_v45 = vsel %vm200_vm0, %v356_v15, 0 }
  0x72   : > { %370 = vmatpush.bf16.xpose.msrb.mxu1 %v361_v45 }
  0x78   : > { %v351_v16 = vpop.permute.xlu2 %350 }
  0x80   : > { %v435_v17 = vpop.permute.xlu2 %434 }
  0x81   : > { %v440_v18 = vsel %vm200_vm0, %v435_v17, 0 }
  0x82   : > { %449 = vmatpush.bf16.xpose.msrb.mxu0 %v440_v18 }
  0x88   : > { %v430_v20 = vpop.permute.xlu2 %429 }
  0x89   : > { %608 = vmatmul.msk.bf16.vlgmr.msrb.gmra.mxu0 %vm200_vm0, %v430_v20  ;;  %v425_v20 = vld [vmem:[%s724_s16 + $0x8] sm:$0x7] }
  0x96   : > { %v216_v19 = vpop.f32.mrf.mxu0 }
  0x97   : > { %v220_v21 = vmul.f32 0.17677669, %v216_v19  ;;  %v346_v19 = vld [vmem:[%s724_s16 + $0x8] sm:$0x7] }
  0x99   : > { %v222_v22 = vsel %vm221_vm1, %v220_v21, -inf }
  0x9a   : > { %223 = vmax.xlane.f32.xlu0 %v222_v22  ;;  %v469_v22 = vunpack.c.l.b16 %v425_v20 }
  0x9c   : > { %v470_v24 = vpack.c.b16 %v469_v22, %v469_v22 }
  0x9e   : > { %v218_v23 = vpop.f32.mrf.mxu0 }
  0xae   : > { %276 = vrot.lane.b32.xlu0 %v275_v26, %s683_s22 }
 0x106   : > { %v451_v30 = vpop.f32.mrf.mxu0 }
 0x107   : > { %v455_v37 = vmul.f32 0.17677669, %v451_v30 }
 0x109   : > { %v456_v38 = vsel %vm221_vm1, %v455_v37, -inf }
 0x10d   : > { %v224_v27 = vpop.xlane.xlu0 %223 }
 0x10e   : > { %v225_v28 = vsub.f32 %v220_v21, %v224_v27  ;;  %v453_v33 = vpop.f32.mrf.mxu0  ;;  %v390_v21 = vunpack.c.l.b16 %v346_v19 }
 0x110   : > { %v226_v29 = vmul.f32 1.442695, %v225_v28  ;;  %v391_v23 = vpack.c.b16 %v390_v21, %v390_v21 }
 0x112   : > { %641 = vpow2.f32 %v226_v29 }
 0x118   : > { %v642_v31 = vpop.eup %641 }
 0x119   : > { %v228_v32 = vsel %vm221_vm1, %v642_v31, 0.0 }
 0x11a   : > { %229 = vadd.xlane.f32.xlu1 %v228_v32 }
 0x120   : > { %v277_v44 = vpop.permute.xlu0 %276 }
 0x121   : > { %v282_v46 = vsel %vm200_vm0, %v277_v44, 0 }
 0x122   : > { %291 = vmatpush.bf16.xpose.msra.mxu2 %v282_v46 }
 0x133   : > { %271 = vrot.lane.b32.xlu1 %v270_v36, %s683_s22 }
 0x15d   : > { %457 = vmax.xlane.f32.xlu1 %v456_v38 }
 0x18d   : > { %v230_v47 = vpop.xlane.xlu1 %229 }
 0x18e   : > { %643 = vrcp.f32 %v230_v47 }
 0x194   : > { %v644_v48 = vpop.eup %643 }
 0x195   : > { %v232_v49 = vmul.f32 %v644_v48, %v642_v31 }
 0x197   : > { %v233_v50 = vpack.c.bf16 %v232_v49, %v232_v49 }
 0x199   : > { %603 = vmatmul.msk.bf16.vlgmr.msra.gmra.mxu1 %vm234_vm4, %v233_v50 }
 0x1a5   : > { %v272_v51 = vpop.permute.xlu1 %271 }
 0x1a6   : > { %604 = vmatmul.msk.bf16.vlgmr.msra.gmra.mxu2 %vm200_vm0, %v272_v51 }
 0x1a9   : > { %606 = vmatmul.msk.bf16.vlgmr.msrb.gmra.mxu1 %vm200_vm0, %v351_v16 }
 0x1d0   : > { %v458_v52 = vpop.xlane.xlu1 %457 }
 0x1d1   : > { %v459_v53 = vsub.f32 %v455_v37, %v458_v52 }
 0x1d3   : > { %v460_v54 = vmul.f32 1.442695, %v459_v53 }
 0x1d5   : > { %645 = vpow2.f32 %v460_v54 }
 0x1db   : > { %v761_v55 = vpop.eup %645 }
 0x1dc   : > { %v462_v56 = vsel %vm221_vm1, %v761_v55, 0.0 }
 0x1dd   : > { %463 = vadd.xlane.f32.xlu1 %v462_v56 }
 0x216   : > { %v254_v57 = vpop.f32.mrf.mxu1 }
 0x217   : > { %v258_v59 = vpack.c.bf16 %v254_v57, %v254_v57 }
 0x219   : > { %v263_v60 = vsel %vm261_vm7, %v258_v59, %v262_v58 }
 0x21a   : > { %264 = vst [vmem:[%s769_s26] sm:$0x7] %v263_v60 }
 0x21e   : > { %v256_v61 = vpop.f32.mrf.mxu1 }
 0x221   : > { %v341_v52 = vld [vmem:[%s769_s26] sm:$0x7] }
 0x226   : > { %v372_v62 = vpop.f32.mrf.mxu1 }
 0x227   : > { %v376_v63 = vmul.f32 0.17677669, %v372_v62 }
 0x229   : > { %v293_v0 = vpop.f32.mrf.mxu2  ;;  %v377_v1 = vsel %vm221_vm1, %v376_v63, -inf }
 0x22a   : > { %v297_v2 = vmul.f32 0.17677669, %v293_v0  ;;  %378 = vmax.xlane.f32.xlu2 %v377_v1 }
 0x22c   : > { %v298_v3 = vsel %vm221_vm1, %v297_v2, -inf }
 0x22d   : > { %299 = vmax.xlane.f32.xlu0 %v298_v3 }
 0x22e   : > { %v374_v4 = vpop.f32.mrf.mxu1 }
 0x231   : > { %v295_v5 = vpop.f32.mrf.mxu2 }
 0x242   : > { %313 = vrot.lane.b32.xlu2 %v312_v14, %s683_s22 }
 0x250   : > { %v464_v28 = vpop.xlane.xlu1 %463 }
 0x29d   : > { %v379_v6 = vpop.xlane.xlu2 %378 }
 0x29e   : > { %v380_v7 = vsub.f32 %v376_v63, %v379_v6 }
 0x2a0   : > { %v381_v8 = vmul.f32 1.442695, %v380_v7  ;;  %v300_v9 = vpop.xlane.xlu0 %299 }
 0x2a1   : > { %v301_v10 = vsub.f32 %v297_v2, %v300_v9 }
 0x2a2   : > { %647 = vpow2.f32 %v381_v8 }
 0x2a3   : > { %v302_v11 = vmul.f32 1.442695, %v301_v10 }
 0x2a5   : > { %649 = vpow2.f32 %v302_v11  ;;  %v314_v25 = vpop.permute.xlu2 %313 }
 0x2a6   : > { %v319_v26 = vand.u32 %v314_v25, %v753_v42 }
 0x2a8   : > { %v648_v15 = vpop.eup %647  ;;  %328 = vmatpush.bf16.msra.mxu3 %v319_v26 }
 0x2a9   : > { %v383_v16 = vsel %vm221_vm1, %v648_v15, 0.0 }
 0x2aa   : > { %384 = vadd.xlane.f32.xlu1 %v383_v16 }
 0x2ab   : > { %v650_v17 = vpop.eup %649 }
 0x2ac   : > { %v304_v18 = vsel %vm221_vm1, %v650_v17, 0.0 }
 0x2ad   : > { %305 = vadd.xlane.f32.xlu0 %v304_v18 }
 0x2c1   : > { %392 = vrot.lane.b32.xlu0 %v391_v23, %s681_s20 }
 0x2c3   : > { %471 = vrot.lane.b32.xlu1 %v470_v24, %s682_s21 }
 0x31d   : > { %v385_v31 = vpop.xlane.xlu1 %384 }
 0x320   : > { %v306_v27 = vpop.xlane.xlu0 %305 }
 0x321   : > { %651 = vrcp.f32 %v306_v27 }
 0x322   : > { %653 = vrcp.f32 %v464_v28 }
 0x323   : > { %655 = vrcp.f32 %v385_v31 }
 0x327   : > { %v652_v29 = vpop.eup %651 }
 0x328   : > { %v308_v30 = vmul.f32 %v652_v29, %v650_v17  ;;  %v654_v33 = vpop.eup %653 }
 0x329   : > { %v656_v34 = vpop.eup %655  ;;  %v466_v37 = vmul.f32 %v654_v33, %v761_v55 }
 0x32a   : > { %v309_v32 = vpack.c.bf16 %v308_v30, %v308_v30  ;;  %v387_v39 = vmul.f32 %v656_v34, %v648_v15 }
 0x32b   : > { %v467_v41 = vpack.c.bf16 %v466_v37, %v466_v37 }
 0x32c   : > { %605 = vmatmul.msk.bf16.vlgmr.msra.gmra.mxu3 %vm234_vm4, %v309_v32  ;;  %v388_v43 = vpack.c.bf16 %v387_v39, %v387_v39 }
 0x333   : > { %v393_v35 = vpop.permute.xlu0 %392 }
 0x334   : > { %v398_v36 = vand.u32 %v393_v35, %v753_v42 }
 0x335   : > { %v472_v38 = vpop.permute.xlu1 %471 }
 0x336   : > { %v477_v40 = vand.u32 %v472_v38, %v753_v42  ;;  %407 = vmatpush.bf16.msrb.mxu3 %v398_v36 }
 0x338   : > { %486 = vmatpush.bf16.msrb.mxu2 %v477_v40 }
 0x33b   : > { %609 = vmatmul.msk.bf16.vlgmr.msrb.gmra.mxu2 %vm234_vm4, %v467_v41 }
 0x33c   : > { %607 = vmatmul.msk.bf16.vlgmr.msrb.gmra.mxu3 %vm234_vm4, %v388_v43 }
 0x3af   : > { %v330_v44 = vpop.f32.mrf.mxu3 }
 0x3b0   : > { %v334_v45 = vpack.c.bf16 %v330_v44, %v330_v44 }
 0x3b2   : > { %336 = vrot.lane.b32.xlu2 %v334_v45, %s682_s21 }
 0x3b7   : > { %v332_v46 = vpop.f32.mrf.mxu3 }
 0x3be   : > { %v488_v47 = vpop.f32.mrf.mxu2 }
 0x3bf   : > { %v492_v48 = vpack.c.bf16 %v488_v47, %v488_v47  ;;  %v409_v49 = vpop.f32.mrf.mxu3 }
 0x3c0   : > { %v413_v42 = vpack.c.bf16 %v409_v49, %v409_v49 }
 0x3c1   : > { %494 = vrot.lane.b32.xlu2 %v492_v48, %s683_s22 }
 0x3c2   : > { %415 = vrot.lane.b32.xlu0 %v413_v42, %s681_s20 }
 0x3c6   : > { %v490_v50 = vpop.f32.mrf.mxu2 }
 0x3c7   : > { %v411_v51 = vpop.f32.mrf.mxu3 }
 0x40c   : > { %v337_v53 = vpop.permute.xlu2 %336 }
 0x40d   : > { %v342_v54 = vsel %vm340_vm9, %v337_v53, %v341_v52 }
 0x40e   : > { %343 = vst [vmem:[%s769_s26] sm:$0x7] %v342_v54 }
 0x415   : > { %v420_v55 = vld [vmem:[%s769_s26] sm:$0x7] }
 0x41b   : > { %v495_v58 = vpop.permute.xlu2 %494 }
 0x434   : > { %v416_v56 = vpop.permute.xlu0 %415 }
 0x435   : > { %v421_v57 = vsel %vm419_vm11, %v416_v56, %v420_v55 }
 0x436   : > { %422 = vst [vmem:[%s769_s26] sm:$0x7] %v421_v57 }
 0x43d   : > { %v499_v59 = vld [vmem:[%s769_s26] sm:$0x7] }
 0x43e   : > { %v500_v60 = vsel %vm498_vm13, %v495_v58, %v499_v59 }
 0x43f   : > { %501 = vst [vmem:[%s769_s26] sm:$0x7] %v500_v60 }
 0x440 PF: > { %s12_s11 = sadd.s32 1, %s679_s11   ;;  %s815_s9 = smov %s675_s10 }
 0x441   : > { %p9_p5 = scmp.ge.s32.totalorder %s12_s11, 4   ;;  %s816_s10 = smov %s818_s12 }
 0x443   :  { %11 = sbr.rel (!%p9_p5) target bundleno = 2 (0x2), region = 61 }

// kernel: clip_vit_forward.20
= control target key start
LH: loop header
LB: loop body
LE: loop exit
PB: predicated region body
PF: predicated region fallthrough
CT: control target
= control target key end

     0   :  { %s237_s1 = inlined_call_operand.vmem [shape: bf16[128,128], index: 1, kind: input, shape index: {}]   ;;  %s238_s2 = inlined_call_operand.vmem [shape: f32[1,128], index: 2, kind: input, shape index: {}]   ;;  %s239_s0 = inlined_call_operand.vmem [shape: bf16[10,128], index: 0, kind: input, shape index: {}]   ;;  %s240_s3 = inlined_call_operand.vmem [shape: bf16[10,128], index: 3, kind: input, shape index: {}]   ;;  %s241_s4 = inlined_call_operand.vmem [shape: bf16[10,128], index: 4, kind: output, shape index: {}]  }
   0x1   :  { %v165_v0 = vld [vmem:[%s237_s1 + $0x38] sm:$0xff]  ;;  %v164_v1 = vld [vmem:[%s237_s1 + $0x30] sm:$0xff]  ;;  %v163_v2 = vld [vmem:[%s237_s1 + $0x28] sm:$0xff] }
   0x2   :  { %93 = vmatpush.bf16.msra.mxu0 %v165_v0  ;;  %v162_v3 = vld [vmem:[%s237_s1 + $0x20] sm:$0xff]  ;;  %v161_v4 = vld [vmem:[%s237_s1 + $0x18] sm:$0xff]  ;;  %v160_v5 = vld [vmem:[%s237_s1 + $0x10] sm:$0xff] }
   0x3   :  { %v159_v6 = vld [vmem:[%s237_s1 + $0x8] sm:$0xff]  ;;  %v158_v7 = vld [vmem:[%s237_s1] sm:$0xff] }
   0x4   :  { %v123_v8 = vld [vmem:[%s239_s0] sm:$0xf]  ;;  %v157_v9 = vld [vmem:[%s239_s0] sm:$0x10] }
   0x5   :  { %v124_v10 = vor.u32 %v157_v9, %v123_v8  ;;  %v107_v11 = vld [vmem:[%s240_s3] sm:$0xf]  ;;  %v108_v17 = vld [vmem:[%s240_s3 + $0x4] sm:$0x1] }
   0x6   :  { %94 = vmatpush.bf16.msra.mxu0 %v164_v1  ;;  %v166_v12 = vld [vmem:[%s238_s2] ss:$0 sm:$0xff]  ;;  %v109_v13 = vunpack.c.l.bf16 %v107_v11  ;;  %v110_v19 = vunpack.c.l.bf16 %v108_v17 }
   0xa   :  { %95 = vmatpush.bf16.msra.mxu0 %v163_v2 }
   0xe   :  { %96 = vmatpush.bf16.msra.mxu0 %v162_v3 }
  0x12   :  { %97 = vmatpush.bf16.msra.mxu0 %v161_v4 }
  0x16   :  { %98 = vmatpush.bf16.msra.mxu0 %v160_v5 }
  0x1a   :  { %99 = vmatpush.bf16.msra.mxu0 %v159_v6 }
  0x1e   :  { %100 = vmatpush.bf16.msra.mxu0 %v158_v7 }
  0x21   :  { %101 = vmatmul.bf16.vlgmr.msra.gmra.mxu0 %v124_v10 }
  0x9e   :  { %v102_v14 = vpop.f32.mrf.mxu0 }
  0x9f   :  { %v103_v15 = vadd.f32 %v166_v12, %v102_v14 }
  0xa1   :  { %v111_v16 = vadd.f32 %v109_v13, %v103_v15 }
  0xa3   :  { %v113_v18 = vpack.c.bf16 %v111_v16, %v111_v16 }
  0xa5   :  { %115 = vst [vmem:[%s241_s4] sm:$0xf] %v113_v18 }
  0xa6   :  { %v104_v20 = vpop.f32.mrf.mxu0 }
  0xa7   :  { %v105_v21 = vadd.f32 %v166_v12, %v104_v20 }
  0xa9   :  { %v112_v22 = vadd.f32 %v110_v19, %v105_v21 }
  0xab   :  { %v114_v23 = vpack.c.bf16 %v112_v22, %v112_v22 }
  0xad   :  { %116 = vst [vmem:[%s241_s4 + $0x4] sm:$0x1] %v114_v23 }

// kernel: clip_vit_forward.21
= control target key start
LH: loop header
LB: loop body
LE: loop exit
PB: predicated region body
PF: predicated region fallthrough
CT: control target
= control target key end

     0   :  { %vm26_vm0 = vcmask 1041408   ;;  %v734_v5 = vmov 128.0   ;;  %s1105_s0 = inlined_call_operand.vmem [shape: bf16[10,128], index: 0, kind: input, shape index: {}]   ;;  %s1106_s3 = inlined_call_operand.vmem [shape: f32[1,128], index: 3, kind: input, shape index: {}]   ;;  %s1107_s4 = inlined_call_operand.vmem [shape: f32[1,128], index: 4, kind: input, shape index: {}]   ;;  %s1108_s1 = inlined_call_operand.vmem [shape: bf16[128,512], index: 1, kind: input, shape index: {}]   ;;  %s1109_s2 = inlined_call_operand.vmem [shape: f32[1,512], index: 2, kind: input, shape index: {}]   ;;  %s1110_s5 = inlined_call_operand.vmem [shape: bf16[10,512], index: 5, kind: output, shape index: {}]  }
   0x1   :  { %v21_v0 = vld [vmem:[%s1105_s0 + $0x4] sm:$0x1]  ;;  %v20_v3 = vld [vmem:[%s1105_s0] sm:$0xf]  ;;  %696 = vrcp.f32 %v734_v5  ;;  %v691_v22 = vld [vmem:[%s1108_s1 + $0xec] sm:$0xf0] }
   0x2   :  { %v23_v1 = vunpack.c.l.bf16 %v21_v0  ;;  %v22_v4 = vunpack.c.l.bf16 %v20_v3  ;;  %v639_v21 = vld [vmem:[%s1108_s1 + $0xe0] sm:$0xf]  ;;  %v689_v23 = vld [vmem:[%s1108_s1 + $0xe4] sm:$0xf]  ;;  %v641_v25 = vld [vmem:[%s1108_s1 + $0xf0] sm:$0xf0] }
   0x3   :  { %v640_v24 = vor.u32 %v691_v22, %v639_v21  ;;  %v647_v26 = vld [vmem:[%s1108_s1 + $0xe8] sm:$0xf]  ;;  %v692_v27 = vld [vmem:[%s1108_s1 + $0xf4] sm:$0xf0]  ;;  %v644_v28 = vor.u32 %v689_v23, %v641_v25  ;;  %v690_v30 = vld [vmem:[%s1108_s1 + $0xec] sm:$0xf] }
   0x4   :  { %v27_v2 = vsel %vm26_vm0, %v23_v1, 0.0  ;;  %v648_v29 = vor.u32 %v692_v27, %v647_v26  ;;  %v649_v31 = vld [vmem:[%s1108_s1 + $0xf8] sm:$0xf0]  ;;  %v623_v33 = vld [vmem:[%s1108_s1 + $0xc0] sm:$0xf] }
   0x5   :  { %28 = vadd.xlane.f32.xlu0 %v27_v2  ;;  %289 = vmatpush.bf16.msra.mxu0 %v640_v24  ;;  %v652_v32 = vor.u32 %v690_v30, %v649_v31  ;;  %v687_v34 = vld [vmem:[%s1108_s1 + $0xcc] sm:$0xf0]  ;;  %v685_v35 = vld [vmem:[%s1108_s1 + $0xc4] sm:$0xf]  ;;  %v625_v37 = vld [vmem:[%s1108_s1 + $0xd0] sm:$0xf0] }
   0x6   :  { %303 = vmatpush.bf16.msra.mxu1 %v644_v28  ;;  %317 = vmatpush.bf16.msra.mxu2 %v648_v29  ;;  %v624_v36 = vor.u32 %v687_v34, %v623_v33  ;;  %v631_v38 = vld [vmem:[%s1108_s1 + $0xc8] sm:$0xf]  ;;  %v688_v39 = vld [vmem:[%s1108_s1 + $0xd4] sm:$0xf0]  ;;  %v628_v40 = vor.u32 %v685_v35, %v625_v37  ;;  %v686_v42 = vld [vmem:[%s1108_s1 + $0xcc] sm:$0xf] }
   0x7   :  { %v697_v6 = vpop.eup %696  ;;  %331 = vmatpush.bf16.msra.mxu3 %v652_v32  ;;  %v632_v41 = vor.u32 %v688_v39, %v631_v38  ;;  %v633_v43 = vld [vmem:[%s1108_s1 + $0xd8] sm:$0xf0]  ;;  %v607_v45 = vld [vmem:[%s1108_s1 + $0xa0] sm:$0xf]  ;;  %v683_v46 = vld [vmem:[%s1108_s1 + $0xac] sm:$0xf0] }
   0x8   :  { %v31_v7 = vmul.f32 128.0, %v697_v6  ;;  %vm35_vm1 = vweird.f32 %v697_v6  ;;  %v636_v44 = vor.u32 %v686_v42, %v633_v43  ;;  %v681_v47 = vld [vmem:[%s1108_s1 + $0xa4] sm:$0xf]  ;;  %v608_v48 = vor.u32 %v683_v46, %v607_v45  ;;  %v609_v49 = vld [vmem:[%s1108_s1 + $0xb0] sm:$0xf0] }
   0x9   :  { %290 = vmatpush.bf16.msra.mxu0 %v624_v36  ;;  %v615_v50 = vld [vmem:[%s1108_s1 + $0xa8] sm:$0xf]  ;;  %v684_v51 = vld [vmem:[%s1108_s1 + $0xb4] sm:$0xf0]  ;;  %v612_v52 = vor.u32 %v681_v47, %v609_v49  ;;  %v682_v54 = vld [vmem:[%s1108_s1 + $0xac] sm:$0xf] }
   0xa   :  { %v32_v8 = vsub.f32 1.0, %v31_v7  ;;  %304 = vmatpush.bf16.msra.mxu1 %v628_v40  ;;  %318 = vmatpush.bf16.msra.mxu2 %v632_v41  ;;  %v616_v53 = vor.u32 %v684_v51, %v615_v50  ;;  %v617_v55 = vld [vmem:[%s1108_s1 + $0xb8] sm:$0xf0]  ;;  %v591_v57 = vld [vmem:[%s1108_s1 + $0x80] sm:$0xf] }
   0xb   :  { %332 = vmatpush.bf16.msra.mxu3 %v636_v44  ;;  %v620_v56 = vor.u32 %v682_v54, %v617_v55  ;;  %v679_v58 = vld [vmem:[%s1108_s1 + $0x8c] sm:$0xf0]  ;;  %v677_v59 = vld [vmem:[%s1108_s1 + $0x84] sm:$0xf]  ;;  %v593_v61 = vld [vmem:[%s1108_s1 + $0x90] sm:$0xf0] }
   0xc   :  { %v33_v9 = vmul.f32 %v697_v6, %v32_v8  ;;  %v592_v60 = vor.u32 %v679_v58, %v591_v57  ;;  %v599_v62 = vld [vmem:[%s1108_s1 + $0x88] sm:$0xf]  ;;  %v680_v63 = vld [vmem:[%s1108_s1 + $0x94] sm:$0xf0]  ;;  %v596_v0 = vor.u32 %v677_v59, %v593_v61  ;;  %v678_v2 = vld [vmem:[%s1108_s1 + $0x8c] sm:$0xf] }
   0xd   :  { %24 = vadd.xlane.f32.xlu0 %v22_v4  ;;  %291 = vmatpush.bf16.msra.mxu0 %v608_v48  ;;  %v601_v3 = vld [vmem:[%s1108_s1 + $0x98] sm:$0xf0]  ;;  %v575_v5 = vld [vmem:[%s1108_s1 + $0x60] sm:$0xf]  ;;  %v673_v7 = vld [vmem:[%s1108_s1 + $0x64] sm:$0xf] }
   0xe   :  { %v34_v11 = vadd.f32 %v697_v6, %v33_v9  ;;  %305 = vmatpush.bf16.msra.mxu1 %v612_v52  ;;  %319 = vmatpush.bf16.msra.mxu2 %v616_v53  ;;  %v577_v9 = vld [vmem:[%s1108_s1 + $0x70] sm:$0xf0]  ;;  %v671_v21 = vld [vmem:[%s1108_s1 + $0x4c] sm:$0xf0]  ;;  %v669_v22 = vld [vmem:[%s1108_s1 + $0x44] sm:$0xf] }
   0xf   :  { %333 = vmatpush.bf16.msra.mxu3 %v620_v56  ;;  %v561_v24 = vld [vmem:[%s1108_s1 + $0x50] sm:$0xf0]  ;;  %v567_v25 = vld [vmem:[%s1108_s1 + $0x48] sm:$0xf]  ;;  %v672_v26 = vld [vmem:[%s1108_s1 + $0x54] sm:$0xf0] }
  0x10   :  { %v772_v12 = vsel %vm35_vm1, %v697_v6, %v34_v11  ;;  %v675_v6 = vld [vmem:[%s1108_s1 + $0x6c] sm:$0xf0]  ;;  %v676_v11 = vld [vmem:[%s1108_s1 + $0x74] sm:$0xf0]  ;;  %v564_v27 = vor.u32 %v669_v22, %v561_v24  ;;  %v568_v28 = vor.u32 %v672_v26, %v567_v25  ;;  %v670_v29 = vld [vmem:[%s1108_s1 + $0x4c] sm:$0xf] }
  0x11   :  { %292 = vmatpush.bf16.msra.mxu0 %v592_v60  ;;  %v576_v8 = vor.u32 %v675_v6, %v575_v5  ;;  %v569_v30 = vld [vmem:[%s1108_s1 + $0x58] sm:$0xf0]  ;;  %v543_v32 = vld [vmem:[%s1108_s1 + $0x20] sm:$0xf]  ;;  %v667_v33 = vld [vmem:[%s1108_s1 + $0x2c] sm:$0xf0] }
  0x12   :  { %306 = vmatpush.bf16.msra.mxu1 %v596_v0  ;;  %v572_v31 = vor.u32 %v670_v29, %v569_v30  ;;  %v665_v34 = vld [vmem:[%s1108_s1 + $0x24] sm:$0xf]  ;;  %v544_v35 = vor.u32 %v667_v33, %v543_v32  ;;  %v545_v36 = vld [vmem:[%s1108_s1 + $0x30] sm:$0xf0]  ;;  %v551_v37 = vld [vmem:[%s1108_s1 + $0x28] sm:$0xf] }
  0x13   :  { %v668_v38 = vld [vmem:[%s1108_s1 + $0x34] sm:$0xf0]  ;;  %v548_v39 = vor.u32 %v665_v34, %v545_v36  ;;  %v666_v41 = vld [vmem:[%s1108_s1 + $0x2c] sm:$0xf]  ;;  %v553_v42 = vld [vmem:[%s1108_s1 + $0x38] sm:$0xf0] }
  0x14   :  { %v552_v40 = vor.u32 %v668_v38, %v551_v37  ;;  %v527_v43 = vld [vmem:[%s1108_s1] sm:$0xf]  ;;  %v556_v45 = vor.u32 %v666_v41, %v553_v42  ;;  %v663_v46 = vld [vmem:[%s1108_s1 + $0xc] sm:$0xf0]  ;;  %v661_v47 = vld [vmem:[%s1108_s1 + $0x4] sm:$0xf] }
  0x15   :  { %293 = vmatpush.bf16.msra.mxu0 %v576_v8  ;;  %v529_v48 = vld [vmem:[%s1108_s1 + $0x10] sm:$0xf0]  ;;  %v528_v50 = vor.u32 %v663_v46, %v527_v43  ;;  %v535_v52 = vld [vmem:[%s1108_s1 + $0x8] sm:$0xf]  ;;  %v664_v53 = vld [vmem:[%s1108_s1 + $0x14] sm:$0xf0] }
  0x16   :  { %v532_v51 = vor.u32 %v661_v47, %v529_v48  ;;  %v662_v54 = vld [vmem:[%s1108_s1 + $0xc] sm:$0xf]  ;;  %v536_v55 = vor.u32 %v664_v53, %v535_v52  ;;  %v537_v56 = vld [vmem:[%s1108_s1 + $0x18] sm:$0xf0] }
  0x17   :  { %v540_v58 = vor.u32 %v662_v54, %v537_v56 }
  0x78   :  { %v29_v10 = vpop.xlane.xlu0 %28 }
  0x79   :  { %v38_v15 = vmul.f32 %v772_v12, %v29_v10  ;;  %v583_v10 = vld [vmem:[%s1108_s1 + $0x68] sm:$0xf] }
  0x7b   :  { %v780_v18 = vsub.f32 %v23_v1, %v38_v15  ;;  %v600_v1 = vor.u32 %v680_v63, %v599_v62  ;;  %v674_v15 = vld [vmem:[%s1108_s1 + $0x6c] sm:$0xf] }
  0x7d   :  { %v42_v19 = vmul.f32 %v780_v18, %v780_v18  ;;  %320 = vmatpush.bf16.msra.mxu2 %v600_v1 }
  0x7f   :  { %v45_v20 = vsel %vm26_vm0, %v42_v19, 0.0 }
  0x80   :  { %v25_v13 = vpop.xlane.xlu0 %24 }
  0x81   :  { %v37_v14 = vmul.f32 %v772_v12, %v25_v13  ;;  %v580_v13 = vor.u32 %v673_v7, %v577_v9 }
  0x83   :  { %v776_v16 = vsub.f32 %v22_v4, %v37_v14  ;;  %v604_v4 = vor.u32 %v678_v2, %v601_v3  ;;  %v584_v14 = vor.u32 %v676_v11, %v583_v10  ;;  %307 = vmatpush.bf16.msra.mxu1 %v580_v13  ;;  %v694_v10 = vld [vmem:[%s1106_s3] ss:$0 sm:$0xff] }
  0x85   :  { %v41_v17 = vmul.f32 %v776_v16, %v776_v16  ;;  %334 = vmatpush.bf16.msra.mxu3 %v604_v4  ;;  %321 = vmatpush.bf16.msra.mxu2 %v584_v14 }
  0x87   :  { %43 = vadd.xlane.f32.xlu1 %v41_v17  ;;  %v585_v17 = vld [vmem:[%s1108_s1 + $0x78] sm:$0xf0]  ;;  %308 = vmatpush.bf16.msra.mxu1 %v564_v27 }
  0x88   :  { %v588_v19 = vor.u32 %v674_v15, %v585_v17  ;;  %v695_v17 = vld [vmem:[%s1107_s4] ss:$0 sm:$0xff] }
  0x89   :  { %322 = vmatpush.bf16.msra.mxu2 %v568_v28 }
  0x8a   :  { %335 = vmatpush.bf16.msra.mxu3 %v588_v19 }
  0x8b   :  { %309 = vmatpush.bf16.msra.mxu1 %v548_v39 }
  0x8d   :  { %323 = vmatpush.bf16.msra.mxu2 %v552_v40 }
  0x8e   :  { %336 = vmatpush.bf16.msra.mxu3 %v572_v31 }
  0x8f   :  { %46 = vadd.xlane.f32.xlu1 %v45_v20  ;;  %v559_v20 = vld [vmem:[%s1108_s1 + $0x40] sm:$0xf]  ;;  %310 = vmatpush.bf16.msra.mxu1 %v532_v51 }
  0x90   :  { %v560_v23 = vor.u32 %v671_v21, %v559_v20 }
  0x91   :  { %324 = vmatpush.bf16.msra.mxu2 %v536_v55 }
  0x92   :  { %294 = vmatpush.bf16.msra.mxu0 %v560_v23  ;;  %337 = vmatpush.bf16.msra.mxu3 %v556_v45 }
  0x96   :  { %295 = vmatpush.bf16.msra.mxu0 %v544_v35  ;;  %338 = vmatpush.bf16.msra.mxu3 %v540_v58 }
  0x9a   :  { %296 = vmatpush.bf16.msra.mxu0 %v528_v50 }
  0xfa   :  { %v44_v44 = vpop.xlane.xlu1 %43 }
  0xfb   :  { %v48_v49 = vmul.f32 %v44_v44, %v772_v12 }
  0xfd   :  { %v50_v57 = vadd.f32 1e-05, %v48_v49 }
  0xff   :  { %698 = vrsqrt.f32 %v50_v57  ;;  %vm58_vm3 = vweird.f32 %v50_v57 }
 0x102   :  { %v47_v59 = vpop.xlane.xlu1 %46 }
 0x103   :  { %v49_v60 = vmul.f32 %v47_v59, %v772_v12 }
 0x105   :  { %v699_v61 = vpop.eup %698  ;;  %v51_v62 = vadd.f32 1e-05, %v49_v60 }
 0x106   :  { %v53_v63 = vmul.f32 %v699_v61, %v50_v57  ;;  %vm59_vm2 = vweird.f32 %v699_v61 }
 0x107   :  { %700 = vrsqrt.f32 %v51_v62  ;;  %vm60_vm4 = vmor %vm58_vm3, %vm59_vm2  ;;  %vm68_vm6 = vweird.f32 %v51_v62 }
 0x108   :  { %v54_v0 = vmul.f32 %v699_v61, %v53_v63 }
 0x10a   :  { %v55_v1 = vmul.f32 0.5, %v54_v0 }
 0x10c   :  { %v56_v2 = vsub.f32 1.5, %v55_v1 }
 0x10d   :  { %v701_v3 = vpop.eup %700 }
 0x10e   :  { %v57_v4 = vmul.f32 %v699_v61, %v56_v2  ;;  %v63_v5 = vmul.f32 %v701_v3, %v51_v62  ;;  %vm69_vm5 = vweird.f32 %v701_v3 }
 0x10f   :  { %vm70_vm7 = vmor %vm68_vm6, %vm69_vm5 }
 0x110   :  { %v64_v6 = vmul.f32 %v701_v3, %v63_v5  ;;  %v61_v7 = vsel %vm60_vm4, %v699_v61, %v57_v4 }
 0x111   :  { %v72_v12 = vmul.f32 %v61_v7, %v776_v16  ;;  %v119_v16 = vld [vmem:[%s1109_s2] sm:$0xf] }
 0x112   :  { %v65_v8 = vmul.f32 0.5, %v64_v6  ;;  %v121_v23 = vperm.slane %v119_v16, 0  ;;  %v122_v24 = vperm.slane %v119_v16, 1  ;;  %v123_v30 = vperm.slane %v119_v16, 2 }
 0x113   :  { %v78_v15 = vmul.f32 %v694_v10, %v72_v12  ;;  %v124_v31 = vperm.slane %v119_v16, 3 }
 0x114   :  { %v66_v9 = vsub.f32 1.5, %v65_v8 }
 0x115   :  { %v84_v20 = vadd.f32 %v695_v17, %v78_v15 }
 0x116   :  { %v67_v11 = vmul.f32 %v701_v3, %v66_v9 }
 0x118   :  { %v71_v13 = vsel %vm70_vm7, %v701_v3, %v67_v11 }
 0x119   :  { %v73_v14 = vmul.f32 %v71_v13, %v780_v18 }
 0x11b   :  { %v79_v19 = vmul.f32 %v694_v10, %v73_v14 }
 0x11d   :  { %v85_v21 = vadd.f32 %v695_v17, %v79_v19 }
 0x11f   :  { %v86_v22 = vpack.c.bf16 %v85_v21, %v84_v20 }
 0x121   :  { %297 = vmatmul.bf16.vlgmr.msra.gmra.mxu0 %v86_v22  ;;  %311 = vmatmul.bf16.vlgmr.msra.gmra.mxu1 %v86_v22 }
 0x122   :  { %325 = vmatmul.bf16.vlgmr.msra.gmra.mxu2 %v86_v22  ;;  %339 = vmatmul.bf16.vlgmr.msra.gmra.mxu3 %v86_v22 }
 0x19e   :  { %v298_v18 = vpop.f32.mrf.mxu0  ;;  %v312_v25 = vpop.f32.mrf.mxu1 }
 0x19f   :  { %v990_v26 = vadd.f32 %v298_v18, %v121_v23  ;;  %v992_v27 = vadd.f32 %v312_v25, %v122_v24 }
 0x1a1   :  { %v653_v28 = vmul.f32 -1.702, %v990_v26  ;;  %v654_v29 = vmul.f32 -1.702, %v992_v27 }
 0x1a3   :  { %v361_v32 = vmul.f32 1.442695, %v653_v28  ;;  %v363_v33 = vmul.f32 1.442695, %v654_v29 }
 0x1a5   :  { %702 = vpow2.f32 %v361_v32  ;;  %v326_v34 = vpop.f32.mrf.mxu2  ;;  %v340_v35 = vpop.f32.mrf.mxu3 }
 0x1a6   :  { %704 = vpow2.f32 %v363_v33  ;;  %v996_v36 = vadd.f32 %v326_v34, %v123_v30  ;;  %v998_v37 = vadd.f32 %v340_v35, %v124_v31  ;;  %v300_v38 = vpop.f32.mrf.mxu0  ;;  %v314_v39 = vpop.f32.mrf.mxu1 }
 0x1a7   :  { %v1000_v40 = vadd.f32 %v300_v38, %v121_v23  ;;  %v1002_v41 = vadd.f32 %v314_v39, %v122_v24 }
 0x1a8   :  { %v655_v42 = vmul.f32 -1.702, %v996_v36  ;;  %v656_v43 = vmul.f32 -1.702, %v998_v37 }
 0x1a9   :  { %v657_v44 = vmul.f32 -1.702, %v1000_v40  ;;  %v658_v45 = vmul.f32 -1.702, %v1002_v41 }
 0x1aa   :  { %v365_v46 = vmul.f32 1.442695, %v655_v42  ;;  %v367_v47 = vmul.f32 1.442695, %v656_v43 }
 0x1ab   :  { %v703_v48 = vpop.eup %702  ;;  %v369_v51 = vmul.f32 1.442695, %v657_v44  ;;  %v371_v53 = vmul.f32 1.442695, %v658_v45 }
 0x1ac   :  { %v705_v49 = vpop.eup %704  ;;  %v377_v50 = vadd.f32 1.0, %v703_v48  ;;  %706 = vpow2.f32 %v365_v46 }
 0x1ad   :  { %v378_v52 = vadd.f32 1.0, %v705_v49  ;;  %708 = vpow2.f32 %v367_v47  ;;  %v328_v54 = vpop.f32.mrf.mxu2  ;;  %v342_v56 = vpop.f32.mrf.mxu3 }
 0x1ae   :  { %710 = vrcp.f32 %v377_v50  ;;  %v1008_v55 = vadd.f32 %v328_v54, %v123_v30  ;;  %v394_v60 = vand.u32 2147483647, %v377_v50  ;;  %v396_v63 = vand.u32 2147483648, %v377_v50 }
 0x1af   :  { %712 = vrcp.f32 %v378_v52  ;;  %v409_v0 = vand.u32 2147483647, %v378_v52  ;;  %v1015_v2 = vadd.f32 %v342_v56, %v124_v31  ;;  %vm390_vm8 = vweird.f32 %v377_v50 }
 0x1b0   :  { %714 = vpow2.f32 %v369_v51  ;;  %v659_v58 = vmul.f32 -1.702, %v1008_v55  ;;  %v411_v7 = vand.u32 2147483648, %v378_v52  ;;  %vm1018_vm9 = vcmp.eq.f32.partialorder %v394_v60, 8.507059e+37 }
 0x1b1   :  { %716 = vpow2.f32 %v371_v53  ;;  %vm405_vm10 = vweird.f32 %v378_v52  ;;  %v397_v11 = vor.u32 1.1754944e-38, %v396_v63  ;;  %vm1023_vm11 = vcmp.eq.f32.partialorder %v409_v0, 8.507059e+37 }
 0x1b2   :  { %v707_v57 = vpop.eup %706  ;;  %v373_v8 = vmul.f32 1.442695, %v659_v58  ;;  %v660_v15 = vmul.f32 -1.702, %v1015_v2  ;;  %v412_v22 = vor.u32 1.1754944e-38, %v411_v7 }
 0x1b3   :  { %v709_v59 = vpop.eup %708  ;;  %v1011_v61 = vadd.f32 1.0, %v707_v57 }
 0x1b4   :  { %v711_v62 = vpop.eup %710  ;;  %v1013_v1 = vadd.f32 1.0, %v709_v59  ;;  %v375_v32 = vmul.f32 1.442695, %v660_v15 }
 0x1b5   :  { %v713_v3 = vpop.eup %712  ;;  %v386_v4 = vmul.f32 %v711_v62, %v377_v50  ;;  %718 = vrcp.f32 %v1011_v61  ;;  %vm391_vm12 = vweird.f32 %v711_v62  ;;  %vm420_vm14 = vweird.f32 %v1011_v61 }
 0x1b6   :  { %v715_v5 = vpop.eup %714  ;;  %v401_v6 = vmul.f32 %v713_v3, %v378_v52  ;;  %720 = vrcp.f32 %v1013_v1  ;;  %vm406_vm13 = vweird.f32 %v713_v3  ;;  %v424_v24 = vand.u32 2147483647, %v1011_v61  ;;  %vm392_vm15 = vmor %vm390_vm8, %vm391_vm12 }
 0x1b7   :  { %v717_v9 = vpop.eup %716  ;;  %v387_v12 = vsub.f32 1.0, %v386_v4  ;;  %v1028_v19 = vadd.f32 1.0, %v715_v5  ;;  %722 = vpow2.f32 %v373_v8  ;;  %v426_v28 = vand.u32 2147483648, %v1011_v61  ;;  %vm407_vm1 = vmor %vm405_vm10, %vm406_vm13 }
 0x1b8   :  { %v402_v13 = vsub.f32 1.0, %v401_v6  ;;  %v1030_v20 = vadd.f32 1.0, %v717_v9  ;;  %vm435_vm0 = vweird.f32 %v1013_v1  ;;  %v439_v31 = vand.u32 2147483647, %v1013_v1 }
 0x1b9   :  { %v388_v17 = vmul.f32 %v711_v62, %v387_v12  ;;  %724 = vrcp.f32 %v1028_v19  ;;  %vm1049_vm2 = vcmp.eq.f32.partialorder %v424_v24, 8.507059e+37  ;;  %v441_v44 = vand.u32 2147483648, %v1013_v1 }
 0x1ba   :  { %v403_v21 = vmul.f32 %v713_v3, %v402_v13  ;;  %726 = vrcp.f32 %v1030_v20  ;;  %v427_v50 = vor.u32 1.1754944e-38, %v426_v28  ;;  %vm1060_vm6 = vcmp.eq.f32.partialorder %v439_v31, 8.507059e+37 }
 0x1bb   :  { %v719_v16 = vpop.eup %718  ;;  %v389_v23 = vadd.f32 %v711_v62, %v388_v17  ;;  %728 = vpow2.f32 %v375_v32  ;;  %v442_v57 = vor.u32 1.1754944e-38, %v441_v44  ;;  %vm450_vm7 = vweird.f32 %v1028_v19 }
 0x1bc   :  { %v404_v18 = vadd.f32 %v713_v3, %v403_v21  ;;  %v416_v25 = vmul.f32 %v719_v16, %v1011_v61  ;;  %v721_v29 = vpop.eup %720  ;;  %vm421_vm3 = vweird.f32 %v719_v16  ;;  %v454_v63 = vand.u32 2147483647, %v1028_v19 }
 0x1bd   :  { %v393_v30 = vsel %vm392_vm15, %v711_v62, %v389_v23  ;;  %v431_v38 = vmul.f32 %v721_v29, %v1013_v1  ;;  %v723_v45 = vpop.eup %722  ;;  %vm436_vm4 = vweird.f32 %v721_v29  ;;  %vm422_vm5 = vmor %vm420_vm14, %vm421_vm3  ;;  %v456_v0 = vand.u32 2147483648, %v1028_v19 }
 0x1be   :  { %v398_v33 = vsel %vm1018_vm9, %v397_v11, %v393_v30  ;;  %v408_v34 = vsel %vm407_vm1, %v713_v3, %v404_v18  ;;  %v417_v35 = vsub.f32 1.0, %v416_v25  ;;  %v1055_v51 = vadd.f32 1.0, %v723_v45  ;;  %vm437_vm8 = vmor %vm435_vm0, %vm436_vm4 }
 0x1bf   :  { %v505_v39 = vmul.f32 %v398_v33, %v990_v26  ;;  %v413_v42 = vsel %vm1023_vm11, %v412_v22, %v408_v34  ;;  %v432_v48 = vsub.f32 1.0, %v431_v38  ;;  %v725_v49 = vpop.eup %724  ;;  %v469_v9 = vand.u32 2147483647, %v1030_v20 }
 0x1c0   :  { %v506_v46 = vmul.f32 %v413_v42, %v992_v27  ;;  %v418_v47 = vmul.f32 %v719_v16, %v417_v35  ;;  %v446_v54 = vmul.f32 %v725_v49, %v1028_v19  ;;  %v727_v56 = vpop.eup %726  ;;  %730 = vrcp.f32 %v1055_v51 }
 0x1c1   :  { %v433_v53 = vmul.f32 %v721_v29, %v432_v48  ;;  %v461_v62 = vmul.f32 %v727_v56, %v1030_v20  ;;  %vm451_vm9 = vweird.f32 %v725_v49  ;;  %v729_v7 = vpop.eup %728  ;;  %vm466_vm10 = vweird.f32 %v727_v56 }
 0x1c2   :  { %v513_v26 = vpack.c.bf16 %v506_v46, %v505_v39  ;;  %v419_v52 = vadd.f32 %v719_v16, %v418_v47  ;;  %v447_v60 = vsub.f32 1.0, %v446_v54  ;;  %v471_v1 = vand.u32 2147483648, %v1030_v20  ;;  %vm452_vm11 = vmor %vm450_vm7, %vm451_vm9 }
 0x1c3   :  { %v434_v59 = vadd.f32 %v721_v29, %v433_v53  ;;  %v462_v6 = vsub.f32 1.0, %v461_v62  ;;  %v384_v13 = vadd.f32 1.0, %v729_v7  ;;  %vm455_vm12 = vcmp.eq.f32.partialorder %v454_v63, 8.507059e+37 }
 0x1c4   :  { %517 = vst [vmem:[%s1110_s5] sm:$0xff] %v513_v26  ;;  %v423_v58 = vsel %vm422_vm5, %v719_v16, %v419_v52  ;;  %v448_v5 = vmul.f32 %v725_v49, %v447_v60  ;;  %vm465_vm13 = vweird.f32 %v1030_v20  ;;  %vm470_vm15 = vcmp.eq.f32.partialorder %v469_v9, 8.507059e+37 }
 0x1c5   :  { %v428_v61 = vsel %vm1049_vm2, %v427_v50, %v423_v58  ;;  %v438_v4 = vsel %vm437_vm8, %v721_v29, %v434_v59  ;;  %v463_v11 = vmul.f32 %v727_v56, %v462_v6  ;;  %vm467_vm14 = vmor %vm465_vm13, %vm466_vm10  ;;  %732 = vrcp.f32 %v384_v13 }
 0x1c6   :  { %v507_v3 = vmul.f32 %v428_v61, %v996_v36  ;;  %v443_v8 = vsel %vm1060_vm6, %v442_v57, %v438_v4  ;;  %v449_v10 = vadd.f32 %v725_v49, %v448_v5  ;;  %v731_v14 = vpop.eup %730  ;;  %v457_v36 = vor.u32 1.1754944e-38, %v456_v0 }
 0x1c7   :  { %v508_v12 = vmul.f32 %v443_v8, %v998_v37  ;;  %v464_v21 = vadd.f32 %v727_v56, %v463_v11  ;;  %v476_v22 = vmul.f32 %v731_v14, %v1055_v51  ;;  %v472_v37 = vor.u32 1.1754944e-38, %v471_v1 }
 0x1c8   :  { %v453_v17 = vsel %vm452_vm11, %v725_v49, %v449_v10  ;;  %vm481_vm0 = vweird.f32 %v731_v14  ;;  %v486_v31 = vand.u32 2147483648, %v1055_v51  ;;  %vm480_vm1 = vweird.f32 %v1055_v51 }
 0x1c9   :  { %v514_v15 = vpack.c.bf16 %v508_v12, %v507_v3  ;;  %v458_v16 = vsel %vm455_vm12, %v457_v36, %v453_v17  ;;  %v468_v23 = vsel %vm467_vm14, %v727_v56, %v464_v21  ;;  %v477_v24 = vsub.f32 1.0, %v476_v22  ;;  %vm482_vm2 = vmor %vm480_vm1, %vm481_vm0 }
 0x1ca   :  { %v509_v19 = vmul.f32 %v458_v16, %v1000_v40  ;;  %v473_v20 = vsel %vm470_vm15, %v472_v37, %v468_v23  ;;  %v484_v40 = vand.u32 2147483647, %v1055_v51  ;;  %v501_v35 = vand.u32 2147483648, %v384_v13 }
 0x1cb   :  { %518 = vst [vmem:[%s1110_s5 + $0x8] sm:$0xff] %v514_v15  ;;  %v510_v18 = vmul.f32 %v473_v20, %v1002_v41  ;;  %v478_v25 = vmul.f32 %v731_v14, %v477_v24  ;;  %v733_v30 = vpop.eup %732  ;;  %v487_v41 = vor.u32 1.1754944e-38, %v486_v31  ;;  %v499_v39 = vand.u32 2147483647, %v384_v13 }
 0x1cc   :  { %v491_v32 = vmul.f32 %v733_v30, %v384_v13  ;;  %vm485_vm3 = vcmp.eq.f32.partialorder %v484_v40, 8.507059e+37  ;;  %vm496_vm4 = vweird.f32 %v733_v30  ;;  %vm495_vm5 = vweird.f32 %v384_v13 }
 0x1cd   :  { %v515_v28 = vpack.c.bf16 %v510_v18, %v509_v19  ;;  %v479_v29 = vadd.f32 %v731_v14, %v478_v25  ;;  %vm497_vm6 = vmor %vm495_vm5, %vm496_vm4  ;;  %v502_v44 = vor.u32 1.1754944e-38, %v501_v35  ;;  %vm500_vm7 = vcmp.eq.f32.partialorder %v499_v39, 8.507059e+37 }
 0x1ce   :  { %v492_v34 = vsub.f32 1.0, %v491_v32 }
 0x1cf   :  { %519 = vst [vmem:[%s1110_s5 + $0x10] sm:$0x11] %v515_v28  ;;  %v483_v33 = vsel %vm482_vm2, %v731_v14, %v479_v29 }
 0x1d0   :  { %v493_v38 = vmul.f32 %v733_v30, %v492_v34  ;;  %v488_v42 = vsel %vm485_vm3, %v487_v41, %v483_v33 }
 0x1d1   :  { %v511_v45 = vmul.f32 %v488_v42, %v1008_v55 }
 0x1d2   :  { %v494_v43 = vadd.f32 %v733_v30, %v493_v38 }
 0x1d4   :  { %v498_v46 = vsel %vm497_vm6, %v733_v30, %v494_v43 }
 0x1d5   :  { %v503_v47 = vsel %vm500_vm7, %v502_v44, %v498_v46 }
 0x1d6   :  { %v512_v48 = vmul.f32 %v503_v47, %v1015_v2 }
 0x1d8   :  { %v516_v49 = vpack.c.bf16 %v512_v48, %v511_v45 }
 0x1da   :  { %520 = vst [vmem:[%s1110_s5 + $0x18] sm:$0x11] %v516_v49 }

// kernel: clip_vit_forward.22
= control target key start
LH: loop header
LB: loop body
LE: loop exit
PB: predicated region body
PF: predicated region fallthrough
CT: control target
= control target key end

     0   :  { %s712_s1 = inlined_call_operand.vmem [shape: bf16[512,128], index: 1, kind: input, shape index: {}]   ;;  %s713_s2 = inlined_call_operand.vmem [shape: f32[1,128], index: 2, kind: input, shape index: {}]   ;;  %s714_s0 = inlined_call_operand.vmem [shape: bf16[10,512], index: 0, kind: input, shape index: {}]   ;;  %s715_s3 = inlined_call_operand.vmem [shape: bf16[10,128], index: 3, kind: input, shape index: {}]   ;;  %s716_s4 = inlined_call_operand.vmem [shape: bf16[10,128], index: 4, kind: output, shape index: {}]  }
   0x1   :  { %v526_v0 = vld [vmem:[%s712_s1 + $0x38] sm:$0xff]  ;;  %v525_v4 = vld [vmem:[%s712_s1 + $0x30] sm:$0xff]  ;;  %v524_v8 = vld [vmem:[%s712_s1 + $0x28] sm:$0xff] }
   0x2   :  { %v534_v1 = vld [vmem:[%s712_s1 + $0x78] sm:$0xff]  ;;  %301 = vmatpush.bf16.msra.mxu0 %v526_v0  ;;  %v533_v5 = vld [vmem:[%s712_s1 + $0x70] sm:$0xff]  ;;  %v532_v9 = vld [vmem:[%s712_s1 + $0x68] sm:$0xff] }
   0x3   :  { %v542_v2 = vld [vmem:[%s712_s1 + $0xb8] sm:$0xff]  ;;  %315 = vmatpush.bf16.msra.mxu1 %v534_v1  ;;  %v541_v6 = vld [vmem:[%s712_s1 + $0xb0] sm:$0xff]  ;;  %v540_v10 = vld [vmem:[%s712_s1 + $0xa8] sm:$0xff] }
   0x4   :  { %v550_v3 = vld [vmem:[%s712_s1 + $0xf8] sm:$0xff]  ;;  %329 = vmatpush.bf16.msra.mxu2 %v542_v2  ;;  %v549_v7 = vld [vmem:[%s712_s1 + $0xf0] sm:$0xff]  ;;  %v548_v11 = vld [vmem:[%s712_s1 + $0xe8] sm:$0xff] }
   0x5   :  { %343 = vmatpush.bf16.msra.mxu3 %v550_v3  ;;  %v523_v12 = vld [vmem:[%s712_s1 + $0x20] sm:$0xff]  ;;  %v522_v16 = vld [vmem:[%s712_s1 + $0x18] sm:$0xff]  ;;  %v521_v20 = vld [vmem:[%s712_s1 + $0x10] sm:$0xff] }
   0x6   :  { %302 = vmatpush.bf16.msra.mxu0 %v525_v4  ;;  %v531_v13 = vld [vmem:[%s712_s1 + $0x60] sm:$0xff]  ;;  %v530_v17 = vld [vmem:[%s712_s1 + $0x58] sm:$0xff]  ;;  %v529_v21 = vld [vmem:[%s712_s1 + $0x50] sm:$0xff] }
   0x7   :  { %316 = vmatpush.bf16.msra.mxu1 %v533_v5  ;;  %v539_v14 = vld [vmem:[%s712_s1 + $0xa0] sm:$0xff]  ;;  %v538_v18 = vld [vmem:[%s712_s1 + $0x98] sm:$0xff]  ;;  %v537_v22 = vld [vmem:[%s712_s1 + $0x90] sm:$0xff] }
   0x8   :  { %330 = vmatpush.bf16.msra.mxu2 %v541_v6  ;;  %v547_v15 = vld [vmem:[%s712_s1 + $0xe0] sm:$0xff]  ;;  %v546_v19 = vld [vmem:[%s712_s1 + $0xd8] sm:$0xff]  ;;  %v545_v23 = vld [vmem:[%s712_s1 + $0xd0] sm:$0xff] }
   0x9   :  { %344 = vmatpush.bf16.msra.mxu3 %v549_v7  ;;  %v520_v24 = vld [vmem:[%s712_s1 + $0x8] sm:$0xff]  ;;  %v519_v28 = vld [vmem:[%s712_s1] sm:$0xff]  ;;  %v517_v33 = vld [vmem:[%s714_s0 + $0xc] sm:$0x10] }
   0xa   :  { %303 = vmatpush.bf16.msra.mxu0 %v524_v8  ;;  %v528_v25 = vld [vmem:[%s712_s1 + $0x48] sm:$0xff]  ;;  %v527_v29 = vld [vmem:[%s712_s1 + $0x40] sm:$0xff]  ;;  %v375_v35 = vld [vmem:[%s714_s0 + $0x10] sm:$0x10] }
   0xb   :  { %317 = vmatpush.bf16.msra.mxu1 %v532_v9  ;;  %v536_v26 = vld [vmem:[%s712_s1 + $0x88] sm:$0xff]  ;;  %v535_v30 = vld [vmem:[%s712_s1 + $0x80] sm:$0xff]  ;;  %v518_v37 = vld [vmem:[%s714_s0 + $0x14] sm:$0x10] }
   0xc   :  { %331 = vmatpush.bf16.msra.mxu2 %v540_v10  ;;  %v544_v27 = vld [vmem:[%s712_s1 + $0xc8] sm:$0xff]  ;;  %v543_v31 = vld [vmem:[%s712_s1 + $0xc0] sm:$0xff]  ;;  %v383_v39 = vld [vmem:[%s714_s0 + $0x18] sm:$0x10] }
   0xd   :  { %345 = vmatpush.bf16.msra.mxu3 %v548_v11  ;;  %v373_v32 = vld [vmem:[%s714_s0] sm:$0xf]  ;;  %v515_v34 = vld [vmem:[%s714_s0 + $0x4] sm:$0xf]  ;;  %v381_v36 = vld [vmem:[%s714_s0 + $0x8] sm:$0xf] }
   0xe   :  { %304 = vmatpush.bf16.msra.mxu0 %v523_v12  ;;  %v516_v38 = vld [vmem:[%s714_s0 + $0xc] sm:$0xf]  ;;  %v374_v40 = vor.u32 %v517_v33, %v373_v32  ;;  %v378_v41 = vor.u32 %v515_v34, %v375_v35  ;;  %v382_v42 = vor.u32 %v518_v37, %v381_v36  ;;  %v551_v44 = vld [vmem:[%s713_s2] ss:$0 sm:$0xff]  ;;  %v358_v59 = vld [vmem:[%s715_s3 + $0x4] sm:$0x1] }
   0xf   :  { %318 = vmatpush.bf16.msra.mxu1 %v531_v13  ;;  %v386_v43 = vor.u32 %v516_v38, %v383_v39  ;;  %v357_v49 = vld [vmem:[%s715_s3] sm:$0xf]  ;;  %v360_v0 = vunpack.c.l.bf16 %v358_v59 }
  0x10   :  { %332 = vmatpush.bf16.msra.mxu2 %v539_v14  ;;  %v359_v53 = vunpack.c.l.bf16 %v357_v49 }
  0x11   :  { %346 = vmatpush.bf16.msra.mxu3 %v547_v15 }
  0x12   :  { %305 = vmatpush.bf16.msra.mxu0 %v522_v16 }
  0x13   :  { %319 = vmatpush.bf16.msra.mxu1 %v530_v17 }
  0x14   :  { %333 = vmatpush.bf16.msra.mxu2 %v538_v18 }
  0x15   :  { %347 = vmatpush.bf16.msra.mxu3 %v546_v19 }
  0x16   :  { %306 = vmatpush.bf16.msra.mxu0 %v521_v20 }
  0x17   :  { %320 = vmatpush.bf16.msra.mxu1 %v529_v21 }
  0x18   :  { %334 = vmatpush.bf16.msra.mxu2 %v537_v22 }
  0x19   :  { %348 = vmatpush.bf16.msra.mxu3 %v545_v23 }
  0x1a   :  { %307 = vmatpush.bf16.msra.mxu0 %v520_v24 }
  0x1b   :  { %321 = vmatpush.bf16.msra.mxu1 %v528_v25 }
  0x1c   :  { %335 = vmatpush.bf16.msra.mxu2 %v536_v26 }
  0x1d   :  { %349 = vmatpush.bf16.msra.mxu3 %v544_v27 }
  0x1e   :  { %308 = vmatpush.bf16.msra.mxu0 %v519_v28 }
  0x1f   :  { %322 = vmatpush.bf16.msra.mxu1 %v527_v29 }
  0x20   :  { %336 = vmatpush.bf16.msra.mxu2 %v535_v30 }
  0x21   :  { %350 = vmatpush.bf16.msra.mxu3 %v543_v31  ;;  %309 = vmatmul.bf16.vlgmr.msra.gmra.mxu0 %v374_v40 }
  0x22   :  { %323 = vmatmul.bf16.vlgmr.msra.gmra.mxu1 %v378_v41 }
  0x23   :  { %337 = vmatmul.bf16.vlgmr.msra.gmra.mxu2 %v382_v42 }
  0x24   :  { %351 = vmatmul.bf16.vlgmr.msra.gmra.mxu3 %v386_v43 }
  0x9e   :  { %v310_v45 = vpop.f32.mrf.mxu0 }
  0x9f   :  { %v311_v46 = vadd.f32 %v551_v44, %v310_v45  ;;  %v324_v47 = vpop.f32.mrf.mxu1 }
  0xa1   :  { %v325_v48 = vadd.f32 %v324_v47, %v311_v46 }
  0xa6   :  { %v338_v50 = vpop.f32.mrf.mxu2  ;;  %v312_v54 = vpop.f32.mrf.mxu0 }
  0xa7   :  { %v352_v51 = vpop.f32.mrf.mxu3  ;;  %v339_v52 = vadd.f32 %v338_v50, %v325_v48  ;;  %v313_v56 = vadd.f32 %v551_v44, %v312_v54  ;;  %v326_v58 = vpop.f32.mrf.mxu1 }
  0xa9   :  { %v353_v55 = vadd.f32 %v352_v51, %v339_v52  ;;  %v327_v61 = vadd.f32 %v326_v58, %v313_v56 }
  0xab   :  { %v361_v57 = vadd.f32 %v359_v53, %v353_v55 }
  0xad   :  { %v363_v60 = vpack.c.bf16 %v361_v57, %v361_v57 }
  0xae   :  { %v340_v62 = vpop.f32.mrf.mxu2 }
  0xaf   :  { %365 = vst [vmem:[%s716_s4] sm:$0xf] %v363_v60  ;;  %v341_v63 = vadd.f32 %v340_v62, %v327_v61  ;;  %v354_v1 = vpop.f32.mrf.mxu3 }
  0xb1   :  { %v355_v2 = vadd.f32 %v354_v1, %v341_v63 }
  0xb3   :  { %v362_v3 = vadd.f32 %v360_v0, %v355_v2 }
  0xb5   :  { %v364_v4 = vpack.c.bf16 %v362_v3, %v362_v3 }
  0xb7   :  { %366 = vst [vmem:[%s716_s4 + $0x4] sm:$0x1] %v364_v4 }

// kernel: clip_vit_forward.25
= control target key start
LH: loop header
LB: loop body
LE: loop exit
PB: predicated region body
PF: predicated region fallthrough
CT: control target
= control target key end

     0   :  { %9 = vsyncpa [#allocation3], 0  ;;  %s213_s18 = smov [#allocation2]   ;;  %s214_s20 = smov 64   ;;  %s265_s0 = inlined_call_operand.vmem [shape: bf16[10,128], index: 0, kind: input, shape index: {}]   ;;  %s266_s1 = inlined_call_operand.hbm [shape: bf16[128,128], index: 1, kind: input, shape index: {}]   ;;  %s267_s2 = inlined_call_operand.vmem [shape: f32[1,128], index: 2, kind: input, shape index: {}]   ;;  %s268_s3 = inlined_call_operand.vmem [shape: bf16[10,128], index: 3, kind: input, shape index: {}]   ;;  %s269_s4 = inlined_call_operand.vmem [shape: bf16[10,128], index: 4, kind: output, shape index: {}]  }
   0x1   :  { %s16_s17 = sshll.u32 %s266_s1, 4  ;;  %s18_s19 = sshll.u32 %s213_s18, 4  ;;  %s17_s17 = int_to_ptr.hbm [resolvable:$true] %s16_s17  ;;  %s19_s19 = int_to_ptr.vmem [resolvable:$true] %s18_s19 }
   0x2   :  { %s215_s21 = smov 4  }
   0x3   :  { %24 = dma.hbm_to_vmem [thread:$0]  %s17_s17, 1024, %s19_s19, [#allocation3], %s214_s20, %s214_s20, %s215_s21  }
   0x4   :  { %211 = dma.done.wait [#allocation3], 1024  }
   0x5   :  { %212 = vsyncadd [#allocation3], 4294966272  ;;  %v182_v0 = vld [vmem:[#allocation2 + $0x38] sm:$0xff]  ;;  %v181_v1 = vld [vmem:[#allocation2 + $0x30] sm:$0xff] }
   0x6   :  { %109 = vmatpush.bf16.msra.mxu0 %v182_v0  ;;  %v180_v2 = vld [vmem:[#allocation2 + $0x28] sm:$0xff]  ;;  %v179_v3 = vld [vmem:[#allocation2 + $0x20] sm:$0xff]  ;;  %v178_v4 = vld [vmem:[#allocation2 + $0x18] sm:$0xff] }
   0x7   :  { %v177_v5 = vld [vmem:[#allocation2 + $0x10] sm:$0xff]  ;;  %v176_v6 = vld [vmem:[#allocation2 + $0x8] sm:$0xff]  ;;  %v175_v7 = vld [vmem:[#allocation2] sm:$0xff] }
   0x8   :  { %v140_v8 = vld [vmem:[%s265_s0] sm:$0xf]  ;;  %v174_v9 = vld [vmem:[%s265_s0] sm:$0x10] }
   0x9   :  { %v141_v10 = vor.u32 %v174_v9, %v140_v8  ;;  %v123_v11 = vld [vmem:[%s268_s3] sm:$0xf]  ;;  %v124_v17 = vld [vmem:[%s268_s3 + $0x4] sm:$0x1] }
   0xa   :  { %110 = vmatpush.bf16.msra.mxu0 %v181_v1  ;;  %v186_v12 = vld [vmem:[%s267_s2] ss:$0 sm:$0xff]  ;;  %v125_v13 = vunpack.c.l.bf16 %v123_v11  ;;  %v126_v19 = vunpack.c.l.bf16 %v124_v17 }
   0xe   :  { %111 = vmatpush.bf16.msra.mxu0 %v180_v2 }
  0x12   :  { %112 = vmatpush.bf16.msra.mxu0 %v179_v3 }
  0x16   :  { %113 = vmatpush.bf16.msra.mxu0 %v178_v4 }
  0x1a   :  { %114 = vmatpush.bf16.msra.mxu0 %v177_v5 }
  0x1e   :  { %115 = vmatpush.bf16.msra.mxu0 %v176_v6 }
  0x22   :  { %116 = vmatpush.bf16.msra.mxu0 %v175_v7 }
  0x25   :  { %117 = vmatmul.bf16.vlgmr.msra.gmra.mxu0 %v141_v10 }
  0xa2   :  { %v118_v14 = vpop.f32.mrf.mxu0 }
  0xa3   :  { %v119_v15 = vadd.f32 %v186_v12, %v118_v14 }
  0xa5   :  { %v127_v16 = vadd.f32 %v125_v13, %v119_v15 }
  0xa7   :  { %v129_v18 = vpack.c.bf16 %v127_v16, %v127_v16 }
  0xa9   :  { %131 = vst [vmem:[%s269_s4] sm:$0xf] %v129_v18 }
  0xaa   :  { %v120_v20 = vpop.f32.mrf.mxu0 }
  0xab   :  { %v121_v21 = vadd.f32 %v186_v12, %v120_v20 }
  0xad   :  { %v128_v22 = vadd.f32 %v126_v19, %v121_v21 }
  0xaf   :  { %v130_v23 = vpack.c.bf16 %v128_v22, %v128_v22 }
  0xb1   :  { %132 = vst [vmem:[%s269_s4 + $0x4] sm:$0x1] %v130_v23 }
  0xb2   :  { %137 = vsyncpa [#allocation3], 1 }

// kernel: clip_vit_forward.27
= control target key start
LH: loop header
LB: loop body
LE: loop exit
PB: predicated region body
PF: predicated region fallthrough
CT: control target
= control target key end

     0   :  { %9 = vsyncpa [#allocation3], 0  ;;  %s598_s18 = smov [#allocation2]   ;;  %s599_s20 = smov 64   ;;  %s668_s0 = inlined_call_operand.vmem [shape: bf16[10,512], index: 0, kind: input, shape index: {}]   ;;  %s669_s1 = inlined_call_operand.hbm [shape: bf16[512,128], index: 1, kind: input, shape index: {}]   ;;  %s670_s2 = inlined_call_operand.vmem [shape: f32[1,128], index: 2, kind: input, shape index: {}]   ;;  %s671_s3 = inlined_call_operand.vmem [shape: bf16[10,128], index: 3, kind: input, shape index: {}]   ;;  %s672_s4 = inlined_call_operand.vmem [shape: bf16[10,128], index: 4, kind: output, shape index: {}]  }
   0x1   :  { %s16_s17 = sshll.u32 %s669_s1, 4  ;;  %s18_s19 = sshll.u32 %s598_s18, 4  ;;  %s17_s17 = int_to_ptr.hbm [resolvable:$true] %s16_s17  ;;  %s19_s19 = int_to_ptr.vmem [resolvable:$true] %s18_s19 }
   0x2   :  { %s600_s21 = smov 4  }
   0x3   :  { %24 = dma.hbm_to_vmem [thread:$0]  %s17_s17, 4096, %s19_s19, [#allocation3], %s599_s20, %s599_s20, %s600_s21  }
   0x4   :  { %596 = dma.done.wait [#allocation3], 4096  }
   0x5   :  { %597 = vsyncadd [#allocation3], 4294963200  ;;  %v543_v0 = vld [vmem:[#allocation2 + $0x38] sm:$0xff]  ;;  %v542_v4 = vld [vmem:[#allocation2 + $0x30] sm:$0xff] }
   0x6   :  { %v551_v1 = vld [vmem:[#allocation2 + $0x78] sm:$0xff]  ;;  %317 = vmatpush.bf16.msra.mxu0 %v543_v0  ;;  %v550_v5 = vld [vmem:[#allocation2 + $0x70] sm:$0xff]  ;;  %v541_v8 = vld [vmem:[#allocation2 + $0x28] sm:$0xff] }
   0x7   :  { %v559_v2 = vld [vmem:[#allocation2 + $0xb8] sm:$0xff]  ;;  %331 = vmatpush.bf16.msra.mxu1 %v551_v1  ;;  %v558_v6 = vld [vmem:[#allocation2 + $0xb0] sm:$0xff]  ;;  %v549_v9 = vld [vmem:[#allocation2 + $0x68] sm:$0xff] }
   0x8   :  { %v567_v3 = vld [vmem:[#allocation2 + $0xf8] sm:$0xff]  ;;  %345 = vmatpush.bf16.msra.mxu2 %v559_v2  ;;  %v566_v7 = vld [vmem:[#allocation2 + $0xf0] sm:$0xff]  ;;  %v557_v10 = vld [vmem:[#allocation2 + $0xa8] sm:$0xff] }
   0x9   :  { %359 = vmatpush.bf16.msra.mxu3 %v567_v3  ;;  %v565_v11 = vld [vmem:[#allocation2 + $0xe8] sm:$0xff]  ;;  %v540_v12 = vld [vmem:[#allocation2 + $0x20] sm:$0xff]  ;;  %v539_v16 = vld [vmem:[#allocation2 + $0x18] sm:$0xff] }
   0xa   :  { %318 = vmatpush.bf16.msra.mxu0 %v542_v4  ;;  %v548_v13 = vld [vmem:[#allocation2 + $0x60] sm:$0xff]  ;;  %v547_v17 = vld [vmem:[#allocation2 + $0x58] sm:$0xff]  ;;  %v538_v20 = vld [vmem:[#allocation2 + $0x10] sm:$0xff] }
   0xb   :  { %332 = vmatpush.bf16.msra.mxu1 %v550_v5  ;;  %v556_v14 = vld [vmem:[#allocation2 + $0xa0] sm:$0xff]  ;;  %v555_v18 = vld [vmem:[#allocation2 + $0x98] sm:$0xff]  ;;  %v546_v21 = vld [vmem:[#allocation2 + $0x50] sm:$0xff] }
   0xc   :  { %346 = vmatpush.bf16.msra.mxu2 %v558_v6  ;;  %v564_v15 = vld [vmem:[#allocation2 + $0xe0] sm:$0xff]  ;;  %v563_v19 = vld [vmem:[#allocation2 + $0xd8] sm:$0xff]  ;;  %v554_v22 = vld [vmem:[#allocation2 + $0x90] sm:$0xff] }
   0xd   :  { %360 = vmatpush.bf16.msra.mxu3 %v566_v7  ;;  %v562_v23 = vld [vmem:[#allocation2 + $0xd0] sm:$0xff]  ;;  %v537_v24 = vld [vmem:[#allocation2 + $0x8] sm:$0xff]  ;;  %v536_v28 = vld [vmem:[#allocation2] sm:$0xff] }
   0xe   :  { %319 = vmatpush.bf16.msra.mxu0 %v541_v8  ;;  %v545_v25 = vld [vmem:[#allocation2 + $0x48] sm:$0xff]  ;;  %v544_v29 = vld [vmem:[#allocation2 + $0x40] sm:$0xff]  ;;  %v534_v33 = vld [vmem:[%s668_s0 + $0xc] sm:$0x10] }
   0xf   :  { %333 = vmatpush.bf16.msra.mxu1 %v549_v9  ;;  %v553_v26 = vld [vmem:[#allocation2 + $0x88] sm:$0xff]  ;;  %v552_v30 = vld [vmem:[#allocation2 + $0x80] sm:$0xff]  ;;  %v392_v35 = vld [vmem:[%s668_s0 + $0x10] sm:$0x10] }
  0x10   :  { %347 = vmatpush.bf16.msra.mxu2 %v557_v10  ;;  %v561_v27 = vld [vmem:[#allocation2 + $0xc8] sm:$0xff]  ;;  %v560_v31 = vld [vmem:[#allocation2 + $0xc0] sm:$0xff]  ;;  %v535_v37 = vld [vmem:[%s668_s0 + $0x14] sm:$0x10] }
  0x11   :  { %361 = vmatpush.bf16.msra.mxu3 %v565_v11  ;;  %v390_v32 = vld [vmem:[%s668_s0] sm:$0xf]  ;;  %v532_v34 = vld [vmem:[%s668_s0 + $0x4] sm:$0xf]  ;;  %v398_v36 = vld [vmem:[%s668_s0 + $0x8] sm:$0xf] }
  0x12   :  { %320 = vmatpush.bf16.msra.mxu0 %v540_v12  ;;  %v533_v38 = vld [vmem:[%s668_s0 + $0xc] sm:$0xf]  ;;  %v400_v39 = vld [vmem:[%s668_s0 + $0x18] sm:$0x10]  ;;  %v391_v40 = vor.u32 %v534_v33, %v390_v32  ;;  %v395_v41 = vor.u32 %v532_v34, %v392_v35  ;;  %v399_v42 = vor.u32 %v535_v37, %v398_v36  ;;  %v571_v44 = vld [vmem:[%s670_s2] ss:$0 sm:$0xff] }
  0x13   :  { %334 = vmatpush.bf16.msra.mxu1 %v548_v13  ;;  %v403_v43 = vor.u32 %v533_v38, %v400_v39  ;;  %v373_v49 = vld [vmem:[%s671_s3] sm:$0xf]  ;;  %v374_v59 = vld [vmem:[%s671_s3 + $0x4] sm:$0x1] }
  0x14   :  { %348 = vmatpush.bf16.msra.mxu2 %v556_v14  ;;  %v375_v53 = vunpack.c.l.bf16 %v373_v49  ;;  %v376_v0 = vunpack.c.l.bf16 %v374_v59 }
  0x15   :  { %362 = vmatpush.bf16.msra.mxu3 %v564_v15 }
  0x16   :  { %321 = vmatpush.bf16.msra.mxu0 %v539_v16 }
  0x17   :  { %335 = vmatpush.bf16.msra.mxu1 %v547_v17 }
  0x18   :  { %349 = vmatpush.bf16.msra.mxu2 %v555_v18 }
  0x19   :  { %363 = vmatpush.bf16.msra.mxu3 %v563_v19 }
  0x1a   :  { %322 = vmatpush.bf16.msra.mxu0 %v538_v20 }
  0x1b   :  { %336 = vmatpush.bf16.msra.mxu1 %v546_v21 }
  0x1c   :  { %350 = vmatpush.bf16.msra.mxu2 %v554_v22 }
  0x1d   :  { %364 = vmatpush.bf16.msra.mxu3 %v562_v23 }
  0x1e   :  { %323 = vmatpush.bf16.msra.mxu0 %v537_v24 }
  0x1f   :  { %337 = vmatpush.bf16.msra.mxu1 %v545_v25 }
  0x20   :  { %351 = vmatpush.bf16.msra.mxu2 %v553_v26 }
  0x21   :  { %365 = vmatpush.bf16.msra.mxu3 %v561_v27 }
  0x22   :  { %324 = vmatpush.bf16.msra.mxu0 %v536_v28 }
  0x23   :  { %338 = vmatpush.bf16.msra.mxu1 %v544_v29 }
  0x24   :  { %352 = vmatpush.bf16.msra.mxu2 %v552_v30 }
  0x25   :  { %366 = vmatpush.bf16.msra.mxu3 %v560_v31  ;;  %325 = vmatmul.bf16.vlgmr.msra.gmra.mxu0 %v391_v40 }
  0x26   :  { %339 = vmatmul.bf16.vlgmr.msra.gmra.mxu1 %v395_v41 }
  0x27   :  { %353 = vmatmul.bf16.vlgmr.msra.gmra.mxu2 %v399_v42 }
  0x28   :  { %367 = vmatmul.bf16.vlgmr.msra.gmra.mxu3 %v403_v43 }
  0xa2   :  { %v326_v45 = vpop.f32.mrf.mxu0 }
  0xa3   :  { %v327_v46 = vadd.f32 %v571_v44, %v326_v45  ;;  %v340_v47 = vpop.f32.mrf.mxu1 }
  0xa5   :  { %v341_v48 = vadd.f32 %v340_v47, %v327_v46 }
  0xaa   :  { %v354_v50 = vpop.f32.mrf.mxu2  ;;  %v328_v54 = vpop.f32.mrf.mxu0 }
  0xab   :  { %v368_v51 = vpop.f32.mrf.mxu3  ;;  %v355_v52 = vadd.f32 %v354_v50, %v341_v48  ;;  %v329_v56 = vadd.f32 %v571_v44, %v328_v54  ;;  %v342_v58 = vpop.f32.mrf.mxu1 }
  0xad   :  { %v369_v55 = vadd.f32 %v368_v51, %v355_v52  ;;  %v343_v61 = vadd.f32 %v342_v58, %v329_v56 }
  0xaf   :  { %v377_v57 = vadd.f32 %v375_v53, %v369_v55 }
  0xb1   :  { %v379_v60 = vpack.c.bf16 %v377_v57, %v377_v57 }
  0xb2   :  { %v356_v62 = vpop.f32.mrf.mxu2 }
  0xb3   :  { %381 = vst [vmem:[%s672_s4] sm:$0xf] %v379_v60  ;;  %v357_v63 = vadd.f32 %v356_v62, %v343_v61  ;;  %v370_v1 = vpop.f32.mrf.mxu3 }
  0xb5   :  { %v371_v2 = vadd.f32 %v370_v1, %v357_v63 }
  0xb7   :  { %v378_v3 = vadd.f32 %v376_v0, %v371_v2 }
  0xb9   :  { %v380_v4 = vpack.c.bf16 %v378_v3, %v378_v3 }
  0xbb   :  { %382 = vst [vmem:[%s672_s4 + $0x4] sm:$0x1] %v380_v4 }
  0xbc   :  { %387 = vsyncpa [#allocation3], 1 }

// kernel: clip_vit_forward.28
= control target key start
LH: loop header
LB: loop body
LE: loop exit
PB: predicated region body
PF: predicated region fallthrough
CT: control target
= control target key end

     0   :  { %vm23_vm0 = vcmask 1041408   ;;  %v221_v5 = vmov 128.0   ;;  %vm164_vm8 = vcmask 519168   ;;  %vm166_vm9 = vcmask 516096   ;;  %s291_s0 = inlined_call_operand.vmem [shape: bf16[10,128], index: 0, kind: input, shape index: {}]   ;;  %s292_s2 = inlined_call_operand.vmem [shape: f32[1,128], index: 2, kind: input, shape index: {}]   ;;  %s293_s3 = inlined_call_operand.vmem [shape: f32[1,128], index: 3, kind: input, shape index: {}]   ;;  %s294_s1 = inlined_call_operand.vmem [shape: bf16[128,64], index: 1, kind: input, shape index: {}]   ;;  %s295_s4 = inlined_call_operand.vmem [shape: bf16[10,64], index: 4, kind: output, shape index: {}]  }
   0x1   :  { %v18_v0 = vld [vmem:[%s291_s0 + $0x4] sm:$0x1]  ;;  %v17_v3 = vld [vmem:[%s291_s0] sm:$0xf]  ;;  %215 = vrcp.f32 %v221_v5  ;;  %v211_v21 = vld [vmem:[%s294_s1 + $0x38] sm:$0xff] }
   0x2   :  { %v20_v1 = vunpack.c.l.bf16 %v18_v0  ;;  %v19_v4 = vunpack.c.l.bf16 %v17_v3  ;;  %148 = vmatpush.bf16.msra.mxu0 %v211_v21  ;;  %v210_v22 = vld [vmem:[%s294_s1 + $0x30] sm:$0xff]  ;;  %v209_v23 = vld [vmem:[%s294_s1 + $0x28] sm:$0xff]  ;;  %v208_v24 = vld [vmem:[%s294_s1 + $0x20] sm:$0xff] }
   0x3   :  { %v207_v25 = vld [vmem:[%s294_s1 + $0x18] sm:$0xff]  ;;  %v206_v26 = vld [vmem:[%s294_s1 + $0x10] sm:$0xff]  ;;  %v205_v27 = vld [vmem:[%s294_s1 + $0x8] sm:$0xff] }
   0x4   :  { %v24_v2 = vsel %vm23_vm0, %v20_v1, 0.0  ;;  %v204_v29 = vld [vmem:[%s294_s1] sm:$0xff] }
   0x5   :  { %25 = vadd.xlane.f32.xlu0 %v24_v2  ;;  %v213_v48 = vld [vmem:[%s292_s2] ss:$0 sm:$0xff] }
   0x6   :  { %149 = vmatpush.bf16.msra.mxu0 %v210_v22  ;;  %v214_v53 = vld [vmem:[%s293_s3] ss:$0 sm:$0xff] }
   0x7   :  { %v216_v6 = vpop.eup %215 }
   0x8   :  { %v28_v7 = vmul.f32 128.0, %v216_v6  ;;  %vm32_vm1 = vweird.f32 %v216_v6 }
   0xa   :  { %v29_v8 = vsub.f32 1.0, %v28_v7  ;;  %150 = vmatpush.bf16.msra.mxu0 %v209_v23 }
   0xc   :  { %v30_v9 = vmul.f32 %v216_v6, %v29_v8 }
   0xd   :  { %21 = vadd.xlane.f32.xlu0 %v19_v4 }
   0xe   :  { %v31_v11 = vadd.f32 %v216_v6, %v30_v9  ;;  %151 = vmatpush.bf16.msra.mxu0 %v208_v24 }
  0x10   :  { %v33_v12 = vsel %vm32_vm1, %v216_v6, %v31_v11 }
  0x12   :  { %152 = vmatpush.bf16.msra.mxu0 %v207_v25 }
  0x16   :  { %153 = vmatpush.bf16.msra.mxu0 %v206_v26 }
  0x1a   :  { %154 = vmatpush.bf16.msra.mxu0 %v205_v27 }
  0x1e   :  { %155 = vmatpush.bf16.msra.mxu0 %v204_v29 }
  0x78   :  { %v26_v10 = vpop.xlane.xlu0 %25 }
  0x79   :  { %v35_v15 = vmul.f32 %v33_v12, %v26_v10 }
  0x7b   :  { %v37_v18 = vsub.f32 %v20_v1, %v35_v15 }
  0x7d   :  { %v39_v19 = vmul.f32 %v37_v18, %v37_v18 }
  0x7f   :  { %v42_v20 = vsel %vm23_vm0, %v39_v19, 0.0 }
  0x80   :  { %v22_v13 = vpop.xlane.xlu0 %21 }
  0x81   :  { %v34_v14 = vmul.f32 %v33_v12, %v22_v13 }
  0x83   :  { %v36_v16 = vsub.f32 %v19_v4, %v34_v14 }
  0x85   :  { %v38_v17 = vmul.f32 %v36_v16, %v36_v16 }
  0x87   :  { %40 = vadd.xlane.f32.xlu1 %v38_v17 }
  0x8f   :  { %43 = vadd.xlane.f32.xlu1 %v42_v20 }
  0xfa   :  { %v41_v28 = vpop.xlane.xlu1 %40 }
  0xfb   :  { %v45_v30 = vmul.f32 %v41_v28, %v33_v12 }
  0xfd   :  { %v47_v31 = vadd.f32 1e-05, %v45_v30 }
  0xff   :  { %217 = vrsqrt.f32 %v47_v31  ;;  %vm55_vm3 = vweird.f32 %v47_v31 }
 0x102   :  { %v44_v32 = vpop.xlane.xlu1 %43 }
 0x103   :  { %v46_v33 = vmul.f32 %v44_v32, %v33_v12 }
 0x105   :  { %v218_v34 = vpop.eup %217  ;;  %v48_v35 = vadd.f32 1e-05, %v46_v33 }
 0x106   :  { %v50_v36 = vmul.f32 %v218_v34, %v47_v31  ;;  %vm56_vm2 = vweird.f32 %v218_v34 }
 0x107   :  { %219 = vrsqrt.f32 %v48_v35  ;;  %vm57_vm4 = vmor %vm55_vm3, %vm56_vm2  ;;  %vm65_vm6 = vweird.f32 %v48_v35 }
 0x108   :  { %v51_v37 = vmul.f32 %v218_v34, %v50_v36 }
 0x10a   :  { %v52_v38 = vmul.f32 0.5, %v51_v37 }
 0x10c   :  { %v53_v39 = vsub.f32 1.5, %v52_v38 }
 0x10d   :  { %v220_v40 = vpop.eup %219 }
 0x10e   :  { %v54_v41 = vmul.f32 %v218_v34, %v53_v39  ;;  %v60_v42 = vmul.f32 %v220_v40, %v48_v35  ;;  %vm66_vm5 = vweird.f32 %v220_v40 }
 0x10f   :  { %vm67_vm7 = vmor %vm65_vm6, %vm66_vm5 }
 0x110   :  { %v61_v43 = vmul.f32 %v220_v40, %v60_v42  ;;  %v58_v45 = vsel %vm57_vm4, %v218_v34, %v54_v41 }
 0x111   :  { %v69_v47 = vmul.f32 %v58_v45, %v36_v16 }
 0x112   :  { %v62_v44 = vmul.f32 0.5, %v61_v43 }
 0x113   :  { %v75_v52 = vmul.f32 %v213_v48, %v69_v47 }
 0x114   :  { %v63_v46 = vsub.f32 1.5, %v62_v44 }
 0x115   :  { %v81_v55 = vadd.f32 %v214_v53, %v75_v52 }
 0x116   :  { %v64_v49 = vmul.f32 %v220_v40, %v63_v46 }
 0x118   :  { %v68_v50 = vsel %vm67_vm7, %v220_v40, %v64_v49 }
 0x119   :  { %v70_v51 = vmul.f32 %v68_v50, %v37_v18 }
 0x11b   :  { %v76_v54 = vmul.f32 %v213_v48, %v70_v51 }
 0x11d   :  { %v82_v56 = vadd.f32 %v214_v53, %v76_v54 }
 0x11f   :  { %v83_v57 = vpack.c.bf16 %v82_v56, %v81_v55 }
 0x121   :  { %156 = vmatmul.bf16.vlgmr.msra.gmra.mxu0 %v83_v57 }
 0x19e   :  { %v157_v58 = vpop.f32.mrf.mxu0 }
 0x19f   :  { %v162_v59 = vpack.c.bf16 %v157_v58, %v157_v58 }
 0x1a1   :  { %165 = vst.msk [vmem:[%s295_s4] sm:$0xf] %vm164_vm8, %v162_v59 }
 0x1a6   :  { %v159_v60 = vpop.f32.mrf.mxu0 }
 0x1a7   :  { %v163_v61 = vpack.c.bf16 %v159_v60, %v159_v60 }
 0x1a9   :  { %167 = vst.msk [vmem:[%s295_s4 + $0x4] sm:$0x1] %vm166_vm9, %v163_v61 }

// kernel: clip_vit_forward.29
= control target key start
LH: loop header
LB: loop body
LE: loop exit
PB: predicated region body
PF: predicated region fallthrough
CT: control target
= control target key end

     0   :  { %vm45_vm0 = vcmask 523264   ;;  %vm62_vm1 = vcmask 130048   ;;  %s122_s1 = inlined_call_operand.vmem [shape: bf16[64,16], index: 1, kind: input, shape index: {}]   ;;  %s123_s0 = inlined_call_operand.vmem [shape: bf16[8,64], index: 0, kind: input, shape index: {}]   ;;  %s124_s2 = inlined_call_operand.vmem [shape: f32[8,16], index: 2, kind: output, shape index: {}]  }
   0x1   :  { %v88_v0 = vld [vmem:[%s122_s1 + $0x18] sm:$0xff]  ;;  %v87_v1 = vld [vmem:[%s122_s1 + $0x10] sm:$0xff]  ;;  %v86_v2 = vld [vmem:[%s122_s1 + $0x8] sm:$0xff] }
   0x2   :  { %53 = vmatpush.bf16.msra.mxu0 %v88_v0  ;;  %v85_v3 = vld [vmem:[%s122_s1] sm:$0xff] }
   0x3   :  { %v12_v4 = vld [vmem:[%s123_s0] sm:$0xf] }
   0x6   :  { %54 = vmatpush.bf16.msra.mxu0 %v87_v1 }
   0xa   :  { %55 = vmatpush.bf16.msra.mxu0 %v86_v2 }
   0xe   :  { %56 = vmatpush.bf16.msra.mxu0 %v85_v3 }
  0x11   :  { %84 = vmatmul.msk.bf16.vlgmr.msra.gmra.mxu0 %vm45_vm0, %v12_v4 }
  0x8e   :  { %v58_v5 = vpop.f32.mrf.mxu0 }
  0x8f   :  { %63 = vst.msk [vmem:[%s124_s2] sm:$0xff] %vm62_vm1, %v58_v5 }
  0x96   :  { %v60_v6 = vpop.f32.mrf.mxu0 }

// kernel: clip_vit_forward.31
= control target key start
LH: loop header
LB: loop body
LE: loop exit
PB: predicated region body
PF: predicated region fallthrough
CT: control target
= control target key end

     0   :  { %vm15_vm0 = vcmask 123904   ;;  %s125_s0 = inlined_call_operand.vmem [shape: f32[2,16], index: 0, kind: input, shape index: {}]   ;;  %s126_s1 = inlined_call_operand.vmem [shape: f32[2,16], index: 1, kind: input, shape index: {}]   ;;  %s127_s2 = inlined_call_operand.hbm [shape: f32[2,16], index: 2, kind: output, shape index: {}]  }
   0x1   :  { %v12_v0 = vld [vmem:[%s125_s0] sm:$0x3] }
   0x2   :  { %v14_v1 = vmul.f32 %v12_v0, %v12_v0 }
   0x3   :  { %7 = vsyncpa [#allocation3], 0  ;;  %v13_v2 = vld [vmem:[%s126_s1] sm:$0x3]  ;;  %s97_s0 = smov [#allocation2]   ;;  %s57_s15 = sshll.u32 %s127_s2, 4  ;;  %s58_s15 = int_to_ptr.hbm [resolvable:$true] %s57_s15 }
   0x4   :  { %v16_v3 = vsel %vm15_vm0, %v14_v1, 0.0  ;;  %v31_v4 = vmul.f32 %v13_v2, %v13_v2  ;;  %s55_s1 = sshll.u32 %s97_s0, 4  ;;  %s56_s1 = int_to_ptr.vmem [resolvable:$true] %s55_s1 }
   0x5   :  { %17 = vadd.xlane.f32.xlu0 %v16_v3 }
   0x6   :  { %v32_v5 = vsel %vm15_vm0, %v31_v4, 0.0 }
   0xd   :  { %33 = vadd.xlane.f32.xlu0 %v32_v5 }
  0x78   :  { %v18_v6 = vpop.xlane.xlu0 %17 }
  0x79   :  { %v19_v7 = vadd.f32 1e-12, %v18_v6 }
  0x7b   :  { %67 = vrsqrt.f32 %v19_v7  ;;  %vm26_vm2 = vweird.f32 %v19_v7 }
  0x80   :  { %v34_v8 = vpop.xlane.xlu0 %33 }
  0x81   :  { %v68_v9 = vpop.eup %67  ;;  %v35_v10 = vadd.f32 1e-12, %v34_v8 }
  0x82   :  { %v21_v11 = vmul.f32 %v68_v9, %v19_v7  ;;  %vm27_vm1 = vweird.f32 %v68_v9 }
  0x83   :  { %69 = vrsqrt.f32 %v35_v10  ;;  %vm28_vm4 = vmor %vm26_vm2, %vm27_vm1  ;;  %vm42_vm5 = vweird.f32 %v35_v10 }
  0x84   :  { %v22_v12 = vmul.f32 %v68_v9, %v21_v11 }
  0x86   :  { %v23_v13 = vmul.f32 0.5, %v22_v12 }
  0x88   :  { %v24_v15 = vsub.f32 1.5, %v23_v13 }
  0x89   :  { %v70_v14 = vpop.eup %69 }
  0x8a   :  { %v37_v16 = vmul.f32 %v70_v14, %v35_v10  ;;  %v25_v18 = vmul.f32 %v68_v9, %v24_v15  ;;  %vm43_vm3 = vweird.f32 %v70_v14 }
  0x8b   :  { %vm44_vm6 = vmor %vm42_vm5, %vm43_vm3 }
  0x8c   :  { %v38_v17 = vmul.f32 %v70_v14, %v37_v16  ;;  %v29_v21 = vsel %vm28_vm4, %v68_v9, %v25_v18 }
  0x8d   :  { %v30_v24 = vmul.f32 %v29_v21, %v12_v0 }
  0x8e   :  { %v39_v19 = vmul.f32 0.5, %v38_v17 }
  0x90   :  { %v40_v20 = vsub.f32 1.5, %v39_v19 }
  0x92   :  { %v41_v22 = vmul.f32 %v70_v14, %v40_v20 }
  0x94   :  { %v45_v23 = vsel %vm44_vm6, %v70_v14, %v41_v22 }
  0x95   :  { %v46_v25 = vmul.f32 %v45_v23, %v13_v2 }
  0x97   :  { %v47_v26 = vadd.f32 %v46_v25, %v30_v24 }
  0x99   :  { %v48_v27 = vmul.f32 0.5, %v47_v26 }
  0x9b   :  { %49 = vst.msk [vmem:[#allocation2] sm:$0x3] %vm15_vm0, %v48_v27 }
  0x9c   :  { %60 = dma.vmem_to_hbm [thread:$0]  %s56_s1, 32, %s58_s15, [#allocation3]  }
  0x9d   :  { %95 = dma.done.wait [#allocation3], 32  }
  0x9e   :  { %96 = vsyncadd [#allocation3], 4294967264 }
  0x9f   :  { %65 = vsyncpa [#allocation3], 1 }

// kernel: clip_vit_forward.30
= control target key start
LH: loop header
LB: loop body
LE: loop exit
PB: predicated region body
PF: predicated region fallthrough
CT: control target
= control target key end

     0   :  { %vm45_vm0 = vcmask 523264   ;;  %vm62_vm1 = vcmask 123904   ;;  %s122_s1 = inlined_call_operand.vmem [shape: bf16[64,16], index: 1, kind: input, shape index: {}]   ;;  %s123_s0 = inlined_call_operand.vmem [shape: bf16[2,64], index: 0, kind: input, shape index: {}]   ;;  %s124_s2 = inlined_call_operand.vmem [shape: f32[2,16], index: 2, kind: output, shape index: {}]  }
   0x1   :  { %v88_v0 = vld [vmem:[%s122_s1 + $0x18] sm:$0xff]  ;;  %v87_v1 = vld [vmem:[%s122_s1 + $0x10] sm:$0xff]  ;;  %v86_v2 = vld [vmem:[%s122_s1 + $0x8] sm:$0xff] }
   0x2   :  { %53 = vmatpush.bf16.msra.mxu0 %v88_v0  ;;  %v85_v3 = vld [vmem:[%s122_s1] sm:$0xff] }
   0x3   :  { %v12_v4 = vld [vmem:[%s123_s0] sm:$0x1] }
   0x6   :  { %54 = vmatpush.bf16.msra.mxu0 %v87_v1 }
   0xa   :  { %55 = vmatpush.bf16.msra.mxu0 %v86_v2 }
   0xe   :  { %56 = vmatpush.bf16.msra.mxu0 %v85_v3 }
  0x11   :  { %84 = vmatmul.msk.bf16.vlgmr.msra.gmra.mxu0 %vm45_vm0, %v12_v4 }
  0x8e   :  { %v58_v5 = vpop.f32.mrf.mxu0 }
  0x8f   :  { %63 = vst.msk [vmem:[%s124_s2] sm:$0x3] %vm62_vm1, %v58_v5 }
  0x96   :  { %v60_v6 = vpop.f32.mrf.mxu0 }

</bundles_post_ra>
